<compile_context>
chip_gen: v7x
topology: tpu7x:2x2x1
jax: 0.10.0
libtpu: 0.0.40
codegen_flags: <defaults>
</compile_context>

<pallas_src>
import functools

import jax
import jax.numpy as jnp
import numpy as np
from jax.experimental import pallas as pl
from jax.experimental.pallas import tpu as pltpu


def _elu(x):
    return jnp.where(x > 0, x, jnp.exp(x) - 1.0)


def _gat_attn_kernel(h_ref, elT_ref, er_ref, b_ref, adj_ref, out_ref,
                     m_sc, l_sc, acc_sc, *, H, F, inner_act, mean_heads):
    """Masked edge-softmax + aggregation for one (dst tile, src tile) grid step.

    Online-softmax state (running max / denominator / weighted sum, per head) lives in
    VMEM scratch; it is initialized on the first src step and finalized (normalize, bias,
    activations, single wide store) on the last src step.
    """
    sj = pl.program_id(1)

    @pl.when(sj == 0)
    def _():
        m_sc[...] = jnp.full_like(m_sc, -1e30)
        l_sc[...] = jnp.zeros_like(l_sc)
        acc_sc[...] = jnp.zeros_like(acc_sc)

    # Single additive mask per tile (adjacency is {0,1} int8) — no per-head selects.
    adj = adj_ref[...].astype(jnp.float32)                       # (tm, tk)
    mask_bias = (adj - 1.0) * jnp.float32(1e30)                  # 0 on edges, -1e30 otherwise

    h_src = h_ref[...]                                           # (tk, H*F) bf16
    er = er_ref[...]                                             # (tm, H)   f32
    elT = elT_ref[...]                                           # (H, tk)   f32
    # Row-max floor: exp() of fully-masked rows stays exactly 0, so zero-in-degree dst
    # nodes get denom == 0 -> bias-only output (DGL allow_zero_in_degree=True semantics).
    floor = jnp.float32(-1e28)

    for hd in range(H):                                          # static unroll over heads
        e = er[:, hd:hd + 1] + elT[hd:hd + 1, :]                 # (tm, tk) logits
        e = jnp.maximum(e, 0.2 * e)                              # leaky_relu(0.2)
        em = e + mask_bias
        m_old = m_sc[:, hd:hd + 1]
        m_new = jnp.maximum(m_old, jnp.max(em, axis=1, keepdims=True))
        c_old = jnp.maximum(m_old, floor)
        c_new = jnp.maximum(m_new, floor)
        scale = jnp.exp(c_old - c_new)                           # (tm, 1) rescale old state
        p = jnp.exp(em - c_new)                                  # masked lanes underflow to 0
        l_sc[:, hd:hd + 1] = scale * l_sc[:, hd:hd + 1] + jnp.sum(p, axis=1, keepdims=True)
        acc_sc[:, hd * F:(hd + 1) * F] = (
            scale * acc_sc[:, hd * F:(hd + 1) * F]
            + jnp.dot(p.astype(jnp.bfloat16), h_src[:, hd * F:(hd + 1) * F],
                      preferred_element_type=jnp.float32))
        m_sc[:, hd:hd + 1] = m_new

    @pl.when(sj == pl.num_programs(1) - 1)
    def _():
        l = l_sc[...]                                            # (tm, H)
        inv = pl.reciprocal(jnp.where(l == 0.0, 1.0, l), approx=True)
        bias = b_ref[...]                                        # (1, H*F)
        if mean_heads:                                           # last layer: mean over heads
            out = None
            for hd in range(H):
                o = (acc_sc[:, hd * F:(hd + 1) * F] * inv[:, hd:hd + 1]
                     + bias[:, hd * F:(hd + 1) * F])
                out = o if out is None else out + o
            out = out * jnp.float32(1.0 / H)
        else:                                                    # hidden layers: flatten heads
            for hd in range(H):
                acc_sc[:, hd * F:(hd + 1) * F] = (
                    acc_sc[:, hd * F:(hd + 1) * F] * inv[:, hd:hd + 1])
            out = acc_sc[...] + bias
        for _ in range(inner_act):                               # GATConv ELU + outer ELU
            out = _elu(out)
        out_ref[...] = out.astype(out_ref.dtype)                 # one wide store per dst tile


def _tile_caps():
    """Per-generation dst/src tile caps derived from VMEM capacity."""
    try:
        vmem = pltpu.get_tpu_info().vmem_capacity_bytes
    except Exception:
        vmem = 128 << 20
    if vmem <= (64 << 20):            # v7x-class TensorCore: 64 MiB VMEM
        return 256, 512
    return 512, 1024                  # v5e / v6e: 128 MiB VMEM


def _pick_tile(n, cap):
    """Largest multiple of 32 <= cap that divides n (or n itself if it already fits)."""
    if n <= cap:
        return n
    t = cap - cap % 32
    while t >= 32:
        if n % t == 0:
            return t
        t -= 32
    # TODO(synk): pad N up to a multiple of 128 for ragged graphs instead of falling back.
    return n


def _vmem_estimate_bytes(tm, tk, H, F, out_dim, out_itemsize):
    HF = H * F
    est = 2 * tm * tk * 1                              # adjacency tile (int8), double-buffered
    est += 2 * tk * HF * 2                             # projected feats (bf16)
    est += 2 * H * tk * 4 + 2 * tm * H * 4 + 2 * HF * 4
    est += 2 * tm * out_dim * out_itemsize
    est += tm * (2 * H + HF) * 4                       # online-softmax scratch
    est += 6 * tm * tk * 4                             # live f32 temps (e/em/p/mask + headroom)
    return est


def gat_layer(h_in, w, al, ar, b, adj_i8, *, H, F, inner_act, mean_heads,
              tm=None, tk=None):
    """One GATConv layer: hoisted projection + Pallas masked-softmax/aggregation kernel."""
    N = h_in.shape[0]
    HF = H * F
    out_dim = F if mean_heads else HF
    out_dtype = jnp.float32 if mean_heads else jnp.bfloat16      # hidden layers stay bf16

    # ---- hoisted per-layer projection: ONE bf16 MXU matmul (was redone per dst tile) ----
    h_f32 = jnp.dot(h_in.astype(jnp.bfloat16), w.astype(jnp.bfloat16),
                    preferred_element_type=jnp.float32)          # (N, H*F)
    hr = h_f32.reshape(N, H, F)
    elT = jnp.einsum('nhf,hf->hn', hr, al)                       # (H, N) source logits
    er = jnp.einsum('nhf,hf->nh', hr, ar)                        # (N, H) destination logits
    h_bf16 = h_f32.astype(jnp.bfloat16)                          # MXU aggregation operand

    tm_cap, tk_cap = _tile_caps()
    if tm is None:
        tm = _pick_tile(N, tm_cap)
    if tk is None:
        tk = _pick_tile(N, tk_cap)
    assert N % tm == 0 and N % tk == 0, "pad N to a multiple of the tile size"
    grid = (N // tm, N // tk)          # NOTE: keep N // tm even for v7x's two TensorCores

    est = _vmem_estimate_bytes(tm, tk, H, F, out_dim, jnp.dtype(out_dtype).itemsize)
    vmem_limit = int(min(est * 1.25, 100 << 20)) if est > (16 << 20) else None

    kernel = functools.partial(_gat_attn_kernel, H=H, F=F,
                               inner_act=inner_act, mean_heads=mean_heads)

    return pl.pallas_call(
        kernel,
        out_shape=jax.ShapeDtypeStruct((N, out_dim), out_dtype),
        grid=grid,
        in_specs=[
            pl.BlockSpec((tk, HF), lambda i, j: (j, 0)),     # projected feats, src tile (bf16)
            pl.BlockSpec((H, tk), lambda i, j: (0, j)),      # el^T, src tile
            pl.BlockSpec((tm, H), lambda i, j: (i, 0)),      # er, dst tile
            pl.BlockSpec((1, HF), lambda i, j: (0, 0)),      # bias
            # TODO(synk): if the adjacency DMA shows up exposed, add
            # pipeline_mode=pl.Buffered(3) and/or pack it as a bitmask (8 edges/byte).
            pl.BlockSpec((tm, tk), lambda i, j: (i, j)),     # adjacency tile (int8)
        ],
        out_specs=pl.BlockSpec((tm, out_dim), lambda i, j: (i, 0)),
        scratch_shapes=[
            pltpu.VMEM((tm, H), jnp.float32),     # running max      (per head)
            pltpu.VMEM((tm, H), jnp.float32),     # running denom    (per head)
            pltpu.VMEM((tm, HF), jnp.float32),    # running weighted sum (per head)
        ],
        compiler_params=pltpu.CompilerParams(
            dimension_semantics=("parallel", "arbitrary"),
            vmem_limit_bytes=vmem_limit),
    )(h_bf16, elT, er, b, adj_i8)


def gat_forward(adjs, x, params, *, tm=None, tk=None):
    """3-layer GAT forward.  adjs[l][dst, src] != 0 marks an edge of DGL block l."""
    adjs_i8 = [(a != 0).astype(jnp.int8) for a in adjs]
    h = x
    n_layers = len(params)
    for l, p in enumerate(params):
        last = (l == n_layers - 1)
        h = gat_layer(h, p["w"], p["al"], p["ar"], p["b"], adjs_i8[l],
                      H=p["H"], F=p["F"],
                      inner_act=0 if last else 2,      # GATConv ELU + outer ELU
                      mean_heads=last, tm=tm, tk=tk)
    return h


# ---------------- pure-JAX f32 reference (for correctness check only) ----------------
def _gat_layer_ref(x, w, al, ar, b, adj, inner_act, mean_heads, H, F):
    N = x.shape[0]
    h = x @ w
    hr = h.reshape(N, H, F)
    el = jnp.einsum('nhf,hf->nh', hr, al)
    er = jnp.einsum('nhf,hf->nh', hr, ar)
    e = er[:, None, :] + el[None, :, :]                           # (Nd, Ns, H)
    e = jnp.where(e > 0, e, 0.2 * e)
    mask = (adj > 0)[..., None]
    em = jnp.where(mask, e, -1e30)
    emax = em.max(axis=1, keepdims=True)
    p = jnp.where(mask, jnp.exp(em - emax), 0.0)
    denom = p.sum(axis=1, keepdims=True)
    alpha = p / jnp.where(denom == 0.0, 1.0, denom)
    out = jnp.einsum('dsh,shf->dhf', alpha, hr) + b.reshape(1, H, F)
    out = out.mean(axis=1) if mean_heads else out.reshape(N, H * F)
    for _ in range(inner_act):
        out = jnp.where(out > 0, out, jnp.exp(out) - 1.0)
    return out


if __name__ == "__main__":
    key = jax.random.PRNGKey(0)
    N = 256                                   # nodes (small; lets 128-wide tiles divide evenly)
    in_feats, n_hidden, n_classes = 16, 8, 8
    heads = (4, 4, 4)

    layer_dims = [
        (in_feats, heads[0], n_hidden),
        (n_hidden * heads[0], heads[1], n_hidden),
        (n_hidden * heads[1], heads[2], n_classes),
    ]

    keys = jax.random.split(key, 20)
    ki = 0
    params = []
    for (din, H, F) in layer_dims:
        w = 0.1 * jax.random.normal(keys[ki], (din, H * F), jnp.float32); ki += 1
        al = 0.1 * jax.random.normal(keys[ki], (H, F), jnp.float32); ki += 1
        ar = 0.1 * jax.random.normal(keys[ki], (H, F), jnp.float32); ki += 1
        b = 0.1 * jax.random.normal(keys[ki], (1, H * F), jnp.float32); ki += 1
        params.append(dict(w=w, al=al, ar=ar, b=b, H=H, F=F))

    x = jax.random.normal(keys[ki], (N, in_feats), jnp.float32); ki += 1

    adjs = []
    for _ in range(3):
        a = (jax.random.uniform(keys[ki], (N, N)) < 0.05).astype(jnp.float32); ki += 1
        a = jnp.maximum(a, jnp.eye(N, dtype=jnp.float32))        # self loops
        adjs.append(a)

    # Explicit small tiles: exercises the multi-dst-tile ("parallel", even for megacore)
    # and multi-src-tile online-softmax path with a (2, 2) grid.
    out_tiled = jax.block_until_ready(gat_forward(adjs, x, params, tm=128, tk=128))
    # Default generation-aware tile heuristic (single-tile path at this problem size).
    out_auto = jax.block_until_ready(gat_forward(adjs, x, params))

    ref = x
    for l, p in enumerate(params):
        last = (l == 2)
        ref = _gat_layer_ref(ref, p["w"], p["al"], p["ar"], p["b"], adjs[l],
                             0 if last else 2, last, p["H"], p["F"])

    # bf16 MXU operands / bf16 hidden activations / approximate EUP reciprocal => loose tol.
    np.testing.assert_allclose(np.asarray(out_tiled), np.asarray(ref), rtol=2e-2, atol=2e-2)
    np.testing.assert_allclose(np.asarray(out_auto), np.asarray(ref), rtol=2e-2, atol=2e-2)

    print("KERNEL_OK")
</pallas_src>

<mosaic_0001>
module attributes {stable_mosaic.version = 11 : i64} {
  func.func @_gat_attn_kernel(%arg0: i32, %arg1: i32, %arg2: memref<128x32xbf16, #tpu.memory_space<vmem>>, %arg3: memref<4x128xf32, #tpu.memory_space<vmem>>, %arg4: memref<128x4xf32, #tpu.memory_space<vmem>>, %arg5: memref<1x32xf32, #tpu.memory_space<vmem>>, %arg6: memref<128x128xi8, #tpu.memory_space<vmem>>, %arg7: memref<128x32xbf16, #tpu.memory_space<vmem>>, %arg8: memref<128x4xf32, #tpu.memory_space<vmem>>, %arg9: memref<128x4xf32, #tpu.memory_space<vmem>>, %arg10: memref<128x32xf32, #tpu.memory_space<vmem>>) attributes {dimension_semantics = [#tpu.dimension_semantics<parallel>, #tpu.dimension_semantics<arbitrary>], iteration_bounds = array<i64: 2, 2>, scalar_prefetch = 0 : i64, scratch_operands = 3 : i64, tpu.core_type = #tpu.core_type<tc>, window_params = [{transform_indices = @transform_0, window_bounds = array<i64: 128, 32>}, {transform_indices = @transform_1, window_bounds = array<i64: 4, 128>}, {transform_indices = @transform_2, window_bounds = array<i64: 128, 4>}, {pipeline_mode = #tpu.pipeline_mode<synchronous>, transform_indices = @transform_3, window_bounds = array<i64: 1, 32>}, {transform_indices = @transform_4, window_bounds = array<i64: 128, 128>}, {transform_indices = @transform_5, window_bounds = array<i64: 128, 32>}]} {
    %c0_i32 = arith.constant 0 : i32
    %0 = arith.cmpi eq, %arg1, %c0_i32 : i32
    %1 = arith.extui %0 : i1 to i32
    %c0_i32_0 = arith.constant 0 : i32
    %2 = arith.cmpi ne, %1, %c0_i32_0 : i32
    scf.if %2 {
      %cst_76 = arith.constant -1.000000e+30 : f32
      %163 = vector.broadcast %cst_76 : f32 to vector<128x4xf32>
      %c0_77 = arith.constant 0 : index
      %c0_78 = arith.constant 0 : index
      %164 = vector.load %arg8[%c0_77, %c0_78] : memref<128x4xf32, #tpu.memory_space<vmem>>, vector<128x4xf32>
      tpu.vector_store %arg8[%c0_77, %c0_78], %163 {strides = array<i32>} : memref<128x4xf32, #tpu.memory_space<vmem>>, vector<128x4xf32>,
      %cst_79 = arith.constant 0.000000e+00 : f32
      %165 = vector.broadcast %cst_79 : f32 to vector<128x4xf32>
      %c0_80 = arith.constant 0 : index
      %c0_81 = arith.constant 0 : index
      %166 = vector.load %arg9[%c0_80, %c0_81] : memref<128x4xf32, #tpu.memory_space<vmem>>, vector<128x4xf32>
      tpu.vector_store %arg9[%c0_80, %c0_81], %165 {strides = array<i32>} : memref<128x4xf32, #tpu.memory_space<vmem>>, vector<128x4xf32>,
      %cst_82 = arith.constant 0.000000e+00 : f32
      %167 = vector.broadcast %cst_82 : f32 to vector<128x32xf32>
      %c0_83 = arith.constant 0 : index
      %c0_84 = arith.constant 0 : index
      %168 = vector.load %arg10[%c0_83, %c0_84] : memref<128x32xf32, #tpu.memory_space<vmem>>, vector<128x32xf32>
      tpu.vector_store %arg10[%c0_83, %c0_84], %167 {strides = array<i32>} : memref<128x32xf32, #tpu.memory_space<vmem>>, vector<128x32xf32>,
    } else {
    }
    %c0 = arith.constant 0 : index
    %c0_1 = arith.constant 0 : index
    %3 = vector.load %arg6[%c0, %c0_1] : memref<128x128xi8, #tpu.memory_space<vmem>>, vector<128x128xi8>
    %4 = arith.sitofp %3 : vector<128x128xi8> to vector<128x128xf32>
    %cst = arith.constant 1.000000e+00 : f32
    %5 = vector.broadcast %cst : f32 to vector<128x128xf32>
    %6 = arith.subf %4, %5 : vector<128x128xf32>
    %cst_2 = arith.constant 1.000000e+30 : f32
    %7 = vector.broadcast %cst_2 : f32 to vector<128x128xf32>
    %8 = arith.mulf %6, %7 : vector<128x128xf32>
    %c0_3 = arith.constant 0 : index
    %c0_4 = arith.constant 0 : index
    %9 = vector.load %arg2[%c0_3, %c0_4] : memref<128x32xbf16, #tpu.memory_space<vmem>>, vector<128x32xbf16>
    %c0_5 = arith.constant 0 : index
    %c0_6 = arith.constant 0 : index
    %10 = vector.load %arg4[%c0_5, %c0_6] : memref<128x4xf32, #tpu.memory_space<vmem>>, vector<128x4xf32>
    %c0_7 = arith.constant 0 : index
    %c0_8 = arith.constant 0 : index
    %11 = vector.load %arg3[%c0_7, %c0_8] : memref<4x128xf32, #tpu.memory_space<vmem>>, vector<4x128xf32>
    %12 = vector.extract_strided_slice %10 {offsets = [0, 0], sizes = [128, 1], strides = [1, 1]} : vector<128x4xf32> to vector<128x1xf32>
    %13 = vector.extract_strided_slice %11 {offsets = [0, 0], sizes = [1, 128], strides = [1, 1]} : vector<4x128xf32> to vector<1x128xf32>
    %14 = vector.broadcast %12 : vector<128x1xf32> to vector<128x128xf32>
    %15 = vector.broadcast %13 : vector<1x128xf32> to vector<128x128xf32>
    %16 = arith.addf %14, %15 : vector<128x128xf32>
    %cst_9 = arith.constant 2.000000e-01 : f32
    %17 = vector.broadcast %cst_9 : f32 to vector<128x128xf32>
    %18 = arith.mulf %17, %16 : vector<128x128xf32>
    %19 = arith.maximumf %16, %18 : vector<128x128xf32>
    %20 = arith.addf %19, %8 : vector<128x128xf32>
    %c0_10 = arith.constant 0 : index
    %c0_11 = arith.constant 0 : index
    %21 = vector.load %arg8[%c0_10, %c0_11] : memref<128x4xf32, #tpu.memory_space<vmem>>, vector<128x1xf32>
    %cst_12 = arith.constant dense<0xFF800000> : vector<128xf32>
    %22 = vector.multi_reduction <maximumf>, %20, %cst_12 [1] : vector<128x128xf32> to vector<128xf32>
    %23 = vector.shape_cast %22 : vector<128xf32> to vector<128x1xf32>
    %24 = arith.maximumf %21, %23 : vector<128x1xf32>
    %cst_13 = arith.constant -9.99999944E+27 : f32
    %25 = vector.broadcast %cst_13 : f32 to vector<128x1xf32>
    %26 = arith.maximumf %21, %25 : vector<128x1xf32>
    %cst_14 = arith.constant -9.99999944E+27 : f32
    %27 = vector.broadcast %cst_14 : f32 to vector<128x1xf32>
    %28 = arith.maximumf %24, %27 : vector<128x1xf32>
    %29 = arith.subf %26, %28 : vector<128x1xf32>
    %30 = math.exp %29 : vector<128x1xf32>
    %31 = vector.broadcast %28 : vector<128x1xf32> to vector<128x128xf32>
    %32 = arith.subf %20, %31 : vector<128x128xf32>
    %33 = math.exp %32 : vector<128x128xf32>
    %c0_15 = arith.constant 0 : index
    %c0_16 = arith.constant 0 : index
    %34 = vector.load %arg9[%c0_15, %c0_16] : memref<128x4xf32, #tpu.memory_space<vmem>>, vector<128x1xf32>
    %35 = arith.mulf %30, %34 : vector<128x1xf32>
    %cst_17 = arith.constant dense<0.000000e+00> : vector<128xf32>
    %36 = vector.multi_reduction <add>, %33, %cst_17 [1] : vector<128x128xf32> to vector<128xf32>
    %37 = vector.shape_cast %36 : vector<128xf32> to vector<128x1xf32>
    %38 = arith.addf %35, %37 : vector<128x1xf32>
    %c0_18 = arith.constant 0 : index
    %c0_19 = arith.constant 0 : index
    %39 = vector.load %arg9[%c0_18, %c0_19] : memref<128x4xf32, #tpu.memory_space<vmem>>, vector<128x1xf32>
    tpu.vector_store %arg9[%c0_18, %c0_19], %38 {strides = array<i32>} : memref<128x4xf32, #tpu.memory_space<vmem>>, vector<128x1xf32>,
    %c0_20 = arith.constant 0 : index
    %c0_21 = arith.constant 0 : index
    %40 = vector.load %arg10[%c0_20, %c0_21] : memref<128x32xf32, #tpu.memory_space<vmem>>, vector<128x8xf32>
    %41 = vector.broadcast %30 : vector<128x1xf32> to vector<128x8xf32>
    %42 = arith.mulf %41, %40 : vector<128x8xf32>
    %43 = arith.truncf %33 : vector<128x128xf32> to vector<128x128xbf16>
    %44 = vector.extract_strided_slice %9 {offsets = [0, 0], sizes = [128, 8], strides = [1, 1]} : vector<128x32xbf16> to vector<128x8xbf16>
    %cst_22 = arith.constant dense<0.000000e+00> : vector<128x8xf32>
    %45 = tpu.matmul %43, %44, %cst_22 {dimension_numbers = #tpu.dot_dimension_numbers<[1], [0], [0], [1], [0, 0, 1, 1], [], []>} : vector<128x128xbf16>, vector<128x8xbf16>, vector<128x8xf32> -> vector<128x8xf32>
    %46 = arith.addf %42, %45 : vector<128x8xf32>
    %c0_23 = arith.constant 0 : index
    %c0_24 = arith.constant 0 : index
    %47 = vector.load %arg10[%c0_23, %c0_24] : memref<128x32xf32, #tpu.memory_space<vmem>>, vector<128x8xf32>
    tpu.vector_store %arg10[%c0_23, %c0_24], %46 {strides = array<i32>} : memref<128x32xf32, #tpu.memory_space<vmem>>, vector<128x8xf32>,
    %c0_25 = arith.constant 0 : index
    %c0_26 = arith.constant 0 : index
    %48 = vector.load %arg8[%c0_25, %c0_26] : memref<128x4xf32, #tpu.memory_space<vmem>>, vector<128x1xf32>
    tpu.vector_store %arg8[%c0_25, %c0_26], %24 {strides = array<i32>} : memref<128x4xf32, #tpu.memory_space<vmem>>, vector<128x1xf32>,
    %49 = vector.extract_strided_slice %10 {offsets = [0, 1], sizes = [128, 1], strides = [1, 1]} : vector<128x4xf32> to vector<128x1xf32>
    %50 = vector.extract_strided_slice %11 {offsets = [1, 0], sizes = [1, 128], strides = [1, 1]} : vector<4x128xf32> to vector<1x128xf32>
    %51 = vector.broadcast %49 : vector<128x1xf32> to vector<128x128xf32>
    %52 = vector.broadcast %50 : vector<1x128xf32> to vector<128x128xf32>
    %53 = arith.addf %51, %52 : vector<128x128xf32>
    %cst_27 = arith.constant 2.000000e-01 : f32
    %54 = vector.broadcast %cst_27 : f32 to vector<128x128xf32>
    %55 = arith.mulf %54, %53 : vector<128x128xf32>
    %56 = arith.maximumf %53, %55 : vector<128x128xf32>
    %57 = arith.addf %56, %8 : vector<128x128xf32>
    %c0_28 = arith.constant 0 : index
    %c1 = arith.constant 1 : index
    %58 = vector.load %arg8[%c0_28, %c1] : memref<128x4xf32, #tpu.memory_space<vmem>>, vector<128x1xf32>
    %cst_29 = arith.constant dense<0xFF800000> : vector<128xf32>
    %59 = vector.multi_reduction <maximumf>, %57, %cst_29 [1] : vector<128x128xf32> to vector<128xf32>
    %60 = vector.shape_cast %59 : vector<128xf32> to vector<128x1xf32>
    %61 = arith.maximumf %58, %60 : vector<128x1xf32>
    %cst_30 = arith.constant -9.99999944E+27 : f32
    %62 = vector.broadcast %cst_30 : f32 to vector<128x1xf32>
    %63 = arith.maximumf %58, %62 : vector<128x1xf32>
    %cst_31 = arith.constant -9.99999944E+27 : f32
    %64 = vector.broadcast %cst_31 : f32 to vector<128x1xf32>
    %65 = arith.maximumf %61, %64 : vector<128x1xf32>
    %66 = arith.subf %63, %65 : vector<128x1xf32>
    %67 = math.exp %66 : vector<128x1xf32>
    %68 = vector.broadcast %65 : vector<128x1xf32> to vector<128x128xf32>
    %69 = arith.subf %57, %68 : vector<128x128xf32>
    %70 = math.exp %69 : vector<128x128xf32>
    %c0_32 = arith.constant 0 : index
    %c1_33 = arith.constant 1 : index
    %71 = vector.load %arg9[%c0_32, %c1_33] : memref<128x4xf32, #tpu.memory_space<vmem>>, vector<128x1xf32>
    %72 = arith.mulf %67, %71 : vector<128x1xf32>
    %cst_34 = arith.constant dense<0.000000e+00> : vector<128xf32>
    %73 = vector.multi_reduction <add>, %70, %cst_34 [1] : vector<128x128xf32> to vector<128xf32>
    %74 = vector.shape_cast %73 : vector<128xf32> to vector<128x1xf32>
    %75 = arith.addf %72, %74 : vector<128x1xf32>
    %c0_35 = arith.constant 0 : index
    %c1_36 = arith.constant 1 : index
    %76 = vector.load %arg9[%c0_35, %c1_36] : memref<128x4xf32, #tpu.memory_space<vmem>>, vector<128x1xf32>
    tpu.vector_store %arg9[%c0_35, %c1_36], %75 {strides = array<i32>} : memref<128x4xf32, #tpu.memory_space<vmem>>, vector<128x1xf32>,
    %c0_37 = arith.constant 0 : index
    %c8 = arith.constant 8 : index
    %77 = vector.load %arg10[%c0_37, %c8] : memref<128x32xf32, #tpu.memory_space<vmem>>, vector<128x8xf32>
    %78 = vector.broadcast %67 : vector<128x1xf32> to vector<128x8xf32>
    %79 = arith.mulf %78, %77 : vector<128x8xf32>
    %80 = arith.truncf %70 : vector<128x128xf32> to vector<128x128xbf16>
    %81 = vector.extract_strided_slice %9 {offsets = [0, 8], sizes = [128, 8], strides = [1, 1]} : vector<128x32xbf16> to vector<128x8xbf16>
    %cst_38 = arith.constant dense<0.000000e+00> : vector<128x8xf32>
    %82 = tpu.matmul %80, %81, %cst_38 {dimension_numbers = #tpu.dot_dimension_numbers<[1], [0], [0], [1], [0, 0, 1, 1], [], []>} : vector<128x128xbf16>, vector<128x8xbf16>, vector<128x8xf32> -> vector<128x8xf32>
    %83 = arith.addf %79, %82 : vector<128x8xf32>
    %c0_39 = arith.constant 0 : index
    %c8_40 = arith.constant 8 : index
    %84 = vector.load %arg10[%c0_39, %c8_40] : memref<128x32xf32, #tpu.memory_space<vmem>>, vector<128x8xf32>
    tpu.vector_store %arg10[%c0_39, %c8_40], %83 {strides = array<i32>} : memref<128x32xf32, #tpu.memory_space<vmem>>, vector<128x8xf32>,
    %c0_41 = arith.constant 0 : index
    %c1_42 = arith.constant 1 : index
    %85 = vector.load %arg8[%c0_41, %c1_42] : memref<128x4xf32, #tpu.memory_space<vmem>>, vector<128x1xf32>
    tpu.vector_store %arg8[%c0_41, %c1_42], %61 {strides = array<i32>} : memref<128x4xf32, #tpu.memory_space<vmem>>, vector<128x1xf32>,
    %86 = vector.extract_strided_slice %10 {offsets = [0, 2], sizes = [128, 1], strides = [1, 1]} : vector<128x4xf32> to vector<128x1xf32>
    %87 = vector.extract_strided_slice %11 {offsets = [2, 0], sizes = [1, 128], strides = [1, 1]} : vector<4x128xf32> to vector<1x128xf32>
    %88 = vector.broadcast %86 : vector<128x1xf32> to vector<128x128xf32>
    %89 = vector.broadcast %87 : vector<1x128xf32> to vector<128x128xf32>
    %90 = arith.addf %88, %89 : vector<128x128xf32>
    %cst_43 = arith.constant 2.000000e-01 : f32
    %91 = vector.broadcast %cst_43 : f32 to vector<128x128xf32>
    %92 = arith.mulf %91, %90 : vector<128x128xf32>
    %93 = arith.maximumf %90, %92 : vector<128x128xf32>
    %94 = arith.addf %93, %8 : vector<128x128xf32>
    %c0_44 = arith.constant 0 : index
    %c2 = arith.constant 2 : index
    %95 = vector.load %arg8[%c0_44, %c2] : memref<128x4xf32, #tpu.memory_space<vmem>>, vector<128x1xf32>
    %cst_45 = arith.constant dense<0xFF800000> : vector<128xf32>
    %96 = vector.multi_reduction <maximumf>, %94, %cst_45 [1] : vector<128x128xf32> to vector<128xf32>
    %97 = vector.shape_cast %96 : vector<128xf32> to vector<128x1xf32>
    %98 = arith.maximumf %95, %97 : vector<128x1xf32>
    %cst_46 = arith.constant -9.99999944E+27 : f32
    %99 = vector.broadcast %cst_46 : f32 to vector<128x1xf32>
    %100 = arith.maximumf %95, %99 : vector<128x1xf32>
    %cst_47 = arith.constant -9.99999944E+27 : f32
    %101 = vector.broadcast %cst_47 : f32 to vector<128x1xf32>
    %102 = arith.maximumf %98, %101 : vector<128x1xf32>
    %103 = arith.subf %100, %102 : vector<128x1xf32>
    %104 = math.exp %103 : vector<128x1xf32>
    %105 = vector.broadcast %102 : vector<128x1xf32> to vector<128x128xf32>
    %106 = arith.subf %94, %105 : vector<128x128xf32>
    %107 = math.exp %106 : vector<128x128xf32>
    %c0_48 = arith.constant 0 : index
    %c2_49 = arith.constant 2 : index
    %108 = vector.load %arg9[%c0_48, %c2_49] : memref<128x4xf32, #tpu.memory_space<vmem>>, vector<128x1xf32>
    %109 = arith.mulf %104, %108 : vector<128x1xf32>
    %cst_50 = arith.constant dense<0.000000e+00> : vector<128xf32>
    %110 = vector.multi_reduction <add>, %107, %cst_50 [1] : vector<128x128xf32> to vector<128xf32>
    %111 = vector.shape_cast %110 : vector<128xf32> to vector<128x1xf32>
    %112 = arith.addf %109, %111 : vector<128x1xf32>
    %c0_51 = arith.constant 0 : index
    %c2_52 = arith.constant 2 : index
    %113 = vector.load %arg9[%c0_51, %c2_52] : memref<128x4xf32, #tpu.memory_space<vmem>>, vector<128x1xf32>
    tpu.vector_store %arg9[%c0_51, %c2_52], %112 {strides = array<i32>} : memref<128x4xf32, #tpu.memory_space<vmem>>, vector<128x1xf32>,
    %c0_53 = arith.constant 0 : index
    %c16 = arith.constant 16 : index
    %114 = vector.load %arg10[%c0_53, %c16] : memref<128x32xf32, #tpu.memory_space<vmem>>, vector<128x8xf32>
    %115 = vector.broadcast %104 : vector<128x1xf32> to vector<128x8xf32>
    %116 = arith.mulf %115, %114 : vector<128x8xf32>
    %117 = arith.truncf %107 : vector<128x128xf32> to vector<128x128xbf16>
    %118 = vector.extract_strided_slice %9 {offsets = [0, 16], sizes = [128, 8], strides = [1, 1]} : vector<128x32xbf16> to vector<128x8xbf16>
    %cst_54 = arith.constant dense<0.000000e+00> : vector<128x8xf32>
    %119 = tpu.matmul %117, %118, %cst_54 {dimension_numbers = #tpu.dot_dimension_numbers<[1], [0], [0], [1], [0, 0, 1, 1], [], []>} : vector<128x128xbf16>, vector<128x8xbf16>, vector<128x8xf32> -> vector<128x8xf32>
    %120 = arith.addf %116, %119 : vector<128x8xf32>
    %c0_55 = arith.constant 0 : index
    %c16_56 = arith.constant 16 : index
    %121 = vector.load %arg10[%c0_55, %c16_56] : memref<128x32xf32, #tpu.memory_space<vmem>>, vector<128x8xf32>
    tpu.vector_store %arg10[%c0_55, %c16_56], %120 {strides = array<i32>} : memref<128x32xf32, #tpu.memory_space<vmem>>, vector<128x8xf32>,
    %c0_57 = arith.constant 0 : index
    %c2_58 = arith.constant 2 : index
    %122 = vector.load %arg8[%c0_57, %c2_58] : memref<128x4xf32, #tpu.memory_space<vmem>>, vector<128x1xf32>
    tpu.vector_store %arg8[%c0_57, %c2_58], %98 {strides = array<i32>} : memref<128x4xf32, #tpu.memory_space<vmem>>, vector<128x1xf32>,
    %123 = vector.extract_strided_slice %10 {offsets = [0, 3], sizes = [128, 1], strides = [1, 1]} : vector<128x4xf32> to vector<128x1xf32>
    %124 = vector.extract_strided_slice %11 {offsets = [3, 0], sizes = [1, 128], strides = [1, 1]} : vector<4x128xf32> to vector<1x128xf32>
    %125 = vector.broadcast %123 : vector<128x1xf32> to vector<128x128xf32>
    %126 = vector.broadcast %124 : vector<1x128xf32> to vector<128x128xf32>
    %127 = arith.addf %125, %126 : vector<128x128xf32>
    %cst_59 = arith.constant 2.000000e-01 : f32
    %128 = vector.broadcast %cst_59 : f32 to vector<128x128xf32>
    %129 = arith.mulf %128, %127 : vector<128x128xf32>
    %130 = arith.maximumf %127, %129 : vector<128x128xf32>
    %131 = arith.addf %130, %8 : vector<128x128xf32>
    %c0_60 = arith.constant 0 : index
    %c3 = arith.constant 3 : index
    %132 = vector.load %arg8[%c0_60, %c3] : memref<128x4xf32, #tpu.memory_space<vmem>>, vector<128x1xf32>
    %cst_61 = arith.constant dense<0xFF800000> : vector<128xf32>
    %133 = vector.multi_reduction <maximumf>, %131, %cst_61 [1] : vector<128x128xf32> to vector<128xf32>
    %134 = vector.shape_cast %133 : vector<128xf32> to vector<128x1xf32>
    %135 = arith.maximumf %132, %134 : vector<128x1xf32>
    %cst_62 = arith.constant -9.99999944E+27 : f32
    %136 = vector.broadcast %cst_62 : f32 to vector<128x1xf32>
    %137 = arith.maximumf %132, %136 : vector<128x1xf32>
    %cst_63 = arith.constant -9.99999944E+27 : f32
    %138 = vector.broadcast %cst_63 : f32 to vector<128x1xf32>
    %139 = arith.maximumf %135, %138 : vector<128x1xf32>
    %140 = arith.subf %137, %139 : vector<128x1xf32>
    %141 = math.exp %140 : vector<128x1xf32>
    %142 = vector.broadcast %139 : vector<128x1xf32> to vector<128x128xf32>
    %143 = arith.subf %131, %142 : vector<128x128xf32>
    %144 = math.exp %143 : vector<128x128xf32>
    %c0_64 = arith.constant 0 : index
    %c3_65 = arith.constant 3 : index
    %145 = vector.load %arg9[%c0_64, %c3_65] : memref<128x4xf32, #tpu.memory_space<vmem>>, vector<128x1xf32>
    %146 = arith.mulf %141, %145 : vector<128x1xf32>
    %cst_66 = arith.constant dense<0.000000e+00> : vector<128xf32>
    %147 = vector.multi_reduction <add>, %144, %cst_66 [1] : vector<128x128xf32> to vector<128xf32>
    %148 = vector.shape_cast %147 : vector<128xf32> to vector<128x1xf32>
    %149 = arith.addf %146, %148 : vector<128x1xf32>
    %c0_67 = arith.constant 0 : index
    %c3_68 = arith.constant 3 : index
    %150 = vector.load %arg9[%c0_67, %c3_68] : memref<128x4xf32, #tpu.memory_space<vmem>>, vector<128x1xf32>
    tpu.vector_store %arg9[%c0_67, %c3_68], %149 {strides = array<i32>} : memref<128x4xf32, #tpu.memory_space<vmem>>, vector<128x1xf32>,
    %c0_69 = arith.constant 0 : index
    %c24 = arith.constant 24 : index
    %151 = vector.load %arg10[%c0_69, %c24] : memref<128x32xf32, #tpu.memory_space<vmem>>, vector<128x8xf32>
    %152 = vector.broadcast %141 : vector<128x1xf32> to vector<128x8xf32>
    %153 = arith.mulf %152, %151 : vector<128x8xf32>
    %154 = arith.truncf %144 : vector<128x128xf32> to vector<128x128xbf16>
    %155 = vector.extract_strided_slice %9 {offsets = [0, 24], sizes = [128, 8], strides = [1, 1]} : vector<128x32xbf16> to vector<128x8xbf16>
    %cst_70 = arith.constant dense<0.000000e+00> : vector<128x8xf32>
    %156 = tpu.matmul %154, %155, %cst_70 {dimension_numbers = #tpu.dot_dimension_numbers<[1], [0], [0], [1], [0, 0, 1, 1], [], []>} : vector<128x128xbf16>, vector<128x8xbf16>, vector<128x8xf32> -> vector<128x8xf32>
    %157 = arith.addf %153, %156 : vector<128x8xf32>
    %c0_71 = arith.constant 0 : index
    %c24_72 = arith.constant 24 : index
    %158 = vector.load %arg10[%c0_71, %c24_72] : memref<128x32xf32, #tpu.memory_space<vmem>>, vector<128x8xf32>
    tpu.vector_store %arg10[%c0_71, %c24_72], %157 {strides = array<i32>} : memref<128x32xf32, #tpu.memory_space<vmem>>, vector<128x8xf32>,
    %c0_73 = arith.constant 0 : index
    %c3_74 = arith.constant 3 : index
    %159 = vector.load %arg8[%c0_73, %c3_74] : memref<128x4xf32, #tpu.memory_space<vmem>>, vector<128x1xf32>
    tpu.vector_store %arg8[%c0_73, %c3_74], %135 {strides = array<i32>} : memref<128x4xf32, #tpu.memory_space<vmem>>, vector<128x1xf32>,
    %c1_i32 = arith.constant 1 : i32
    %160 = arith.cmpi eq, %arg1, %c1_i32 : i32
    %161 = arith.extui %160 : i1 to i32
    %c0_i32_75 = arith.constant 0 : i32
    %162 = arith.cmpi ne, %161, %c0_i32_75 : i32
    scf.if %162 {
      %c0_76 = arith.constant 0 : index
      %c0_77 = arith.constant 0 : index
      %163 = vector.load %arg9[%c0_76, %c0_77] : memref<128x4xf32, #tpu.memory_space<vmem>>, vector<128x4xf32>
      %cst_78 = arith.constant 0.000000e+00 : f32
      %164 = vector.broadcast %cst_78 : f32 to vector<128x4xf32>
      %165 = arith.cmpf oeq, %163, %164 : vector<128x4xf32>
      %cst_79 = arith.constant 1.000000e+00 : f32
      %166 = vector.broadcast %cst_79 : f32 to vector<128x4xf32>
      %167 = arith.select %165, %166, %163 : vector<128x4xi1>, vector<128x4xf32>
      %168 = tpu.reciprocal %167 {approx = true} : vector<128x4xf32> -> vector<128x4xf32>
      %c0_80 = arith.constant 0 : index
      %c0_81 = arith.constant 0 : index
      %169 = vector.load %arg5[%c0_80, %c0_81] : memref<1x32xf32, #tpu.memory_space<vmem>>, vector<1x32xf32>
      %c0_82 = arith.constant 0 : index
      %c0_83 = arith.constant 0 : index
      %170 = vector.load %arg10[%c0_82, %c0_83] : memref<128x32xf32, #tpu.memory_space<vmem>>, vector<128x8xf32>
      %171 = vector.extract_strided_slice %168 {offsets = [0, 0], sizes = [128, 1], strides = [1, 1]} : vector<128x4xf32> to vector<128x1xf32>
      %172 = vector.broadcast %171 : vector<128x1xf32> to vector<128x8xf32>
      %173 = arith.mulf %170, %172 : vector<128x8xf32>
      %c0_84 = arith.constant 0 : index
      %c0_85 = arith.constant 0 : index
      %174 = vector.load %arg10[%c0_84, %c0_85] : memref<128x32xf32, #tpu.memory_space<vmem>>, vector<128x8xf32>
      tpu.vector_store %arg10[%c0_84, %c0_85], %173 {strides = array<i32>} : memref<128x32xf32, #tpu.memory_space<vmem>>, vector<128x8xf32>,
      %c0_86 = arith.constant 0 : index
      %c8_87 = arith.constant 8 : index
      %175 = vector.load %arg10[%c0_86, %c8_87] : memref<128x32xf32, #tpu.memory_space<vmem>>, vector<128x8xf32>
      %176 = vector.extract_strided_slice %168 {offsets = [0, 1], sizes = [128, 1], strides = [1, 1]} : vector<128x4xf32> to vector<128x1xf32>
      %177 = vector.broadcast %176 : vector<128x1xf32> to vector<128x8xf32>
      %178 = arith.mulf %175, %177 : vector<128x8xf32>
      %c0_88 = arith.constant 0 : index
      %c8_89 = arith.constant 8 : index
      %179 = vector.load %arg10[%c0_88, %c8_89] : memref<128x32xf32, #tpu.memory_space<vmem>>, vector<128x8xf32>
      tpu.vector_store %arg10[%c0_88, %c8_89], %178 {strides = array<i32>} : memref<128x32xf32, #tpu.memory_space<vmem>>, vector<128x8xf32>,
      %c0_90 = arith.constant 0 : index
      %c16_91 = arith.constant 16 : index
      %180 = vector.load %arg10[%c0_90, %c16_91] : memref<128x32xf32, #tpu.memory_space<vmem>>, vector<128x8xf32>
      %181 = vector.extract_strided_slice %168 {offsets = [0, 2], sizes = [128, 1], strides = [1, 1]} : vector<128x4xf32> to vector<128x1xf32>
      %182 = vector.broadcast %181 : vector<128x1xf32> to vector<128x8xf32>
      %183 = arith.mulf %180, %182 : vector<128x8xf32>
      %c0_92 = arith.constant 0 : index
      %c16_93 = arith.constant 16 : index
      %184 = vector.load %arg10[%c0_92, %c16_93] : memref<128x32xf32, #tpu.memory_space<vmem>>, vector<128x8xf32>
      tpu.vector_store %arg10[%c0_92, %c16_93], %183 {strides = array<i32>} : memref<128x32xf32, #tpu.memory_space<vmem>>, vector<128x8xf32>,
      %c0_94 = arith.constant 0 : index
      %c24_95 = arith.constant 24 : index
      %185 = vector.load %arg10[%c0_94, %c24_95] : memref<128x32xf32, #tpu.memory_space<vmem>>, vector<128x8xf32>
      %186 = vector.extract_strided_slice %168 {offsets = [0, 3], sizes = [128, 1], strides = [1, 1]} : vector<128x4xf32> to vector<128x1xf32>
      %187 = vector.broadcast %186 : vector<128x1xf32> to vector<128x8xf32>
      %188 = arith.mulf %185, %187 : vector<128x8xf32>
      %c0_96 = arith.constant 0 : index
      %c24_97 = arith.constant 24 : index
      %189 = vector.load %arg10[%c0_96, %c24_97] : memref<128x32xf32, #tpu.memory_space<vmem>>, vector<128x8xf32>
      tpu.vector_store %arg10[%c0_96, %c24_97], %188 {strides = array<i32>} : memref<128x32xf32, #tpu.memory_space<vmem>>, vector<128x8xf32>,
      %c0_98 = arith.constant 0 : index
      %c0_99 = arith.constant 0 : index
      %190 = vector.load %arg10[%c0_98, %c0_99] : memref<128x32xf32, #tpu.memory_space<vmem>>, vector<128x32xf32>
      %191 = vector.broadcast %169 : vector<1x32xf32> to vector<128x32xf32>
      %192 = arith.addf %190, %191 : vector<128x32xf32>
      %cst_100 = arith.constant 0.000000e+00 : f32
      %193 = vector.broadcast %cst_100 : f32 to vector<128x32xf32>
      %194 = arith.cmpf ogt, %192, %193 : vector<128x32xf32>
      %195 = math.exp %192 : vector<128x32xf32>
      %cst_101 = arith.constant 1.000000e+00 : f32
      %196 = vector.broadcast %cst_101 : f32 to vector<128x32xf32>
      %197 = arith.subf %195, %196 : vector<128x32xf32>
      %198 = arith.select %194, %192, %197 : vector<128x32xi1>, vector<128x32xf32>
      %cst_102 = arith.constant 0.000000e+00 : f32
      %199 = vector.broadcast %cst_102 : f32 to vector<128x32xf32>
      %200 = arith.cmpf ogt, %198, %199 : vector<128x32xf32>
      %201 = math.exp %198 : vector<128x32xf32>
      %cst_103 = arith.constant 1.000000e+00 : f32
      %202 = vector.broadcast %cst_103 : f32 to vector<128x32xf32>
      %203 = arith.subf %201, %202 : vector<128x32xf32>
      %204 = arith.select %200, %198, %203 : vector<128x32xi1>, vector<128x32xf32>
      %205 = arith.truncf %204 : vector<128x32xf32> to vector<128x32xbf16>
      %c0_104 = arith.constant 0 : index
      %c0_105 = arith.constant 0 : index
      %206 = vector.load %arg7[%c0_104, %c0_105] : memref<128x32xbf16, #tpu.memory_space<vmem>>, vector<128x32xbf16>
      tpu.vector_store %arg7[%c0_104, %c0_105], %205 {strides = array<i32>} : memref<128x32xbf16, #tpu.memory_space<vmem>>, vector<128x32xbf16>,
    } else {
    }
    return
  }
  func.func @transform_0(%arg0: i32, %arg1: i32) -> (i32, i32) {
    %c0_i32 = arith.constant 0 : i32
    %c0_i32_0 = arith.constant 0 : i32
    return %arg1, %c0_i32 : i32, i32
  }
  func.func @transform_1(%arg0: i32, %arg1: i32) -> (i32, i32) {
    %c0_i32 = arith.constant 0 : i32
    %c0_i32_0 = arith.constant 0 : i32
    return %c0_i32, %arg1 : i32, i32
  }
  func.func @transform_2(%arg0: i32, %arg1: i32) -> (i32, i32) {
    %c0_i32 = arith.constant 0 : i32
    %c0_i32_0 = arith.constant 0 : i32
    return %arg0, %c0_i32 : i32, i32
  }
  func.func @transform_3(%arg0: i32, %arg1: i32) -> (i32, i32) {
    %c0_i32 = arith.constant 0 : i32
    %c0_i32_0 = arith.constant 0 : i32
    %c0_i32_1 = arith.constant 0 : i32
    return %c0_i32, %c0_i32_0 : i32, i32
  }
  func.func @transform_4(%arg0: i32, %arg1: i32) -> (i32, i32) {
    %c0_i32 = arith.constant 0 : i32
    return %arg0, %arg1 : i32, i32
  }
  func.func @transform_5(%arg0: i32, %arg1: i32) -> (i32, i32) {
    %c0_i32 = arith.constant 0 : i32
    %c0_i32_0 = arith.constant 0 : i32
    return %arg0, %c0_i32 : i32, i32
  }
}

</mosaic_0001>

<bundles_post_ra>
// kernel: tpu_custom_call.1
= control target key start
LH: loop header
LB: loop body
LE: loop exit
PB: predicated region body
PF: predicated region fallthrough
CT: control target
= control target key end

     0   :  { %s8505_s0 = inlined_call_operand.vmem [shape: bf16[256,32], index: 0, kind: input, shape index: {}]   ;;  %s8506_s1 = inlined_call_operand.vmem [shape: f32[4,256], index: 1, kind: input, shape index: {}]   ;;  %s8507_s2 = inlined_call_operand.vmem [shape: f32[256,4], index: 2, kind: input, shape index: {}]   ;;  %s8508_s3 = inlined_call_operand.vmem [shape: f32[1,32], index: 3, kind: input, shape index: {}]   ;;  %s8509_s4 = inlined_call_operand.vmem [shape: s8[256,256], index: 4, kind: input, shape index: {}]   ;;  %s8510_s5 = inlined_call_operand.vmem [shape: bf16[256,32], index: 5, kind: output, shape index: {}]  }
   0x1   :  { %8678 = sst [smem:[#allocation65_spill]] %s8509_s4 }
   0x2   :  { %s5727_s18 = smov 0   ;;  %s5729_s19 = smov 0  }
   0x3   :  { %s5731_s20 = smov 0   ;;  %s5733_s21 = smov 0  }
   0x4   :  { %s5735_s22 = smov 0   ;;  %s5737_s23 = smov 0  }
   0x5   :  { %s5739_s24 = smov 0  }
   0x6 LB: > { %s24_s25 = sadd.s32 1, %s5671_s22  ;;  %s27_s26 = sadd.s32 1, %s5675_s23  ;;  %s5679_s24 = sphi %s5739_s24, %s15_s24   ;;  %s5675_s23 = sphi %s5737_s23, %s8963_s23   ;;  %s5671_s22 = sphi %s5735_s22, %s8962_s22   ;;  %s5667_s21 = sphi %s5733_s21, %s8961_s21   ;;  %s5663_s20 = sphi %s5731_s20, %s8960_s20   ;;  %s5659_s19 = sphi %s5729_s19, %s8959_s19   ;;  %s5655_s18 = sphi %s5727_s18, %s8958_s18  }
   0x7   : > { %p25_p0 = scmp.ge.s32.totalorder %s24_s25, 2  ;;  %p142_p1 = scmp.ne.s32.totalorder %s5659_s19, %s5655_s18 }
   0x8   : > { %p143_p2 = scmp.eq.s32.totalorder %s5679_s24, 0  ;;  %s135_s30 = sadd.s32 1, %s5659_s19 }
   0x9   : > { %s8965_s25 = smov (%p25_p0, %s24_s25), 0  ;;  %s8967_s26 = smov (!%p25_p0, %s27_s26), %s5675_s23 }
   0xa   : > { %p144_p3 = por %p143_p2, %p142_p1  ;;  %p29_p4 = scmp.ge.s32.totalorder %s8967_s26, 2 }
   0xb   : > { %s131_s27 = ssub.s32 %s5671_s22, %s8965_s25  ;;  %p4830_p6 = scmp.ge.s32.totalorder %s5679_s24, 4 }
   0xc   : > { %s8969_s26 = smov (%p29_p4, %s8967_s26), 0 }
   0xd   : > { %s130_s28 = ssub.s32 %s5675_s23, %s8969_s26  ;;  %197 = sbr.rel (%p4830_p6) target bundleno = 32 (0x20), region = 20 }
   0xe   : > { %s132_s29 = sor.u32 %s131_s27, %s130_s28 }
   0xf   : > { %p133_p5 = scmp.eq.s32.totalorder %s132_s29, 0 }
  0x11   : > { %s5778_s6 = scalar_select %p133_p5, %s5659_s19, %s135_s30  }
  0x14   : > { %225 = sbr.rel (!%p144_p3) target bundleno = 32 (0x20), region = 36  ;;  %s227_s7 = sand.u32 (%p144_p3), 1, %s5659_s19  }
  0x15   : > { %s4921_s8 = sshll.u32 (%p144_p3), %s5675_s23, 3  ;;  %s4831_s9 = sshll.u32 (%p144_p3), %s227_s7, 5 }
  0x16   : > { %s232_s10 = sadd.s32 (%p144_p3), %s5671_s22, %s4921_s8  ;;  %s8679_s4 = sld [smem:[#allocation65_spill]] (%p144_p3) }
  0x17   : > { %s4834_s11 = sshll.u32 (%p144_p3), %s232_s10, 3  ;;  %s229_s15 = scalar_lea.vmem (%p144_p3), [#allocation5], %s4831_s9 }
  0x1c   : > { %s234_s14 = scalar_lea.vmem %s8679_s4, %s4834_s11 }
  0x1d   : > { %v268_v0 = vld [vmem:[%s234_s14] sm:$0xff]  ;;  %v270_v1 = vld [vmem:[%s234_s14 + $0x10] sm:$0xff] }
  0x1e   : > { %v272_v2 = vld [vmem:[%s234_s14 + $0x20] sm:$0xff]  ;;  %269 = vst [vmem:[%s229_s15] sm:$0xff] %v268_v0  ;;  %271 = vst [vmem:[%s229_s15 + $0x8] sm:$0xff] %v270_v1  ;;  %v274_v3 = vld [vmem:[%s234_s14 + $0x30] sm:$0xff] }
  0x1f   : > { %273 = vst [vmem:[%s229_s15 + $0x10] sm:$0xff] %v272_v2  ;;  %275 = vst [vmem:[%s229_s15 + $0x18] sm:$0xff] %v274_v3 }
  0x20 PF: > { %p4835_p7 = scmp.ge.s32.totalorder %s5679_s24, 1  ;;  %p280_p8 = scmp.lt.s32.totalorder %s5679_s24, 5 }
  0x22   : > { %p281_p9 = pnand %p4835_p7, %p280_p8 }
  0x24   : > { %284 = sbr.rel (%p281_p9) target bundleno = 2524 (0x9dc), region = 74 }
  0x2b   : > { %s287_s16 = sand.u32 1, %s5655_s18   ;;  %s4837_s17 = sshll.u32 %s5663_s20, 4 }
  0x2c   : > { %s4836_s27 = sshll.u32 %s287_s16, 5  ;;  %p329_p10 = scmp.lt.s32.totalorder %s4837_s17, 31 }
  0x2d   : > { %p334_p11 = scmp.lt.s32.totalorder %s5663_s20, 1  ;;  %s4840_s30 = sshll.u32 %s5667_s21, 4 }
  0x2e   : > { %s8971_s17 = smov (!%p329_p10, %s4837_s17), 31  ;;  %p339_p12 = scmp.lt.s32.totalorder %s4840_s30, 31 }
  0x2f   : > { %s335_s28 = scalar_select %p334_p11, %s5663_s20, 1 }
  0x30   : > { %s4838_s29 = sshll.u32 %s8971_s17, 2  ;;  %s8973_s30 = smov (!%p339_p12, %s4840_s30), 31 }
  0x31   : > { %s5797_s9 = scalar_lea.vmem %s8505_s0, %s4838_s29  ;;  %s4839_s10 = sshll.u32 %s335_s28, 2 }
  0x32   : > { %s5802_s13 = scalar_lea.vmem %s8506_s1, %s4839_s10  ;;  %s4841_s18 = sshll.u32 %s8973_s30, 3 }
  0x33   : > { %s4843_s14 = sshll.u32 %s8973_s30, 2  ;;  %s5807_s17 = scalar_lea.vmem %s8507_s2, %s4841_s18 }
  0x34   : > { %s5812_s29 = scalar_lea.vmem %s8510_s5, %s4843_s14  ;;  %s5814_s28 = scalar_lea.vmem [#allocation5], %s4836_s27 }
  0x35   : > { %p4844_p13 = scmp.ne.s32.totalorder %s5663_s20, 0 }
  0x36   : > { %vm356_vm0 = vcmask (!%p4844_p13), 31744   ;;  %vm389_vm1 = vcmask (!%p4844_p13), 261120   ;;  %v5681_v4 = vmov (!%p4844_p13), -1e+30   ;;  %v5682_v5 = vmov (!%p4844_p13), 0.0  }
  0x37   : > { %355 = sbr.rel (%p4844_p13) target bundleno = 79 (0x4f), region = 82  ;;  %357 = vst.msk [vmem:[#allocation2] sm:$0xff] (!%p4844_p13), %vm356_vm0, %v5681_v4  ;;  %358 = vst.msk [vmem:[#allocation2 + $0x8] sm:$0xff] (!%p4844_p13), %vm356_vm0, %v5681_v4 }
  0x38   : > { %359 = vst.msk [vmem:[#allocation2 + $0x10] sm:$0xff] (!%p4844_p13), %vm356_vm0, %v5681_v4  ;;  %360 = vst.msk [vmem:[#allocation2 + $0x18] sm:$0xff] (!%p4844_p13), %vm356_vm0, %v5681_v4 }
  0x39   : > { %361 = vst.msk [vmem:[#allocation2 + $0x20] sm:$0xff] (!%p4844_p13), %vm356_vm0, %v5681_v4  ;;  %362 = vst.msk [vmem:[#allocation2 + $0x28] sm:$0xff] (!%p4844_p13), %vm356_vm0, %v5681_v4 }
  0x3a   : > { %363 = vst.msk [vmem:[#allocation2 + $0x30] sm:$0xff] (!%p4844_p13), %vm356_vm0, %v5681_v4  ;;  %364 = vst.msk [vmem:[#allocation2 + $0x38] sm:$0xff] (!%p4844_p13), %vm356_vm0, %v5681_v4 }
  0x3b   : > { %365 = vst.msk [vmem:[#allocation2 + $0x40] sm:$0xff] (!%p4844_p13), %vm356_vm0, %v5681_v4  ;;  %366 = vst.msk [vmem:[#allocation2 + $0x48] sm:$0xff] (!%p4844_p13), %vm356_vm0, %v5681_v4 }
  0x3c   : > { %367 = vst.msk [vmem:[#allocation2 + $0x50] sm:$0xff] (!%p4844_p13), %vm356_vm0, %v5681_v4  ;;  %368 = vst.msk [vmem:[#allocation2 + $0x58] sm:$0xff] (!%p4844_p13), %vm356_vm0, %v5681_v4 }
  0x3d   : > { %369 = vst.msk [vmem:[#allocation2 + $0x60] sm:$0xff] (!%p4844_p13), %vm356_vm0, %v5681_v4  ;;  %370 = vst.msk [vmem:[#allocation2 + $0x68] sm:$0xff] (!%p4844_p13), %vm356_vm0, %v5681_v4 }
  0x3e   : > { %371 = vst.msk [vmem:[#allocation2 + $0x70] sm:$0xff] %vm356_vm0, %v5681_v4  ;;  %372 = vst.msk [vmem:[#allocation2 + $0x78] sm:$0xff] %vm356_vm0, %v5681_v4 }
  0x3f   : > { %373 = vst.msk [vmem:[#allocation3] sm:$0xff] %vm356_vm0, %v5682_v5  ;;  %374 = vst.msk [vmem:[#allocation3 + $0x8] sm:$0xff] %vm356_vm0, %v5682_v5 }
  0x40   : > { %375 = vst.msk [vmem:[#allocation3 + $0x10] sm:$0xff] %vm356_vm0, %v5682_v5  ;;  %376 = vst.msk [vmem:[#allocation3 + $0x18] sm:$0xff] %vm356_vm0, %v5682_v5 }
  0x41   : > { %377 = vst.msk [vmem:[#allocation3 + $0x20] sm:$0xff] %vm356_vm0, %v5682_v5  ;;  %378 = vst.msk [vmem:[#allocation3 + $0x28] sm:$0xff] %vm356_vm0, %v5682_v5 }
  0x42   : > { %379 = vst.msk [vmem:[#allocation3 + $0x30] sm:$0xff] %vm356_vm0, %v5682_v5  ;;  %380 = vst.msk [vmem:[#allocation3 + $0x38] sm:$0xff] %vm356_vm0, %v5682_v5 }
  0x43   : > { %381 = vst.msk [vmem:[#allocation3 + $0x40] sm:$0xff] %vm356_vm0, %v5682_v5  ;;  %382 = vst.msk [vmem:[#allocation3 + $0x48] sm:$0xff] %vm356_vm0, %v5682_v5 }
  0x44   : > { %383 = vst.msk [vmem:[#allocation3 + $0x50] sm:$0xff] %vm356_vm0, %v5682_v5  ;;  %384 = vst.msk [vmem:[#allocation3 + $0x58] sm:$0xff] %vm356_vm0, %v5682_v5 }
  0x45   : > { %385 = vst.msk [vmem:[#allocation3 + $0x60] sm:$0xff] %vm356_vm0, %v5682_v5  ;;  %386 = vst.msk [vmem:[#allocation3 + $0x68] sm:$0xff] %vm356_vm0, %v5682_v5 }
  0x46   : > { %387 = vst.msk [vmem:[#allocation3 + $0x70] sm:$0xff] %vm356_vm0, %v5682_v5  ;;  %388 = vst.msk [vmem:[#allocation3 + $0x78] sm:$0xff] %vm356_vm0, %v5682_v5 }
  0x47   : > { %390 = vst.msk [vmem:[#allocation4] sm:$0xff] %vm389_vm1, %v5682_v5  ;;  %391 = vst.msk [vmem:[#allocation4 + $0x8] sm:$0xff] %vm389_vm1, %v5682_v5 }
  0x48   : > { %392 = vst.msk [vmem:[#allocation4 + $0x10] sm:$0xff] %vm389_vm1, %v5682_v5  ;;  %393 = vst.msk [vmem:[#allocation4 + $0x18] sm:$0xff] %vm389_vm1, %v5682_v5 }
  0x49   : > { %394 = vst.msk [vmem:[#allocation4 + $0x20] sm:$0xff] %vm389_vm1, %v5682_v5  ;;  %395 = vst.msk [vmem:[#allocation4 + $0x28] sm:$0xff] %vm389_vm1, %v5682_v5 }
  0x4a   : > { %396 = vst.msk [vmem:[#allocation4 + $0x30] sm:$0xff] %vm389_vm1, %v5682_v5  ;;  %397 = vst.msk [vmem:[#allocation4 + $0x38] sm:$0xff] %vm389_vm1, %v5682_v5 }
  0x4b   : > { %398 = vst.msk [vmem:[#allocation4 + $0x40] sm:$0xff] %vm389_vm1, %v5682_v5  ;;  %399 = vst.msk [vmem:[#allocation4 + $0x48] sm:$0xff] %vm389_vm1, %v5682_v5 }
  0x4c   : > { %400 = vst.msk [vmem:[#allocation4 + $0x50] sm:$0xff] %vm389_vm1, %v5682_v5  ;;  %401 = vst.msk [vmem:[#allocation4 + $0x58] sm:$0xff] %vm389_vm1, %v5682_v5 }
  0x4d   : > { %402 = vst.msk [vmem:[#allocation4 + $0x60] sm:$0xff] %vm389_vm1, %v5682_v5  ;;  %403 = vst.msk [vmem:[#allocation4 + $0x68] sm:$0xff] %vm389_vm1, %v5682_v5 }
  0x4e   : > { %404 = vst.msk [vmem:[#allocation4 + $0x70] sm:$0xff] %vm389_vm1, %v5682_v5  ;;  %405 = vst.msk [vmem:[#allocation4 + $0x78] sm:$0xff] %vm389_vm1, %v5682_v5 }
  0x4f PF: > { %v490_v6 = vld [vmem:[%s5807_s17] sm:$0xff]  ;;  %v492_v7 = vld [vmem:[%s5807_s17 + $0x10] sm:$0xff]  ;;  %v8512_v8 = vmov 1   ;;  %v8511_v9 = vmov 0   ;;  %v493_v10 = vld [vmem:[%s5807_s17 + $0x18] sm:$0xff]  ;;  %v587_v33 = vlaneseq  ;;  %vm1007_vm2 = vcmask 7168  }
  0x50   : > { %5203 = vset.pattern.permute.xlu0 %v8512_v8  ;;  %5202 = vset.pattern.permute.xlu1 %v8511_v9  ;;  %v495_v11 = vld [vmem:[%s5807_s17 + $0x28] sm:$0xff]  ;;  %v497_v12 = vld [vmem:[%s5807_s17 + $0x38] sm:$0xff]  ;;  %v494_v18 = vld [vmem:[%s5807_s17 + $0x20] sm:$0xff]  ;;  %vm1822_vm3 = vcmask 15368   ;;  %s5685_s4 = smov 120   ;;  %vm1305_vm4 = vcmask 64512  }
  0x51   : > { %1339 = vperm.xlu0 %5203, %v490_v6   ;;  %519 = vperm.xlu1 %5202, %v492_v7   ;;  %v499_v13 = vld [vmem:[%s5807_s17 + $0x48] sm:$0xff]  ;;  %v501_v14 = vld [vmem:[%s5807_s17 + $0x58] sm:$0xff]  ;;  %v496_v19 = vld [vmem:[%s5807_s17 + $0x30] sm:$0xff]  ;;  %v5901_v36 = vshrl.u32 %v587_v33, 7  ;;  %vm2677_vm5 = vcmask 23568   ;;  %s5687_s27 = smov 8  }
  0x52   : > { %v503_v15 = vld [vmem:[%s5807_s17 + $0x68] sm:$0xff]  ;;  %v505_v16 = vld [vmem:[%s5807_s17 + $0x78] sm:$0xff]  ;;  %v498_v20 = vld [vmem:[%s5807_s17 + $0x40] sm:$0xff]  ;;  %vm2160_vm6 = vcmask 130112   ;;  %s5689_s30 = smov 112   ;;  %s5690_s7 = smov 104  }
  0x53   : > { %v491_v17 = vld [vmem:[%s5807_s17 + $0x8] sm:$0xff]  ;;  %v500_v21 = vld [vmem:[%s5807_s17 + $0x50] sm:$0xff]  ;;  %v502_v22 = vld [vmem:[%s5807_s17 + $0x60] sm:$0xff]  ;;  %8680 = vst [vmem:[#allocation6_spill] sm:$0xff] %v5901_v36  ;;  %v589_v39 = vsub.s32 0, %v5901_v36  ;;  %vm3532_vm7 = vcmask 31768  }
  0x54   : > { %v504_v23 = vld [vmem:[%s5807_s17 + $0x70] sm:$0xff]  ;;  %v406_v35 = vld [vmem:[%s5814_s28] sm:$0xff]  ;;  %v407_v48 = vld [vmem:[%s5814_s28 + $0x8] sm:$0xff]  ;;  %s5691_s8 = smov 16   ;;  %vm3015_vm8 = vcmask 195712   ;;  %vm3870_vm9 = vcmask 261312  }
  0x55   : > { %1351 = vperm.xlu0 %5203, %v493_v10   ;;  %524 = vperm.xlu1 %5202, %v493_v10   ;;  %v410_v40 = vunpack.c.0.s8 %v406_v35  ;;  %v412_v41 = vunpack.c.2.s8 %v406_v35  ;;  %v5909_v42 = vld [vmem:[%s5802_s13] sm:$0xf]  ;;  %v411_v44 = vunpack.c.1.s8 %v406_v35  ;;  %v414_v49 = vunpack.c.0.s8 %v407_v48  ;;  %v5927_v5 = vld [vmem:[%s5814_s28 + $0x10] sm:$0xff]  ;;  %p4869_p0 = scmp.ne.s32.totalorder %s5663_s20, 1 }
  0x56   : > { %v5914_v45 = vrot.slane %v5909_v42, %v589_v39  ;;  %v413_v55 = vunpack.c.3.s8 %v406_v35  ;;  %v416_v62 = vunpack.c.2.s8 %v407_v48  ;;  %v415_v4 = vunpack.c.1.s8 %v407_v48 }
  0x57   : > { %v426_v47 = vcvt.s32.f32 %v410_v40  ;;  %v428_v51 = vcvt.s32.f32 %v412_v41  ;;  %v427_v52 = vcvt.s32.f32 %v411_v44  ;;  %v430_v57 = vcvt.s32.f32 %v414_v49 }
  0x58   : > { %v429_v3 = vcvt.s32.f32 %v413_v55 }
  0x59   : > { %1359 = vperm.xlu0 %5203, %v495_v11   ;;  %534 = vperm.xlu1 %5202, %v495_v11   ;;  %v4845_v54 = vadd.f32 -1.0, %v426_v47  ;;  %v4847_v61 = vadd.f32 -1.0, %v428_v51  ;;  %v4846_v0 = vadd.f32 -1.0, %v427_v52  ;;  %v4849_v10 = vadd.f32 -1.0, %v430_v57  ;;  %v5964_v57 = vld [vmem:[%s5814_s28 + $0x18] sm:$0xff] }
  0x5a   : > { %v418_v11 = vunpack.c.0.s8 %v5927_v5  ;;  %v420_v47 = vunpack.c.2.s8 %v5927_v5 }
  0x5b   : > { %v5924_v2 = vmul.f32 1e+30, %v4845_v54  ;;  %v5946_v35 = vmul.f32 1e+30, %v4849_v10 }
  0x5c   : > { %v434_v39 = vcvt.s32.f32 %v418_v11 }
  0x5d   : > { %1367 = vperm.xlu0 %5203, %v497_v12   ;;  %544 = vperm.xlu1 %5202, %v497_v12   ;;  %8681 = vst [vmem:[#allocation7_spill] sm:$0xff] %v5924_v2  ;;  %8684 = vst [vmem:[#allocation10_spill] sm:$0xff] %v5946_v35 }
  0x61   : > { %1375 = vperm.xlu0 %5203, %v499_v13   ;;  %554 = vperm.xlu1 %5202, %v499_v13   ;;  %v5931_v13 = vmul.f32 1e+30, %v4847_v61  ;;  %v4853_v61 = vadd.f32 -1.0, %v434_v39 }
  0x63   : > { %8682 = vst [vmem:[#allocation8_spill] sm:$0xff] %v5931_v13 }
  0x65   : > { %1383 = vperm.xlu0 %5203, %v501_v14   ;;  %564 = vperm.xlu1 %5202, %v501_v14  }
  0x69   : > { %1391 = vperm.xlu0 %5203, %v503_v15   ;;  %574 = vperm.xlu1 %5202, %v503_v15   ;;  %v432_v15 = vcvt.s32.f32 %v416_v62  ;;  %v422_v62 = vunpack.c.0.s8 %v5964_v57 }
  0x6b   : > { %v4851_v44 = vadd.f32 -1.0, %v432_v15 }
  0x6d   : > { %1399 = vperm.xlu0 %5203, %v505_v16   ;;  %584 = vperm.xlu1 %5202, %v505_v16  }
  0x71   : > { %5205 = vset.pattern.permute.xlu0 %v8511_v9  ;;  %5204 = vset.pattern.permute.xlu1 %v8512_v8 }
  0x72   : > { %509 = vperm.xlu0 %5205, %v490_v6   ;;  %1343 = vperm.xlu1 %5204, %v491_v17  }
  0x76   : > { %514 = vperm.xlu0 %5205, %v491_v17   ;;  %1347 = vperm.xlu1 %5204, %v492_v7  }
  0x7a   : > { %529 = vperm.xlu0 %5205, %v494_v18   ;;  %1355 = vperm.xlu1 %5204, %v494_v18  }
  0x7e   : > { %539 = vperm.xlu0 %5205, %v496_v19   ;;  %1363 = vperm.xlu1 %5204, %v496_v19   ;;  %v5939_v19 = vmul.f32 1e+30, %v4846_v0 }
  0x80   : > { %8683 = vst [vmem:[#allocation9_spill] sm:$0xff] %v5939_v19 }
  0x82   : > { %549 = vperm.xlu0 %5205, %v498_v20   ;;  %1371 = vperm.xlu1 %5204, %v498_v20   ;;  %v1404_v20 = vsub.s32 1, %v5901_v36 }
  0x86   : > { %559 = vperm.xlu0 %5205, %v500_v21   ;;  %1379 = vperm.xlu1 %5204, %v500_v21  }
  0x8a   : > { %569 = vperm.xlu0 %5205, %v502_v22   ;;  %1387 = vperm.xlu1 %5204, %v502_v22  }
  0x8e   : > { %579 = vperm.xlu0 %5205, %v504_v23   ;;  %1395 = vperm.xlu1 %5204, %v504_v23   ;;  %v4848_v23 = vadd.f32 -1.0, %v429_v3  ;;  %v436_v3 = vcvt.s32.f32 %v420_v47 }
  0x92   : > { %5206 = vset.pattern.permute.xlu1 %v8511_v9 }
  0xd0   : > { %v5886_v24 = vpop.permute.xlu0 %1339  ;;  %v520_v25 = vpop.permute.xlu1 %519 }
  0xd1   : > { %v593_v50 = vadd.f32 %v5914_v45, %v520_v25  ;;  %v431_v25 = vcvt.s32.f32 %v415_v4 }
  0xd3   : > { %v609_v58 = vmul.f32 0.2, %v593_v50  ;;  %v4850_v54 = vadd.f32 -1.0, %v431_v25  ;;  %v438_v25 = vcvt.s32.f32 %v422_v62 }
  0xd4   : > { %v5888_v26 = vpop.permute.xlu0 %1351  ;;  %v525_v27 = vpop.permute.xlu1 %524 }
  0xd5   : > { %v594_v59 = vadd.f32 %v5914_v45, %v525_v27  ;;  %v625_v14 = vmax.f32 %v593_v50, %v609_v58  ;;  %v417_v27 = vunpack.c.3.s8 %v407_v48 }
  0xd7   : > { %v610_v12 = vmul.f32 0.2, %v594_v59  ;;  %v5949_v40 = vadd.f32 %v625_v14, %v5931_v13  ;;  %v433_v55 = vcvt.s32.f32 %v417_v27 }
  0xd8   : > { %v5890_v28 = vpop.permute.xlu0 %1359  ;;  %v535_v29 = vpop.permute.xlu1 %534 }
  0xd9   : > { %v5934_v16 = vadd.f32 %v5914_v45, %v535_v29  ;;  %v626_v41 = vmax.f32 %v594_v59, %v610_v12  ;;  %v5984_v12 = vmul.f32 1e+30, %v4850_v54  ;;  %v4852_v14 = vadd.f32 -1.0, %v433_v55 }
  0xda   : > { %v423_v54 = vunpack.c.1.s8 %v5964_v57 }
  0xdb   : > { %v612_v49 = vmul.f32 0.2, %v5934_v16  ;;  %8687 = vst [vmem:[#allocation13_spill] sm:$0xff] %v5984_v12 }
  0xdc   : > { %v5892_v30 = vpop.permute.xlu0 %1367  ;;  %v5896_v32 = vpop.permute.xlu1 %544 }
  0xdd   : > { %v5955_v48 = vadd.f32 %v5914_v45, %v5896_v32  ;;  %v628_v10 = vmax.f32 %v5934_v16, %v612_v49  ;;  %v6005_v49 = vrot.slane %v5909_v42, %v1404_v20 }
  0xdf   : > { %v614_v4 = vmul.f32 0.2, %v5955_v48 }
  0xe0   : > { %v5894_v31 = vpop.permute.xlu0 %1375  ;;  %v5903_v37 = vpop.permute.xlu1 %554 }
  0xe1   : > { %v630_v47 = vmax.f32 %v5955_v48, %v614_v4 }
  0xe4   : > { %v5898_v34 = vpop.permute.xlu0 %1383  ;;  %v5916_v46 = vpop.permute.xlu1 %564 }
  0xe5   : > { %v602_v16 = vadd.f32 %v5914_v45, %v5916_v46 }
  0xe8   : > { %v5905_v38 = vpop.permute.xlu0 %1391  ;;  %v5922_v60 = vpop.permute.xlu1 %574 }
  0xe9   : > { %v604_v62 = vadd.f32 %v5914_v45, %v5922_v60 }
  0xec   : > { %v5911_v43 = vpop.permute.xlu0 %1399  ;;  %v5942_v21 = vpop.permute.xlu1 %584 }
  0xf1   : > { %v510_v53 = vpop.permute.xlu0 %509  ;;  %v5966_v58 = vpop.permute.xlu1 %1343 }
  0xf2   : > { %v591_v56 = vadd.f32 %v5914_v45, %v510_v53  ;;  %v5960_v53 = vmul.f32 1e+30, %v4848_v23  ;;  %v5990_v23 = vmul.f32 1e+30, %v4853_v61  ;;  %v618_v61 = vmul.f32 0.2, %v602_v16 }
  0xf4   : > { %v607_v63 = vmul.f32 0.2, %v591_v56  ;;  %8685 = vst [vmem:[#allocation11_spill] sm:$0xff] %v5960_v53  ;;  %v5975_v0 = vadd.f32 %v626_v41, %v5960_v53  ;;  %8688 = vst [vmem:[#allocation14_spill] sm:$0xff] %v5990_v23 }
  0xf5   : > { %v515_v1 = vpop.permute.xlu0 %514  ;;  %v5995_v39 = vpop.permute.xlu1 %1347 }
  0xf6   : > { %v592_v6 = vadd.f32 %v5914_v45, %v515_v1  ;;  %v623_v7 = vmax.f32 %v591_v56, %v607_v63  ;;  %v419_v56 = vunpack.c.1.s8 %v5927_v5  ;;  %v600_v63 = vadd.f32 %v5914_v45, %v5903_v37 }
  0xf7   : > { %v5977_v1 = vmul.f32 1e+30, %v4851_v44  ;;  %v421_v37 = vunpack.c.3.s8 %v5927_v5  ;;  %v6001_v44 = vadd.f32 %v628_v10, %v5984_v12 }
  0xf8   : > { %v608_v17 = vmul.f32 0.2, %v592_v6  ;;  %v5937_v18 = vadd.f32 %v623_v7, %v5924_v2  ;;  %v435_v15 = vcvt.s32.f32 %v419_v56  ;;  %v616_v27 = vmul.f32 0.2, %v600_v63 }
  0xf9   : > { %v530_v22 = vpop.permute.xlu0 %529  ;;  %8686 = vst [vmem:[#allocation12_spill] sm:$0xff] %v5977_v1  ;;  %v437_v46 = vcvt.s32.f32 %v421_v37  ;;  %v1356_v37 = vpop.permute.xlu1 %1355 }
  0xfa   : > { %v595_v33 = vadd.f32 %v5914_v45, %v530_v22  ;;  %671 = vmax.xlane.f32.xlu0 %v5937_v18  ;;  %v624_v29 = vmax.f32 %v592_v6, %v608_v17  ;;  %v632_v42 = vmax.f32 %v600_v63, %v616_v27 }
  0xfc   : > { %v611_v50 = vmul.f32 0.2, %v595_v33  ;;  %v5958_v51 = vadd.f32 %v624_v29, %v5939_v19  ;;  %v424_v29 = vunpack.c.2.s8 %v5964_v57 }
  0xfd   : > { %v540_v52 = vpop.permute.xlu0 %539 }
  0xfe   : > { %v597_v59 = vadd.f32 %v5914_v45, %v540_v52  ;;  %673 = vmax.xlane.f32.xlu1 %v5958_v51  ;;  %675 = vmax.xlane.f32.xlu0 %v5949_v40  ;;  %v627_v32 = vmax.f32 %v595_v33, %v611_v50  ;;  %v4855_v33 = vadd.f32 -1.0, %v436_v3  ;;  %v4854_v52 = vadd.f32 -1.0, %v435_v15 }
  0xff   : > { %v440_v20 = vcvt.s32.f32 %v424_v29  ;;  %v439_v15 = vcvt.s32.f32 %v423_v54 }
 0x100   : > { %v613_v6 = vmul.f32 0.2, %v597_v59  ;;  %v5981_v7 = vadd.f32 %v627_v32, %v5946_v35  ;;  %v4857_v32 = vadd.f32 -1.0, %v438_v25  ;;  %v6013_v48 = vmul.f32 1e+30, %v4855_v33 }
 0x101   : > { %v550_v11 = vpop.permute.xlu0 %549  ;;  %v1406_v25 = vadd.f32 %v6005_v49, %v5886_v24  ;;  %v634_v33 = vmax.f32 %v602_v16, %v618_v61  ;;  %v4859_v29 = vadd.f32 -1.0, %v440_v20  ;;  %v1407_v16 = vadd.f32 %v6005_v49, %v5966_v58  ;;  %v1364_v20 = vpop.permute.xlu1 %1363 }
 0x102   : > { %v599_v17 = vadd.f32 %v5914_v45, %v550_v11  ;;  %679 = vmax.xlane.f32.xlu1 %v5981_v7  ;;  %677 = vmax.xlane.f32.xlu0 %v5975_v0  ;;  %v629_v22 = vmax.f32 %v597_v59, %v613_v6  ;;  %v6011_v59 = vmul.f32 1e+30, %v4852_v14  ;;  %8690 = vst [vmem:[#allocation16_spill] sm:$0xff] %v6013_v48  ;;  %v6023_v11 = vmul.f32 1e+30, %v4854_v52 }
 0x103   : > { %v4856_v14 = vadd.f32 -1.0, %v437_v46  ;;  %v6028_v63 = vmul.f32 1e+30, %v4857_v32  ;;  %v1409_v32 = vadd.f32 %v6005_v49, %v5888_v26  ;;  %v1423_v58 = vmul.f32 0.2, %v1407_v16 }
 0x104   : > { %v615_v5 = vmul.f32 0.2, %v599_v17  ;;  %v5998_v41 = vadd.f32 %v629_v22, %v5977_v1  ;;  %8689 = vst [vmem:[#allocation15_spill] sm:$0xff] %v6011_v59  ;;  %v6021_v6 = vadd.f32 %v630_v47, %v6011_v59  ;;  %8691 = vst [vmem:[#allocation17_spill] sm:$0xff] %v6023_v11  ;;  %v425_v22 = vunpack.c.3.s8 %v5964_v57 }
 0x105   : > { %v560_v50 = vpop.permute.xlu0 %559  ;;  %8692 = vst [vmem:[#allocation18_spill] sm:$0xff] %v6028_v63  ;;  %v6034_v27 = vadd.f32 %v632_v42, %v6023_v11  ;;  %v606_v47 = vadd.f32 %v5914_v45, %v5942_v21  ;;  %v6041_v54 = vmul.f32 1e+30, %v4856_v14  ;;  %v4858_v57 = vadd.f32 -1.0, %v439_v15 }
 0x106   : > { %v601_v55 = vadd.f32 %v5914_v45, %v560_v50  ;;  %683 = vmax.xlane.f32.xlu1 %v5998_v41  ;;  %681 = vmax.xlane.f32.xlu0 %v6001_v44  ;;  %v631_v56 = vmax.f32 %v599_v17, %v615_v5  ;;  %v620_v5 = vmul.f32 0.2, %v604_v62  ;;  %v1422_v21 = vmul.f32 0.2, %v1406_v25 }
 0x107   : > { %8693 = vst [vmem:[#allocation19_spill] sm:$0xff] %v6041_v54  ;;  %v6051_v61 = vadd.f32 %v634_v33, %v6041_v54  ;;  %v6053_v42 = vmul.f32 1e+30, %v4859_v29  ;;  %v6058_v15 = vmul.f32 1e+30, %v4858_v57  ;;  %v1411_v29 = vadd.f32 %v6005_v49, %v5890_v28 }
 0x108   : > { %v617_v3 = vmul.f32 0.2, %v601_v55  ;;  %v6018_v4 = vadd.f32 %v631_v56, %v5990_v23  ;;  %v441_v56 = vcvt.s32.f32 %v425_v22  ;;  %v636_v14 = vmax.f32 %v604_v62, %v620_v5 }
 0x109   : > { %v570_v10 = vpop.permute.xlu0 %569  ;;  %8694 = vst [vmem:[#allocation20_spill] sm:$0xff] %v6053_v42  ;;  %8695 = vst [vmem:[#allocation21_spill] sm:$0xff] %v6058_v15  ;;  %v1425_v22 = vmul.f32 0.2, %v1409_v32  ;;  %v1438_v33 = vmax.f32 %v1406_v25, %v1422_v21  ;;  %v1410_v25 = vadd.f32 %v6005_v49, %v1356_v37  ;;  %v1412_v37 = vadd.f32 %v6005_v49, %v1364_v20 }
 0x10a   : > { %v603_v17 = vadd.f32 %v5914_v45, %v570_v10  ;;  %687 = vmax.xlane.f32.xlu1 %v6018_v4  ;;  %685 = vmax.xlane.f32.xlu0 %v6021_v6  ;;  %v633_v60 = vmax.f32 %v601_v55, %v617_v3  ;;  %v6070_v62 = vadd.f32 %v636_v14, %v6058_v15 }
 0x10b   : > { %v6078_v28 = vadd.f32 %v1438_v33, %v5924_v2  ;;  %v1441_v21 = vmax.f32 %v1409_v32, %v1425_v22  ;;  %v5223_v2 = vld [vmem:[%s5797_s9 + $0x20] sm:$0xff]  }
 0x10c   : > { %v619_v50 = vmul.f32 0.2, %v603_v17  ;;  %v6039_v52 = vadd.f32 %v633_v60, %v6013_v48  ;;  %v4860_v60 = vadd.f32 -1.0, %v441_v56  ;;  %v1413_v56 = vadd.f32 %v6005_v49, %v5892_v30 }
 0x10d   : > { %v580_v46 = vpop.permute.xlu0 %579  ;;  %v1415_v30 = vadd.f32 %v6005_v49, %v5894_v31 }
 0x10e   : > { %v605_v55 = vadd.f32 %v5914_v45, %v580_v46  ;;  %691 = vmax.xlane.f32.xlu1 %v6039_v52  ;;  %689 = vmax.xlane.f32.xlu0 %v6034_v27  ;;  %v635_v24 = vmax.f32 %v603_v17, %v619_v50  ;;  %v622_v45 = vmul.f32 0.2, %v606_v47  ;;  %v1408_v17 = vadd.f32 %v6005_v49, %v5995_v39  ;;  %v1372_v46 = vpop.permute.xlu1 %1371 }
 0x10f   : > { %v6074_v39 = vmul.f32 1e+30, %v4860_v60  ;;  %v1428_v60 = vmul.f32 0.2, %v1412_v37  ;;  %v1414_v20 = vadd.f32 %v6005_v49, %v1372_v46  ;;  %v1431_v33 = vmul.f32 0.2, %v1415_v30 }
 0x110   : > { %v621_v3 = vmul.f32 0.2, %v605_v55  ;;  %v6056_v10 = vadd.f32 %v635_v24, %v6028_v63  ;;  %v638_v5 = vmax.f32 %v606_v47, %v622_v45  ;;  %v1424_v57 = vmul.f32 0.2, %v1408_v17 }
 0x111   : > { %8696 = vst [vmem:[#allocation22_spill] sm:$0xff] %v6074_v39  ;;  %v1427_v24 = vmul.f32 0.2, %v1411_v29  ;;  %v1426_v45 = vmul.f32 0.2, %v1410_v25 }
 0x112   : > { %695 = vmax.xlane.f32.xlu1 %v6056_v10  ;;  %693 = vmax.xlane.f32.xlu0 %v6051_v61  ;;  %v637_v26 = vmax.f32 %v605_v55, %v621_v3  ;;  %v1439_v55 = vmax.f32 %v1407_v16, %v1423_v58  ;;  %v6083_v47 = vadd.f32 %v638_v5, %v6074_v39  ;;  %v1380_v14 = vpop.permute.xlu1 %1379  ;;  %v1429_v58 = vmul.f32 0.2, %v1413_v56 }
 0x113   : > { %v1440_v16 = vmax.f32 %v1408_v17, %v1424_v57  ;;  %v1443_v32 = vmax.f32 %v1411_v29, %v1427_v24  ;;  %v1442_v17 = vmax.f32 %v1410_v25, %v1426_v45  ;;  %v1417_v5 = vadd.f32 %v6005_v49, %v5898_v34 }
 0x114   : > { %v6067_v50 = vadd.f32 %v637_v26, %v6053_v42  ;;  %v6088_v3 = vadd.f32 %v1439_v55, %v5939_v19  ;;  %v6094_v26 = vadd.f32 %v1441_v21, %v5960_v53  ;;  %v1445_v57 = vmax.f32 %v1413_v56, %v1429_v58 }
 0x115   : > { %v6099_v22 = vadd.f32 %v1440_v16, %v5931_v13  ;;  %v6105_v31 = vadd.f32 %v1443_v32, %v5984_v12  ;;  %v1430_v55 = vmul.f32 0.2, %v1414_v20  ;;  %v6110_v24 = vadd.f32 %v1442_v17, %v5946_v35 }
 0x116   : > { %699 = vmax.xlane.f32.xlu1 %v6067_v50  ;;  %697 = vmax.xlane.f32.xlu0 %v6070_v62  ;;  %v1388_v29 = vpop.permute.xlu1 %1387  ;;  %v1416_v46 = vadd.f32 %v6005_v49, %v1380_v14  ;;  %v1444_v25 = vmax.f32 %v1412_v37, %v1428_v60  ;;  %v1433_v21 = vmul.f32 0.2, %v1417_v5  ;;  %v1419_v34 = vadd.f32 %v6005_v49, %v5905_v38 }
 0x117   : > { %v6116_v45 = vadd.f32 %v1445_v57, %v6011_v59  ;;  %v1447_v56 = vmax.f32 %v1415_v30, %v1431_v33  ;;  %v1418_v32 = vadd.f32 %v6005_v49, %v1388_v29  ;;  %v1446_v14 = vmax.f32 %v1414_v20, %v1430_v55 }
 0x118   : > { %v1432_v16 = vmul.f32 0.2, %v1416_v46  ;;  %v6121_v58 = vadd.f32 %v1444_v25, %v5977_v1  ;;  %v1435_v60 = vmul.f32 0.2, %v1419_v34  ;;  %v1421_v38 = vadd.f32 %v6005_v49, %v5911_v43 }
 0x119   : > { %v6127_v17 = vadd.f32 %v1447_v56, %v6023_v11  ;;  %v1449_v30 = vmax.f32 %v1417_v5, %v1433_v21  ;;  %v1434_v33 = vmul.f32 0.2, %v1418_v32  ;;  %v6132_v57 = vadd.f32 %v1446_v14, %v5990_v23 }
 0x11a   : > { %1486 = vmax.xlane.f32.xlu1 %v6078_v28  ;;  %701 = vmax.xlane.f32.xlu0 %v6083_v47  ;;  %v1396_v37 = vpop.permute.xlu1 %1395  ;;  %v1448_v20 = vmax.f32 %v1416_v46, %v1432_v16  ;;  %v1437_v55 = vmul.f32 0.2, %v1421_v38  ;;  %v1451_v43 = vmax.f32 %v1419_v34, %v1435_v60  ;;  %v5220_v60 = vld [vmem:[%s5797_s9 + $0x8] sm:$0xff]  }
 0x11b   : > { %v1420_v29 = vadd.f32 %v6005_v49, %v1396_v37  ;;  %v6136_v25 = vadd.f32 %v1449_v30, %v6041_v54  ;;  %v1450_v56 = vmax.f32 %v1418_v32, %v1434_v33  ;;  %v5219_v37 = vld [vmem:[%s5797_s9] sm:$0xff]  }
 0x11c   : > { %v6141_v21 = vadd.f32 %v1448_v20, %v6013_v48  ;;  %v6144_v14 = vadd.f32 %v1451_v43, %v6058_v15  ;;  %v1453_v49 = vmax.f32 %v1421_v38, %v1437_v55  ;;  %5002 = vmatprep.subr.bf16.mxu0 %v5219_v37  ;;  %v6162_v38 = vld [vmem:[#allocation2] sm:$0xff]  ;;  %v6167_v20 = vld [vmem:[#allocation2 + $0x10] sm:$0xff]  ;;  %v6228_v48 = vld [vmem:[#allocation2 + $0x48] sm:$0xff] }
 0x11d   : > { %v1436_v5 = vmul.f32 0.2, %v1420_v29  ;;  %v6149_v46 = vadd.f32 %v1450_v56, %v6028_v63  ;;  %5003 = vmatpush3.bf16.msra.mxu0 %v5219_v37  ;;  %v721_v23 = vmax.f32 %v6167_v20, -1e+28 }
 0x11e   : > { %1492 = vmax.xlane.f32.xlu1 %v6094_v26  ;;  %1488 = vmax.xlane.f32.xlu0 %v6088_v3  ;;  %8697 = vst [vmem:[#allocation23_spill] sm:$0xff] %v6141_v21  ;;  %v6152_v16 = vadd.f32 %v1453_v49, %v6074_v39  ;;  %v6194_v39 = vld [vmem:[#allocation2 + $0x28] sm:$0xff] }
 0x11f   : > { %8698 = vst [vmem:[#allocation24_spill] sm:$0xff] %v6149_v46  ;;  %v1452_v34 = vmax.f32 %v1420_v29, %v1436_v5  ;;  %5004 = vmatprep.subr.bf16.mxu0 %v5220_v60  ;;  %v656_v29 = vld [vmem:[#allocation2 + $0x8] sm:$0xff] }
 0x120   : > { %8699 = vst [vmem:[#allocation25_spill] sm:$0xff] %v6152_v16  ;;  %v720_v12 = vmax.f32 %v656_v29, -1e+28 }
 0x121   : > { %v6157_v32 = vadd.f32 %v1452_v34, %v6053_v42  ;;  %5005 = vmatpush3.bf16.msra.mxu0 %v5220_v60  ;;  %v6177_v34 = vld [vmem:[#allocation2 + $0x20] sm:$0xff] }
 0x122   : > { %1496 = vmax.xlane.f32.xlu1 %v6105_v31  ;;  %1490 = vmax.xlane.f32.xlu0 %v6099_v22 }
 0x123   : > { %8700 = vst [vmem:[#allocation26_spill] sm:$0xff] %v6157_v32 }
 0x126   : > { %1500 = vmax.xlane.f32.xlu1 %v6116_v45  ;;  %1494 = vmax.xlane.f32.xlu0 %v6110_v24 }
 0x12a   : > { %1504 = vmax.xlane.f32.xlu1 %v6127_v17  ;;  %1498 = vmax.xlane.f32.xlu0 %v6121_v58 }
 0x12e   : > { %1508 = vmax.xlane.f32.xlu1 %v6136_v25  ;;  %1502 = vmax.xlane.f32.xlu0 %v6132_v57 }
 0x132   : > { %1512 = vmax.xlane.f32.xlu1 %v6144_v14  ;;  %1506 = vmax.xlane.f32.xlu0 %v6141_v21 }
 0x136   : > { %1516 = vmax.xlane.f32.xlu1 %v6152_v16  ;;  %1510 = vmax.xlane.f32.xlu0 %v6149_v46 }
 0x13a   : > { %1514 = vmax.xlane.f32.xlu0 %v6157_v32 }
 0x187   : > { %v672_v30 = vpop.xlane.xlu0 %671 }
 0x188   : > { %v6165_v33 = vmax.f32 %v6162_v38, %v672_v30  ;;  %v6183_v30 = vld [vmem:[#allocation2 + $0x18] sm:$0xff] }
 0x18a   : > { %v8514_v55 = vmax.f32 %v6165_v33, -1e+28  ;;  %1322 = vst.msk [vmem:[#allocation2] sm:$0xff] %vm1007_vm2, %v6165_v33 }
 0x18b   : > { %v674_v43 = vpop.xlane.xlu1 %673  ;;  %v676_v5 = vpop.xlane.xlu0 %675 }
 0x18c   : > { %v704_v56 = vmax.f32 %v656_v29, %v674_v43  ;;  %v6173_v49 = vmax.f32 %v6167_v20, %v676_v5  ;;  %801 = vperm.xlu1 %5206, %v8514_v55   ;;  %v5221_v5 = vld [vmem:[%s5797_s9 + $0x10] sm:$0xff]   ;;  %v719_v29 = vmax.f32 %v6162_v38, -1e+28 }
 0x18d   : > { %5006 = vmatprep.subr.bf16.mxu0 %v5221_v5 }
 0x18e   : > { %v736_v37 = vmax.f32 %v704_v56, -1e+28  ;;  %1323 = vst.msk [vmem:[#allocation2 + $0x8] sm:$0xff] %vm1007_vm2, %v704_v56  ;;  %v8523_v60 = vmax.f32 %v6173_v49, -1e+28  ;;  %1324 = vst.msk [vmem:[#allocation2 + $0x10] sm:$0xff] %vm1007_vm2, %v6173_v49  ;;  %5007 = vmatpush3.bf16.msra.mxu0 %v5221_v5 }
 0x18f   : > { %v680_v9 = vpop.xlane.xlu1 %679  ;;  %v678_v43 = vpop.xlane.xlu0 %677  ;;  %v6192_v56 = vld [vmem:[#allocation2 + $0x30] sm:$0xff] }
 0x190   : > { %v707_v8 = vmax.f32 %v6177_v34, %v680_v9  ;;  %806 = vperm.xlu0 %5205, %v736_v37   ;;  %811 = vperm.xlu1 %5206, %v8523_v60   ;;  %v6190_v55 = vmax.f32 %v6183_v30, %v678_v43  ;;  %v5222_v60 = vld [vmem:[%s5797_s9 + $0x18] sm:$0xff]   ;;  %v752_v42 = vsub.f32 %v720_v12, %v736_v37  ;;  %v5224_v37 = vld [vmem:[%s5797_s9 + $0x28] sm:$0xff]   ;;  %v725_v19 = vmax.f32 %v6192_v56, -1e+28 }
 0x191   : > { %5008 = vmatprep.subr.bf16.mxu0 %v5222_v60 }
 0x192   : > { %v739_v15 = vmax.f32 %v707_v8, -1e+28  ;;  %1326 = vst.msk [vmem:[#allocation2 + $0x20] sm:$0xff] %vm1007_vm2, %v707_v8  ;;  %v8532_v54 = vmax.f32 %v6190_v55, -1e+28  ;;  %1325 = vst.msk [vmem:[#allocation2 + $0x18] sm:$0xff] %vm1007_vm2, %v6190_v55  ;;  %5009 = vmatpush3.bf16.msra.mxu0 %v5222_v60 }
 0x193   : > { %v684_v9 = vpop.xlane.xlu1 %683  ;;  %v682_v11 = vpop.xlane.xlu0 %681  ;;  %v6207_v8 = vld [vmem:[#allocation2 + $0x40] sm:$0xff]  ;;  %v6226_v60 = vld [vmem:[#allocation2 + $0x50] sm:$0xff]  ;;  %5010 = vmatprep.subr.bf16.mxu0 %v5223_v2  ;;  %v769_v12 = vmul.f32 1.442695, %v752_v42  ;;  %v6257_v42 = vld [vmem:[#allocation2 + $0x58] sm:$0xff] }
 0x194   : > { %v709_v43 = vmax.f32 %v6192_v56, %v684_v9  ;;  %v6203_v59 = vmax.f32 %v6194_v39, %v682_v11  ;;  %821 = vperm.xlu0 %5205, %v739_v15   ;;  %816 = vperm.xlu1 %5206, %v8532_v54   ;;  %v6213_v9 = vld [vmem:[#allocation2 + $0x38] sm:$0xff] }
 0x195   : > { %5227 = vpow2.f32 %v769_v12 }
 0x196   : > { %v741_v5 = vmax.f32 %v709_v43, -1e+28  ;;  %1328 = vst.msk [vmem:[#allocation2 + $0x30] sm:$0xff] %vm1007_vm2, %v709_v43  ;;  %1327 = vst.msk [vmem:[#allocation2 + $0x28] sm:$0xff] %vm1007_vm2, %v6203_v59  ;;  %v723_v43 = vmax.f32 %v6177_v34, -1e+28  ;;  %5011 = vmatpush3.bf16.msra.mxu0 %v5223_v2 }
 0x197   : > { %v688_v11 = vpop.xlane.xlu1 %687  ;;  %v686_v13 = vpop.xlane.xlu0 %685  ;;  %v8701_v63 = vmax.f32 %v6203_v59, -1e+28  ;;  %v6249_v2 = vld [vmem:[#allocation2 + $0x60] sm:$0xff]  ;;  %5012 = vmatprep.subr.bf16.mxu0 %v5224_v37 }
 0x198   : > { %v6217_v54 = vmax.f32 %v6207_v8, %v688_v11  ;;  %831 = vperm.xlu0 %5205, %v741_v5   ;;  %v6222_v53 = vmax.f32 %v6213_v9, %v686_v13  ;;  %v755_v35 = vsub.f32 %v723_v43, %v739_v15 }
 0x199   : > { %826 = vperm.xlu1 %5206, %v8701_v63   ;;  %v8702_v63 = vmax.f32 %v6165_v33, -1e+28 }
 0x19a   : > { %v743_v38 = vmax.f32 %v6217_v54, -1e+28  ;;  %1330 = vst.msk [vmem:[#allocation2 + $0x40] sm:$0xff] %vm1007_vm2, %v6217_v54  ;;  %1329 = vst.msk [vmem:[#allocation2 + $0x38] sm:$0xff] %vm1007_vm2, %v6222_v53  ;;  %v8703_v36 = vmax.f32 %v6222_v53, -1e+28  ;;  %5013 = vmatpush3.bf16.msra.mxu0 %v5224_v37 }
 0x19b   : > { %v692_v13 = vpop.xlane.xlu1 %691  ;;  %v690_v34 = vpop.xlane.xlu0 %689  ;;  %v751_v11 = vsub.f32 %v719_v29, %v8702_v63  ;;  %v757_v63 = vsub.f32 %v725_v19, %v741_v5  ;;  %v6271_v37 = vld [vmem:[#allocation2 + $0x70] sm:$0xff]  ;;  %v5226_v5 = vld [vmem:[%s5797_s9 + $0x38] sm:$0xff]   ;;  %v729_v19 = vmax.f32 %v6226_v60, -1e+28 }
 0x19c   : > { %v6241_v1 = vmax.f32 %v6226_v60, %v692_v13  ;;  %v6244_v54 = vmax.f32 %v6228_v48, %v690_v34  ;;  %841 = vperm.xlu0 %5205, %v743_v38   ;;  %v5225_v13 = vld [vmem:[%s5797_s9 + $0x30] sm:$0xff]   ;;  %v775_v34 = vmul.f32 1.442695, %v755_v35  ;;  %v726_v60 = vmax.f32 %v6213_v9, -1e+28 }
 0x19d   : > { %836 = vperm.xlu1 %5206, %v8703_v36   ;;  %v767_v29 = vmul.f32 1.442695, %v751_v11  ;;  %v727_v36 = vmax.f32 %v6207_v8, -1e+28  ;;  %v6273_v8 = vld [vmem:[#allocation2 + $0x68] sm:$0xff]  ;;  %5014 = vmatprep.subr.bf16.mxu0 %v5225_v13 }
 0x19e   : > { %v8552_v33 = vmax.f32 %v6241_v1, -1e+28  ;;  %1332 = vst.msk [vmem:[#allocation2 + $0x50] sm:$0xff] %vm1007_vm2, %v6241_v1  ;;  %1331 = vst.msk [vmem:[#allocation2 + $0x48] sm:$0xff] %vm1007_vm2, %v6244_v54  ;;  %v8704_v16 = vmax.f32 %v6244_v54, -1e+28  ;;  %5015 = vmatpush3.bf16.msra.mxu0 %v5225_v13 }
 0x19f   : > { %v696_v15 = vpop.xlane.xlu1 %695  ;;  %v694_v56 = vpop.xlane.xlu0 %693  ;;  %v8705_v11 = vmax.f32 %v6173_v49, -1e+28  ;;  %5229 = vpow2.f32 %v767_v29  ;;  %v6297_v29 = vld [vmem:[#allocation2 + $0x78] sm:$0xff]  ;;  %5016 = vmatprep.subr.bf16.mxu0 %v5226_v5 }
 0x1a0   : > { %v6261_v43 = vmax.f32 %v6249_v2, %v696_v15  ;;  %851 = vperm.xlu0 %5205, %v8552_v33   ;;  %v6267_v20 = vmax.f32 %v6257_v42, %v694_v56  ;;  %v722_v33 = vmax.f32 %v6183_v30, -1e+28  ;;  %5231 = vpow2.f32 %v775_v34 }
 0x1a1   : > { %846 = vperm.xlu1 %5206, %v8704_v16   ;;  %v753_v15 = vsub.f32 %v721_v23, %v8705_v11  ;;  %v724_v23 = vmax.f32 %v6194_v39, -1e+28  ;;  %v779_v56 = vmul.f32 1.442695, %v757_v63  ;;  %v759_v11 = vsub.f32 %v727_v36, %v743_v38  ;;  %v1470_v63 = vld [vmem:[#allocation2] sm:$0xff] }
 0x1a2   : > { %v8554_v12 = vmax.f32 %v6261_v43, -1e+28  ;;  %1334 = vst.msk [vmem:[#allocation2 + $0x60] sm:$0xff] %vm1007_vm2, %v6261_v43  ;;  %1333 = vst.msk [vmem:[#allocation2 + $0x58] sm:$0xff] %vm1007_vm2, %v6267_v20  ;;  %v8706_v13 = vmax.f32 %v6267_v20, -1e+28  ;;  %5017 = vmatpush3.bf16.msra.mxu0 %v5226_v5 }
 0x1a3   : > { %v700_v35 = vpop.xlane.xlu1 %699  ;;  %v698_v16 = vpop.xlane.xlu0 %697  ;;  %v771_v39 = vmul.f32 1.442695, %v753_v15  ;;  %v728_v38 = vmax.f32 %v6228_v48, -1e+28  ;;  %5233 = vpow2.f32 %v779_v56  ;;  %v783_v9 = vmul.f32 1.442695, %v759_v11 }
 0x1a4   : > { %v6287_v49 = vmax.f32 %v6271_v37, %v700_v35  ;;  %v6290_v30 = vmax.f32 %v6273_v8, %v698_v16  ;;  %861 = vperm.xlu0 %5205, %v8554_v12   ;;  %v8707_v35 = vmax.f32 %v6190_v55, -1e+28  ;;  %v8708_v55 = vmax.f32 %v6203_v59, -1e+28  ;;  %v1471_v5 = vld [vmem:[#allocation2 + $0x8] sm:$0xff]  ;;  %v6327_v56 = vpop.eup %5227 }
 0x1a5   : > { %856 = vperm.xlu1 %5206, %v8706_v13   ;;  %v731_v13 = vmax.f32 %v6249_v2, -1e+28  ;;  %v8709_v48 = vmax.f32 %v6241_v1, -1e+28  ;;  %5235 = vpow2.f32 %v771_v39  ;;  %8711 = vst [vmem:[#allocation27_spill] sm:$0xff] %v6327_v56 }
 0x1a6   : > { %v754_v32 = vsub.f32 %v722_v33, %v8707_v35  ;;  %v8556_v16 = vmax.f32 %v6287_v49, -1e+28  ;;  %1336 = vst.msk [vmem:[#allocation2 + $0x70] sm:$0xff] %vm1007_vm2, %v6287_v49  ;;  %1335 = vst.msk [vmem:[#allocation2 + $0x68] sm:$0xff] %vm1007_vm2, %v6290_v30  ;;  %v756_v33 = vsub.f32 %v724_v23, %v8708_v55  ;;  %v8710_v59 = vmax.f32 %v6290_v30, -1e+28 }
 0x1a7   : > { %v1487_v36 = vpop.xlane.xlu1 %1486  ;;  %v702_v15 = vpop.xlane.xlu0 %701  ;;  %v761_v34 = vsub.f32 %v729_v19, %v8709_v48  ;;  %v1534_v23 = vmax.f32 %v1470_v63, -1e+28  ;;  %v8712_v1 = vmax.f32 %v6222_v53, -1e+28  ;;  %v733_v11 = vmax.f32 %v6271_v37, -1e+28 }
 0x1a8   : > { %v6313_v12 = vmax.f32 %v1470_v63, %v1487_v36  ;;  %871 = vperm.xlu0 %5205, %v8556_v16   ;;  %v6320_v46 = vmax.f32 %v6297_v29, %v702_v15  ;;  %v773_v2 = vmul.f32 1.442695, %v754_v32  ;;  %v1473_v32 = vld [vmem:[#allocation2 + $0x18] sm:$0xff]  ;;  %v777_v53 = vmul.f32 1.442695, %v756_v33 }
 0x1a9   : > { %866 = vperm.xlu1 %5206, %v8710_v59   ;;  %v758_v19 = vsub.f32 %v726_v60, %v8712_v1  ;;  %v1535_v59 = vmax.f32 %v1471_v5, -1e+28  ;;  %5237 = vpow2.f32 %v783_v9  ;;  %v787_v37 = vmul.f32 1.442695, %v761_v34  ;;  %v6348_v16 = vpop.eup %5229  ;;  %v1475_v9 = vld [vmem:[#allocation2 + $0x28] sm:$0xff] }
 0x1aa   : > { %v8557_v36 = vmax.f32 %v6313_v12, -1e+28  ;;  %2177 = vst.msk [vmem:[#allocation2] sm:$0xff] %vm1822_vm3, %v6313_v12  ;;  %v8558_v15 = vmax.f32 %v6320_v46, -1e+28  ;;  %8715 = vst [vmem:[#allocation29_spill] sm:$0xff] %v6348_v16  ;;  %5239 = vpow2.f32 %v773_v2  ;;  %v6356_v34 = vpop.eup %5231 }
 0x1ab   : > { %1337 = vst.msk [vmem:[#allocation2 + $0x78] sm:$0xff] %vm1007_vm2, %v6320_v46  ;;  %v1493_v39 = vpop.xlane.xlu1 %1492  ;;  %v1489_v63 = vpop.xlane.xlu0 %1488  ;;  %v8714_v60 = vmax.f32 %v6261_v43, -1e+28  ;;  %8716 = vst [vmem:[#allocation30_spill] sm:$0xff] %v6356_v34  ;;  %v781_v43 = vmul.f32 1.442695, %v758_v19  ;;  %5241 = vpow2.f32 %v787_v37 }
 0x1ac   : > { %v6337_v55 = vsub.f32 %v1534_v23, %v8557_v36  ;;  %v6339_v48 = vmax.f32 %v1473_v32, %v1493_v39  ;;  %v6341_v35 = vmax.f32 %v1471_v5, %v1489_v63  ;;  %1047 = vperm.xlu0 %5205, %v6327_v56   ;;  %v1537_v23 = vmax.f32 %v1473_v32, -1e+28  ;;  %v1472_v63 = vld [vmem:[#allocation2 + $0x10] sm:$0xff] }
 0x1ad   : > { %v763_v1 = vsub.f32 %v731_v13, %v8714_v60  ;;  %876 = vperm.xlu1 %5206, %v8558_v15   ;;  %v732_v33 = vmax.f32 %v6273_v8, -1e+28  ;;  %v8717_v32 = vmax.f32 %v6244_v54, -1e+28  ;;  %v1474_v8 = vld [vmem:[#allocation2 + $0x20] sm:$0xff]  ;;  %5243 = vpow2.f32 %v777_v53 }
 0x1ae   : > { %8713 = vst [vmem:[#allocation28_spill] sm:$0xff] %v6337_v55  ;;  %v8562_v39 = vmax.f32 %v6339_v48, -1e+28  ;;  %2180 = vst.msk [vmem:[#allocation2 + $0x18] sm:$0xff] %vm1822_vm3, %v6339_v48  ;;  %v8561_v5 = vmax.f32 %v6341_v35, -1e+28  ;;  %5245 = vpow2.f32 %v781_v43 }
 0x1af   : > { %2178 = vst.msk [vmem:[#allocation2 + $0x8] sm:$0xff] %vm1822_vm3, %v6341_v35  ;;  %v1497_v13 = vpop.xlane.xlu1 %1496  ;;  %v1491_v2 = vpop.xlane.xlu0 %1490  ;;  %v760_v60 = vsub.f32 %v728_v38, %v8717_v32  ;;  %v791_v19 = vmul.f32 1.442695, %v763_v1  ;;  %v8719_v55 = vmax.f32 %v6287_v49, -1e+28 }
 0x1b0   : > { %v6363_v36 = vsub.f32 %v1537_v23, %v8562_v39  ;;  %v6367_v15 = vsub.f32 %v1535_v59, %v8561_v5  ;;  %v6369_v56 = vmax.f32 %v1475_v9, %v1497_v13  ;;  %1062 = vperm.xlu0 %5205, %v6356_v34   ;;  %v6374_v54 = vmax.f32 %v1472_v63, %v1491_v2  ;;  %v6380_v13 = vpop.eup %5233 }
 0x1b1   : > { %v765_v21 = vsub.f32 %v733_v11, %v8719_v55  ;;  %1042 = vperm.xlu1 %5206, %v6348_v16   ;;  %v1539_v38 = vmax.f32 %v1475_v9, -1e+28  ;;  %v1536_v59 = vmax.f32 %v1472_v63, -1e+28  ;;  %8720 = vst [vmem:[#allocation32_spill] sm:$0xff] %v6380_v13  ;;  %v1477_v11 = vld [vmem:[#allocation2 + $0x38] sm:$0xff]  ;;  %v6385_v2 = vpop.eup %5235  ;;  %5247 = vpow2.f32 %v791_v19 }
 0x1b2   : > { %8718 = vst [vmem:[#allocation31_spill] sm:$0xff] %v6367_v15  ;;  %v8563_v23 = vmax.f32 %v6369_v56, -1e+28  ;;  %2182 = vst.msk [vmem:[#allocation2 + $0x28] sm:$0xff] %vm1822_vm3, %v6369_v56  ;;  %v8564_v37 = vmax.f32 %v6374_v54, -1e+28 }
 0x1b3   : > { %2179 = vst.msk [vmem:[#allocation2 + $0x10] sm:$0xff] %vm1822_vm3, %v6374_v54  ;;  %v1501_v49 = vpop.xlane.xlu1 %1500  ;;  %v1538_v55 = vmax.f32 %v1474_v8, -1e+28  ;;  %v1495_v1 = vpop.xlane.xlu0 %1494  ;;  %8721 = vst [vmem:[#allocation33_spill] sm:$0xff] %v6385_v2  ;;  %v785_v32 = vmul.f32 1.442695, %v760_v60 }
 0x1b4   : > { %v6389_v53 = vsub.f32 %v1539_v38, %v8563_v23  ;;  %v6391_v9 = vmax.f32 %v1477_v11, %v1501_v49  ;;  %v6393_v63 = vmax.f32 %v1474_v8, %v1495_v1  ;;  %1072 = vperm.xlu0 %5205, %v6380_v13   ;;  %v795_v5 = vmul.f32 1.442695, %v765_v21  ;;  %v6411_v21 = vpop.eup %5237  ;;  %v1478_v13 = vld [vmem:[#allocation2 + $0x40] sm:$0xff] }
 0x1b5   : > { %v6398_v39 = vsub.f32 %v1536_v59, %v8564_v37  ;;  %1052 = vperm.xlu1 %5206, %v6385_v2   ;;  %v8723_v43 = vmax.f32 %v6267_v20, -1e+28  ;;  %v8724_v38 = vmax.f32 %v6257_v42, -1e+28  ;;  %v1541_v49 = vmax.f32 %v1477_v11, -1e+28  ;;  %v6413_v20 = vpop.eup %5239 }
 0x1b6   : > { %v8566_v8 = vmax.f32 %v6391_v9, -1e+28  ;;  %2184 = vst.msk [vmem:[#allocation2 + $0x38] sm:$0xff] %vm1822_vm3, %v6391_v9  ;;  %v8567_v60 = vmax.f32 %v6393_v63, -1e+28  ;;  %2181 = vst.msk [vmem:[#allocation2 + $0x20] sm:$0xff] %vm1822_vm3, %v6393_v63  ;;  %5249 = vpow2.f32 %v795_v5 }
 0x1b7   : > { %8722 = vst [vmem:[#allocation34_spill] sm:$0xff] %v6398_v39  ;;  %v762_v23 = vsub.f32 %v8724_v38, %v8723_v43  ;;  %8725 = vst [vmem:[#allocation35_spill] sm:$0xff] %v6411_v21  ;;  %v1505_v19 = vpop.xlane.xlu1 %1504  ;;  %v1479_v59 = vld [vmem:[#allocation2 + $0x48] sm:$0xff]  ;;  %v1499_v1 = vpop.xlane.xlu0 %1498  ;;  %v1476_v38 = vld [vmem:[#allocation2 + $0x30] sm:$0xff]  ;;  %v8728_v37 = vmax.f32 %v6290_v30, -1e+28  ;;  %5251 = vpow2.f32 %v785_v32 }
 0x1b8   : > { %8726 = vst [vmem:[#allocation36_spill] sm:$0xff] %v6413_v20  ;;  %v6417_v42 = vsub.f32 %v1541_v49, %v8566_v8  ;;  %v6421_v11 = vsub.f32 %v1538_v55, %v8567_v60  ;;  %v6423_v43 = vmax.f32 %v1479_v59, %v1505_v19  ;;  %1082 = vperm.xlu0 %5205, %v6411_v21   ;;  %v1543_v8 = vmax.f32 %v1479_v59, -1e+28  ;;  %v6434_v19 = vpop.eup %5241 }
 0x1b9   : > { %v764_v39 = vsub.f32 %v732_v33, %v8728_v37  ;;  %v6428_v15 = vmax.f32 %v1476_v38, %v1499_v1  ;;  %1057 = vperm.xlu1 %5206, %v6413_v20   ;;  %v789_v49 = vmul.f32 1.442695, %v762_v23  ;;  %8729 = vst [vmem:[#allocation38_spill] sm:$0xff] %v6434_v19  ;;  %v1540_v60 = vmax.f32 %v1476_v38, -1e+28  ;;  %v1481_v33 = vld [vmem:[#allocation2 + $0x58] sm:$0xff]  ;;  %v6439_v1 = vpop.eup %5243 }
 0x1ba   : > { %8727 = vst [vmem:[#allocation37_spill] sm:$0xff] %v6421_v11  ;;  %v8572_v55 = vmax.f32 %v6423_v43, -1e+28  ;;  %2186 = vst.msk [vmem:[#allocation2 + $0x48] sm:$0xff] %vm1822_vm3, %v6423_v43  ;;  %v1542_v21 = vmax.f32 %v1478_v13, -1e+28  ;;  %v6455_v20 = vpop.eup %5245 }
 0x1bb   : > { %v8571_v5 = vmax.f32 %v6428_v15, -1e+28  ;;  %2183 = vst.msk [vmem:[#allocation2 + $0x30] sm:$0xff] %vm1822_vm3, %v6428_v15  ;;  %v1509_v30 = vpop.xlane.xlu1 %1508  ;;  %v1503_v37 = vpop.xlane.xlu0 %1502  ;;  %8730 = vst [vmem:[#allocation39_spill] sm:$0xff] %v6439_v1  ;;  %v793_v38 = vmul.f32 1.442695, %v764_v39  ;;  %5253 = vpow2.f32 %v789_v49 }
 0x1bc   : > { %v6443_v23 = vsub.f32 %v1543_v8, %v8572_v55  ;;  %v6445_v32 = vmax.f32 %v1481_v33, %v1509_v30  ;;  %v6447_v59 = vmax.f32 %v1478_v13, %v1503_v37  ;;  %1092 = vperm.xlu0 %5205, %v6434_v19   ;;  %8732 = vst [vmem:[#allocation41_spill] sm:$0xff] %v6455_v20  ;;  %v1545_v34 = vmax.f32 %v1481_v33, -1e+28  ;;  %v6463_v39 = vpop.eup %5247  ;;  %v1483_v13 = vld [vmem:[#allocation2 + $0x68] sm:$0xff] }
 0x1bd   : > { %v6452_v11 = vsub.f32 %v1540_v60, %v8571_v5  ;;  %1067 = vperm.xlu1 %5206, %v6439_v1   ;;  %8733 = vst [vmem:[#allocation42_spill] sm:$0xff] %v6463_v39  ;;  %v734_v5 = vmax.f32 %v6297_v29, -1e+28  ;;  %5255 = vpow2.f32 %v793_v38  ;;  %v1547_v1 = vmax.f32 %v1483_v13, -1e+28  ;;  %v1482_v29 = vld [vmem:[#allocation2 + $0x60] sm:$0xff] }
 0x1be   : > { %v8577_v8 = vmax.f32 %v6445_v32, -1e+28  ;;  %2188 = vst.msk [vmem:[#allocation2 + $0x58] sm:$0xff] %vm1822_vm3, %v6445_v32  ;;  %v8578_v30 = vmax.f32 %v6447_v59, -1e+28  ;;  %2185 = vst.msk [vmem:[#allocation2 + $0x40] sm:$0xff] %vm1822_vm3, %v6447_v59 }
 0x1bf   : > { %8731 = vst [vmem:[#allocation40_spill] sm:$0xff] %v6452_v11  ;;  %v1513_v60 = vpop.xlane.xlu1 %1512  ;;  %v1507_v37 = vpop.xlane.xlu0 %1506  ;;  %v1480_v11 = vld [vmem:[#allocation2 + $0x50] sm:$0xff] }
 0x1c0   : > { %v6468_v49 = vsub.f32 %v1545_v34, %v8577_v8  ;;  %v6472_v33 = vsub.f32 %v1542_v21, %v8578_v30  ;;  %v1531_v55 = vmax.f32 %v1483_v13, %v1513_v60  ;;  %1102 = vperm.xlu0 %5205, %v6463_v39   ;;  %v1528_v19 = vmax.f32 %v1480_v11, %v1507_v37  ;;  %v6477_v16 = vpop.eup %5249  ;;  %v1485_v60 = vld [vmem:[#allocation2 + $0x78] sm:$0xff] }
 0x1c1   : > { %1077 = vperm.xlu1 %5206, %v6455_v20   ;;  %8736 = vst [vmem:[#allocation45_spill] sm:$0xff] %v6477_v16  ;;  %v1544_v34 = vmax.f32 %v1480_v11, -1e+28  ;;  %v8738_v37 = vmax.f32 %v6320_v46, -1e+28 }
 0x1c2   : > { %8734 = vst [vmem:[#allocation43_spill] sm:$0xff] %v6468_v49  ;;  %8735 = vst [vmem:[#allocation44_spill] sm:$0xff] %v6472_v33  ;;  %v1563_v2 = vmax.f32 %v1531_v55, -1e+28  ;;  %v1560_v8 = vmax.f32 %v1528_v19, -1e+28  ;;  %v6480_v33 = vpop.eup %5251 }
 0x1c3   : > { %2190 = vst.msk [vmem:[#allocation2 + $0x68] sm:$0xff] %vm1822_vm3, %v1531_v55  ;;  %2187 = vst.msk [vmem:[#allocation2 + $0x50] sm:$0xff] %vm1822_vm3, %v1528_v19  ;;  %v1517_v21 = vpop.xlane.xlu1 %1516  ;;  %v1511_v30 = vpop.xlane.xlu0 %1510  ;;  %v766_v39 = vsub.f32 %v734_v5, %v8738_v37  ;;  %v1546_v11 = vmax.f32 %v1482_v29, -1e+28  ;;  %v1549_v19 = vmax.f32 %v1485_v60, -1e+28 }
 0x1c4   : > { %8737 = vst [vmem:[#allocation46_spill] sm:$0xff] %v6480_v33  ;;  %v6484_v38 = vsub.f32 %v1547_v1, %v1563_v2  ;;  %v6486_v13 = vmax.f32 %v1485_v60, %v1517_v21  ;;  %v1530_v55 = vmax.f32 %v1482_v29, %v1511_v30  ;;  %1112 = vperm.xlu0 %5205, %v6477_v16   ;;  %v1484_v5 = vld [vmem:[#allocation2 + $0x70] sm:$0xff]  ;;  %v8740_v37 = vmov 1  }
 0x1c5   : > { %v6489_v20 = vsub.f32 %v1544_v34, %v1560_v8  ;;  %1087 = vperm.xlu1 %5206, %v6480_v33   ;;  %v6496_v21 = vpop.eup %5253  ;;  %v797_v30 = vmul.f32 1.442695, %v766_v39 }
 0x1c6   : > { %v1565_v49 = vmax.f32 %v6486_v13, -1e+28  ;;  %2192 = vst.msk [vmem:[#allocation2 + $0x78] sm:$0xff] %vm1822_vm3, %v6486_v13  ;;  %v1562_v46 = vmax.f32 %v1530_v55, -1e+28  ;;  %2189 = vst.msk [vmem:[#allocation2 + $0x60] sm:$0xff] %vm1822_vm3, %v1530_v55 }
 0x1c7   : > { %8739 = vst [vmem:[#allocation47_spill] sm:$0xff] %v6489_v20  ;;  %v1515_v1 = vpop.xlane.xlu0 %1514  ;;  %v8741_v20 = vmax.f32 %v6313_v12, -1e+28  ;;  %v1548_v55 = vmax.f32 %v1484_v5, -1e+28  ;;  %v6509_v33 = vpop.eup %5255  ;;  %5257 = vpow2.f32 %v797_v30  ;;  %v8758_v13 = vld [vmem:[#allocation29_spill] sm:$0xff] }
 0x1c8   : > { %v6500_v34 = vsub.f32 %v1549_v19, %v1565_v49  ;;  %v6502_v29 = vsub.f32 %v1546_v11, %v1562_v46  ;;  %v1532_v60 = vmax.f32 %v1484_v5, %v1515_v1  ;;  %5207 = vset.pattern.permute.xlu0 %v8740_v37  ;;  %v8742_v11 = vmax.f32 %v6339_v48, -1e+28 }
 0x1c9   : > { %1097 = vperm.xlu1 %5206, %v6496_v21   ;;  %1616 = vperm.xlu0 %5207, %v8741_v20   ;;  %v8743_v19 = vmax.f32 %v6369_v56, -1e+28  ;;  %v8744_v12 = vmax.f32 %v6341_v35, -1e+28  ;;  %v8745_v20 = vmax.f32 %v6391_v9, -1e+28 }
 0x1ca   : > { %v1564_v16 = vmax.f32 %v1532_v60, -1e+28  ;;  %2191 = vst.msk [vmem:[#allocation2 + $0x70] sm:$0xff] %vm1822_vm3, %v1532_v60  ;;  %v8746_v1 = vmov 0   ;;  %v8747_v48 = vmax.f32 %v6423_v43, -1e+28 }
 0x1cb   : > { %v8748_v56 = vmax.f32 %v6374_v54, -1e+28  ;;  %v8749_v35 = vmax.f32 %v6445_v32, -1e+28  ;;  %v8750_v9 = vmax.f32 %v6393_v63, -1e+28 }
 0x1cc   : > { %v6511_v39 = vsub.f32 %v1548_v55, %v1564_v16  ;;  %v8751_v30 = vmax.f32 %v6428_v15, -1e+28  ;;  %v8752_v60 = vmax.f32 %v6447_v59, -1e+28 }
 0x1cd   : > { %1107 = vperm.xlu1 %5206, %v6509_v33   ;;  %1631 = vperm.xlu0 %5207, %v8742_v11  }
 0x1d1   : > { %5208 = vset.pattern.permute.xlu1 %v8740_v37  ;;  %1641 = vperm.xlu0 %5207, %v8743_v19   ;;  %v6523_v5 = vpop.eup %5257 }
 0x1d2   : > { %1621 = vperm.xlu1 %5208, %v8744_v12  }
 0x1d5   : > { %1651 = vperm.xlu0 %5207, %v8745_v20  }
 0x1d6   : > { %5209 = vset.pattern.permute.xlu1 %v8746_v1 }
 0x1d7   : > { %1117 = vperm.xlu1 %5209, %v6523_v5  }
 0x1d9   : > { %1661 = vperm.xlu0 %5207, %v8747_v48  }
 0x1db   : > { %5210 = vset.pattern.permute.xlu1 %v8740_v37 }
 0x1dc   : > { %1626 = vperm.xlu1 %5210, %v8748_v56  }
 0x1dd   : > { %1671 = vperm.xlu0 %5207, %v8749_v35  }
 0x1e0   : > { %1636 = vperm.xlu1 %5210, %v8750_v9  }
 0x1e1   : > { %1681 = vperm.xlu0 %5207, %v1563_v2  }
 0x1e4   : > { %1646 = vperm.xlu1 %5210, %v8751_v30  }
 0x1e8   : > { %1656 = vperm.xlu1 %5210, %v8752_v60  }
 0x1ec   : > { %1666 = vperm.xlu1 %5210, %v1560_v8  }
 0x1f0   : > { %1676 = vperm.xlu1 %5210, %v1562_v46  }
 0x1f4   : > { %1686 = vperm.xlu1 %5210, %v1564_v16  }
 0x20b   : > { %v802_v43 = vpop.permute.xlu1 %801 }
 0x20c   : > { %v879_v54 = vsub.f32 %v5937_v18, %v802_v43 }
 0x20e   : > { %v895_v37 = vmul.f32 1.442695, %v879_v54 }
 0x20f   : > { %v812_v55 = vpop.permute.xlu1 %811  ;;  %v807_v32 = vpop.permute.xlu0 %806 }
 0x210   : > { %5259 = vpow2.f32 %v895_v37  ;;  %v881_v63 = vsub.f32 %v5949_v40, %v812_v55  ;;  %v880_v2 = vsub.f32 %v5958_v51, %v807_v32 }
 0x212   : > { %v899_v11 = vmul.f32 1.442695, %v881_v63  ;;  %v897_v15 = vmul.f32 1.442695, %v880_v2 }
 0x213   : > { %v822_v19 = vpop.permute.xlu0 %821  ;;  %v817_v59 = vpop.permute.xlu1 %816 }
 0x214   : > { %5261 = vpow2.f32 %v899_v11  ;;  %v883_v8 = vsub.f32 %v5981_v7, %v822_v19  ;;  %v882_v16 = vsub.f32 %v5975_v0, %v817_v59 }
 0x215   : > { %5263 = vpow2.f32 %v897_v15 }
 0x216   : > { %v903_v46 = vmul.f32 1.442695, %v883_v8  ;;  %v901_v18 = vmul.f32 1.442695, %v882_v16 }
 0x217   : > { %v832_v12 = vpop.permute.xlu0 %831 }
 0x218   : > { %5265 = vpow2.f32 %v903_v46  ;;  %v827_v20 = vpop.permute.xlu1 %826  ;;  %v885_v1 = vsub.f32 %v5998_v41, %v832_v12 }
 0x219   : > { %5267 = vpow2.f32 %v901_v18  ;;  %v884_v40 = vsub.f32 %v6001_v44, %v827_v20 }
 0x21a   : > { %v5260_v51 = vpop.eup %5259  ;;  %v907_v48 = vmul.f32 1.442695, %v885_v1 }
 0x21b   : > { %v905_v56 = vmul.f32 1.442695, %v884_v40  ;;  %959 = vadd.xlane.f32.xlu0 %v5260_v51  ;;  %v842_v35 = vpop.permute.xlu0 %841 }
 0x21c   : > { %5269 = vpow2.f32 %v907_v48  ;;  %v837_v7 = vpop.permute.xlu1 %836  ;;  %v887_v9 = vsub.f32 %v6018_v4, %v842_v35 }
 0x21d   : > { %5271 = vpow2.f32 %v905_v56  ;;  %v886_v0 = vsub.f32 %v6021_v6, %v837_v7 }
 0x21e   : > { %v5262_v30 = vpop.eup %5261  ;;  %v911_v60 = vmul.f32 1.442695, %v887_v9 }
 0x21f   : > { %v5264_v43 = vpop.eup %5263  ;;  %v909_v54 = vmul.f32 1.442695, %v886_v0  ;;  %963 = vadd.xlane.f32.xlu0 %v5262_v30  ;;  %v852_v41 = vpop.permute.xlu0 %851 }
 0x220   : > { %5273 = vpow2.f32 %v911_v60  ;;  %v847_v44 = vpop.permute.xlu1 %846  ;;  %961 = vadd.xlane.f32.xlu1 %v5264_v43  ;;  %v889_v37 = vsub.f32 %v6039_v52, %v852_v41  ;;  %v1136_v55 = vpack.c.bf16 %v5264_v43, %v5260_v51 }
 0x221   : > { %5275 = vpow2.f32 %v909_v54  ;;  %v888_v32 = vsub.f32 %v6034_v27, %v847_v44 }
 0x222   : > { %v5266_v63 = vpop.eup %5265  ;;  %v915_v4 = vmul.f32 1.442695, %v889_v37  ;;  %5018 = vmatprep.mubr.bf16.mxu0 %v1136_v55 }
 0x223   : > { %v5268_v2 = vpop.eup %5267  ;;  %v913_v6 = vmul.f32 1.442695, %v888_v32  ;;  %v862_v11 = vpop.permute.xlu0 %861 }
 0x224   : > { %5277 = vpow2.f32 %v915_v4  ;;  %v857_v15 = vpop.permute.xlu1 %856  ;;  %965 = vadd.xlane.f32.xlu0 %v5268_v2  ;;  %967 = vadd.xlane.f32.xlu1 %v5266_v63  ;;  %v891_v19 = vsub.f32 %v6056_v10, %v862_v11  ;;  %v1137_v59 = vpack.c.bf16 %v5268_v2, %v5262_v30 }
 0x225   : > { %5279 = vpow2.f32 %v913_v6  ;;  %v890_v52 = vsub.f32 %v6051_v61, %v857_v15 }
 0x226   : > { %v5270_v8 = vpop.eup %5269  ;;  %v919_v16 = vmul.f32 1.442695, %v891_v19  ;;  %5019 = vmatmul.mubr.bf16.vlgmr.msra.gmra.mrb[0].mxu0 %v1137_v59 }
 0x227   : > { %v5272_v27 = vpop.eup %5271  ;;  %v917_v46 = vmul.f32 1.442695, %v890_v52  ;;  %v872_v18 = vpop.permute.xlu0 %871 }
 0x228   : > { %5281 = vpow2.f32 %v919_v16  ;;  %969 = vadd.xlane.f32.xlu0 %v5272_v27  ;;  %v867_v12 = vpop.permute.xlu1 %866  ;;  %971 = vadd.xlane.f32.xlu1 %v5270_v8  ;;  %v893_v20 = vsub.f32 %v6067_v50, %v872_v18  ;;  %v1138_v1 = vpack.c.bf16 %v5272_v27, %v5266_v63 }
 0x229   : > { %5283 = vpow2.f32 %v917_v46  ;;  %v892_v10 = vsub.f32 %v6070_v62, %v867_v12 }
 0x22a   : > { %v5274_v40 = vpop.eup %5273  ;;  %v923_v51 = vmul.f32 1.442695, %v893_v20  ;;  %5022 = vmatprep.mubr.bf16.mxu0 %v1138_v1 }
 0x22b   : > { %v5276_v61 = vpop.eup %5275  ;;  %v921_v48 = vmul.f32 1.442695, %v892_v10  ;;  %v6555_v56 = vpop.permute.xlu0 %1047 }
 0x22c   : > { %5285 = vpow2.f32 %v923_v51  ;;  %973 = vadd.xlane.f32.xlu0 %v5276_v61  ;;  %v877_v35 = vpop.permute.xlu1 %876  ;;  %975 = vadd.xlane.f32.xlu1 %v5274_v40  ;;  %v1139_v7 = vpack.c.bf16 %v5276_v61, %v5270_v8 }
 0x22d   : > { %5287 = vpow2.f32 %v921_v48  ;;  %v894_v9 = vsub.f32 %v6083_v47, %v877_v35 }
 0x22e   : > { %v5278_v50 = vpop.eup %5277  ;;  %5023 = vmatmul.mubr.bf16.gmra.mrb[4].mxu0 %v1139_v7 }
 0x22f   : > { %v5280_v0 = vpop.eup %5279  ;;  %v925_v30 = vmul.f32 1.442695, %v894_v9  ;;  %v6558_v62 = vpop.permute.xlu0 %1062 }
 0x230   : > { %977 = vadd.xlane.f32.xlu0 %v5280_v0  ;;  %v6560_v60 = vpop.permute.xlu1 %1042  ;;  %979 = vadd.xlane.f32.xlu1 %v5278_v50  ;;  %v1140_v43 = vpack.c.bf16 %v5280_v0, %v5274_v40 }
 0x231   : > { %5289 = vpow2.f32 %v925_v30 }
 0x232   : > { %v5282_v54 = vpop.eup %5281  ;;  %5026 = vmatprep.mubr.bf16.mxu0 %v1140_v43 }
 0x233   : > { %v5284_v41 = vpop.eup %5283  ;;  %v6562_v44 = vpop.permute.xlu0 %1072 }
 0x234   : > { %981 = vadd.xlane.f32.xlu0 %v5284_v41  ;;  %v6564_v37 = vpop.permute.xlu1 %1052  ;;  %983 = vadd.xlane.f32.xlu1 %v5282_v54  ;;  %v1141_v47 = vpack.c.bf16 %v5284_v41, %v5278_v50 }
 0x236   : > { %v5286_v55 = vpop.eup %5285  ;;  %5027 = vmatmul.mubr.bf16.gmra.mrb[8].mxu0 %v1141_v47 }
 0x237   : > { %v5288_v32 = vpop.eup %5287  ;;  %v6566_v63 = vpop.permute.xlu0 %1082 }
 0x238   : > { %985 = vadd.xlane.f32.xlu0 %v5288_v32  ;;  %v6568_v4 = vpop.permute.xlu1 %1057  ;;  %987 = vadd.xlane.f32.xlu1 %v5286_v55  ;;  %v1142_v2 = vpack.c.bf16 %v5288_v32, %v5282_v54 }
 0x23a   : > { %5030 = vmatprep.mubr.bf16.mxu0 %v1142_v2 }
 0x23b   : > { %v5290_v6 = vpop.eup %5289  ;;  %v6570_v11 = vpop.permute.xlu0 %1092 }
 0x23c   : > { %989 = vadd.xlane.f32.xlu0 %v5290_v6  ;;  %v6572_v15 = vpop.permute.xlu1 %1067  ;;  %v1143_v19 = vpack.c.bf16 %v5290_v6, %v5286_v55 }
 0x23e   : > { %5031 = vmatmul.mubr.bf16.gmra.mrb[12].mxu0 %v1143_v19 }
 0x23f   : > { %v6574_v59 = vpop.permute.xlu0 %1102 }
 0x240   : > { %v6576_v52 = vpop.permute.xlu1 %1077 }
 0x243   : > { %v6578_v8 = vpop.permute.xlu0 %1112 }
 0x244   : > { %v6580_v16 = vpop.permute.xlu1 %1087 }
 0x248   : > { %v6582_v27 = vpop.permute.xlu1 %1097  ;;  %v1617_v46 = vpop.permute.xlu0 %1616 }
 0x249   : > { %v1694_v18 = vsub.f32 %v6078_v28, %v1617_v46 }
 0x24b   : > { %v1710_v12 = vmul.f32 1.442695, %v1694_v18 }
 0x24c   : > { %v6585_v20 = vpop.permute.xlu1 %1107  ;;  %v1632_v1 = vpop.permute.xlu0 %1631 }
 0x24d   : > { %5291 = vpow2.f32 %v1710_v12  ;;  %v1697_v10 = vsub.f32 %v6094_v26, %v1632_v1 }
 0x24f   : > { %v1716_v40 = vmul.f32 1.442695, %v1697_v10 }
 0x250   : > { %v1642_v51 = vpop.permute.xlu0 %1641 }
 0x251   : > { %5293 = vpow2.f32 %v1716_v40  ;;  %v1622_v61 = vpop.permute.xlu1 %1621  ;;  %v1699_v48 = vsub.f32 %v6105_v31, %v1642_v51 }
 0x252   : > { %v1695_v35 = vsub.f32 %v6088_v3, %v1622_v61 }
 0x253   : > { %v1720_v7 = vmul.f32 1.442695, %v1699_v48 }
 0x254   : > { %v1712_v9 = vmul.f32 1.442695, %v1695_v35  ;;  %v1652_v50 = vpop.permute.xlu0 %1651 }
 0x255   : > { %5295 = vpow2.f32 %v1720_v7  ;;  %v1701_v28 = vsub.f32 %v6116_v45, %v1652_v50 }
 0x256   : > { %5297 = vpow2.f32 %v1712_v9  ;;  %v6591_v0 = vpop.permute.xlu1 %1117 }
 0x257   : > { %v5292_v30 = vpop.eup %5291  ;;  %v1724_v43 = vmul.f32 1.442695, %v1701_v28  ;;  %v8753_v28 = vld [vmem:[#allocation23_spill] sm:$0xff] }
 0x258   : > { %1774 = vadd.xlane.f32.xlu1 %v5292_v30  ;;  %v1662_v26 = vpop.permute.xlu0 %1661 }
 0x259   : > { %5299 = vpow2.f32 %v1724_v43  ;;  %v1703_v54 = vsub.f32 %v6127_v17, %v1662_v26 }
 0x25b   : > { %v6594_v41 = vpop.eup %5293  ;;  %v1728_v31 = vmul.f32 1.442695, %v1703_v54  ;;  %v1627_v3 = vpop.permute.xlu1 %1626 }
 0x25c   : > { %v1696_v47 = vsub.f32 %v6099_v22, %v1627_v3  ;;  %1780 = vadd.xlane.f32.xlu1 %v6594_v41  ;;  %v1672_v55 = vpop.permute.xlu0 %1671  ;;  %v8754_v3 = vld [vmem:[#allocation24_spill] sm:$0xff] }
 0x25d   : > { %5301 = vpow2.f32 %v1728_v31  ;;  %v1705_v45 = vsub.f32 %v6136_v25, %v1672_v55 }
 0x25e   : > { %v1714_v32 = vmul.f32 1.442695, %v1696_v47 }
 0x25f   : > { %v6599_v2 = vpop.eup %5295  ;;  %v1732_v6 = vmul.f32 1.442695, %v1705_v45  ;;  %v1637_v19 = vpop.permute.xlu1 %1636 }
 0x260   : > { %v5298_v46 = vpop.eup %5297  ;;  %5303 = vpow2.f32 %v1714_v32  ;;  %v1698_v17 = vsub.f32 %v6110_v24, %v1637_v19  ;;  %1784 = vadd.xlane.f32.xlu1 %v6599_v2  ;;  %v1682_v18 = vpop.permute.xlu0 %1681  ;;  %v8755_v19 = vld [vmem:[#allocation26_spill] sm:$0xff] }
 0x261   : > { %5305 = vpow2.f32 %v1732_v6  ;;  %1776 = vadd.xlane.f32.xlu0 %v5298_v46  ;;  %v1707_v22 = vsub.f32 %v6144_v14, %v1682_v18  ;;  %v1951_v12 = vpack.c.bf16 %v5298_v46, %v5292_v30 }
 0x262   : > { %v1718_v1 = vmul.f32 1.442695, %v1698_v17 }
 0x263   : > { %v6604_v10 = vpop.eup %5299  ;;  %v1736_v25 = vmul.f32 1.442695, %v1707_v22  ;;  %v1647_v40 = vpop.permute.xlu1 %1646  ;;  %5050 = vmatprep.mubr.bf16.mxu1 %v1951_v12  ;;  %v8784_v22 = vld [vmem:[#allocation14_spill] sm:$0xff] }
 0x264   : > { %5307 = vpow2.f32 %v1718_v1  ;;  %v1700_v51 = vsub.f32 %v6121_v58, %v1647_v40  ;;  %1788 = vadd.xlane.f32.xlu1 %v6604_v10 }
 0x265   : > { %5309 = vpow2.f32 %v1736_v25 }
 0x266   : > { %v1722_v24 = vmul.f32 1.442695, %v1700_v51 }
 0x267   : > { %v6608_v61 = vpop.eup %5301  ;;  %v1657_v48 = vpop.permute.xlu1 %1656 }
 0x268   : > { %5311 = vpow2.f32 %v1722_v24  ;;  %v1702_v14 = vsub.f32 %v6132_v57, %v1657_v48  ;;  %1792 = vadd.xlane.f32.xlu1 %v6608_v61  ;;  %v8756_v24 = vld [vmem:[#allocation28_spill] sm:$0xff] }
 0x269   : > { %v1582_v48 = vmul.f32 1.442695, %v8756_v24 }
 0x26a   : > { %v6612_v35 = vpop.eup %5303  ;;  %v1726_v7 = vmul.f32 1.442695, %v1702_v14  ;;  %v1588_v14 = vmul.f32 1.442695, %v6363_v36  ;;  %v8757_v36 = vld [vmem:[#allocation43_spill] sm:$0xff] }
 0x26b   : > { %v6614_v9 = vpop.eup %5305  ;;  %1778 = vadd.xlane.f32.xlu0 %v6612_v35  ;;  %v1667_v58 = vpop.permute.xlu1 %1666 }
 0x26c   : > { %5313 = vpow2.f32 %v1726_v7  ;;  %v1704_v30 = vsub.f32 %v8753_v28, %v1667_v58  ;;  %1796 = vadd.xlane.f32.xlu1 %v6614_v9  ;;  %v1592_v7 = vmul.f32 1.442695, %v6389_v53  ;;  %v1596_v58 = vmul.f32 1.442695, %v6417_v42 }
 0x26d   : > { %v1604_v53 = vmul.f32 1.442695, %v8757_v36  ;;  %v1608_v42 = vmul.f32 1.442695, %v6484_v38  ;;  %v8760_v38 = vld [vmem:[#allocation27_spill] sm:$0xff]  ;;  %v931_v36 = vld [vmem:[#allocation3 + $0x20] sm:$0xff] }
 0x26e   : > { %v6621_v43 = vpop.eup %5307  ;;  %v1730_v57 = vmul.f32 1.442695, %v1704_v30  ;;  %v1600_v30 = vmul.f32 1.442695, %v6443_v23 }
 0x26f   : > { %v6623_v26 = vpop.eup %5309  ;;  %1782 = vadd.xlane.f32.xlu0 %v6621_v43  ;;  %v1677_v54 = vpop.permute.xlu1 %1676 }
 0x270   : > { %5315 = vpow2.f32 %v1730_v57  ;;  %v1706_v47 = vsub.f32 %v8754_v3, %v1677_v54  ;;  %1800 = vadd.xlane.f32.xlu1 %v6623_v26 }
 0x272   : > { %v6630_v55 = vpop.eup %5311  ;;  %v1734_v45 = vmul.f32 1.442695, %v1706_v47 }
 0x273   : > { %1786 = vadd.xlane.f32.xlu0 %v6630_v55  ;;  %v1687_v32 = vpop.permute.xlu1 %1686 }
 0x274   : > { %5317 = vpow2.f32 %v1734_v45  ;;  %v1708_v46 = vsub.f32 %v8755_v19, %v1687_v32  ;;  %v929_v45 = vld [vmem:[#allocation3 + $0x10] sm:$0xff]  ;;  %v928_v19 = vld [vmem:[#allocation3 + $0x8] sm:$0xff] }
 0x276   : > { %v6636_v17 = vpop.eup %5313  ;;  %v1738_v18 = vmul.f32 1.442695, %v1708_v46  ;;  %v1612_v46 = vmul.f32 1.442695, %v6500_v34 }
 0x277   : > { %1790 = vadd.xlane.f32.xlu0 %v6636_v17 }
 0x278   : > { %5319 = vpow2.f32 %v1738_v18  ;;  %v8759_v18 = vld [vmem:[#allocation33_spill] sm:$0xff] }
 0x279   : > { %5321 = vpow2.f32 %v1582_v48  ;;  %v945_v24 = vmul.f32 %v8759_v18, %v929_v45  ;;  %v932_v18 = vld [vmem:[#allocation3 + $0x28] sm:$0xff] }
 0x27a   : > { %v6641_v12 = vpop.eup %5315  ;;  %5323 = vpow2.f32 %v1588_v14  ;;  %v944_v14 = vmul.f32 %v8760_v38, %v928_v19  ;;  %v933_v19 = vld [vmem:[#allocation3 + $0x30] sm:$0xff] }
 0x27b   : > { %1794 = vadd.xlane.f32.xlu0 %v6641_v12  ;;  %5325 = vpow2.f32 %v1592_v7 }
 0x27c   : > { %5327 = vpow2.f32 %v1596_v58 }
 0x27d   : > { %5329 = vpow2.f32 %v1600_v30 }
 0x27e   : > { %v6646_v25 = vpop.eup %5317  ;;  %5331 = vpow2.f32 %v1604_v53  ;;  %v930_v53 = vld [vmem:[#allocation3 + $0x18] sm:$0xff] }
 0x27f   : > { %1798 = vadd.xlane.f32.xlu0 %v6646_v25  ;;  %5333 = vpow2.f32 %v1608_v42  ;;  %v8761_v42 = vld [vmem:[#allocation30_spill] sm:$0xff] }
 0x280   : > { %5335 = vpow2.f32 %v1612_v46 }
 0x282   : > { %v6651_v51 = vpop.eup %5319 }
 0x283   : > { %1802 = vadd.xlane.f32.xlu0 %v6651_v51  ;;  %v6660_v28 = vpop.eup %5321 }
 0x284   : > { %v6664_v57 = vpop.eup %5323 }
 0x285   : > { %v6668_v54 = vpop.eup %5325 }
 0x286   : > { %v6673_v47 = vpop.eup %5327 }
 0x287   : > { %v6679_v48 = vpop.eup %5329 }
 0x288   : > { %v6684_v34 = vpop.eup %5331 }
 0x289   : > { %v6690_v46 = vpop.eup %5333 }
 0x299   : > { %1691 = vperm.xlu0 %5207, %v1565_v49   ;;  %v927_v49 = vld [vmem:[#allocation3] sm:$0xff] }
 0x29a   : > { %v943_v3 = vmul.f32 %v8758_v13, %v927_v49  ;;  %v947_v13 = vmul.f32 %v8761_v42, %v931_v36  ;;  %v934_v42 = vld [vmem:[#allocation3 + $0x38] sm:$0xff] }
 0x29d   : > { %1857 = vperm.xlu0 %5207, %v6660_v28  }
 0x2a1   : > { %1872 = vperm.xlu0 %5207, %v6664_v57  }
 0x2a5   : > { %1882 = vperm.xlu0 %5207, %v6668_v54  }
 0x2a8   : > { %v960_v23 = vpop.xlane.xlu0 %959 }
 0x2a9   : > { %1892 = vperm.xlu0 %5207, %v6673_v47   ;;  %v991_v32 = vadd.f32 %v960_v23, %v943_v3  ;;  %v8762_v3 = vld [vmem:[#allocation36_spill] sm:$0xff] }
 0x2aa   : > { %v946_v23 = vmul.f32 %v8762_v3, %v930_v53 }
 0x2ab   : > { %1008 = vst.msk [vmem:[#allocation3] sm:$0xff] %vm1007_vm2, %v991_v32 }
 0x2ac   : > { %v964_v7 = vpop.xlane.xlu0 %963 }
 0x2ad   : > { %1902 = vperm.xlu0 %5207, %v6679_v48   ;;  %v962_v58 = vpop.xlane.xlu1 %961  ;;  %v993_v30 = vadd.f32 %v964_v7, %v945_v24 }
 0x2ae   : > { %v992_v49 = vadd.f32 %v962_v58, %v944_v14  ;;  %v8763_v14 = vld [vmem:[#allocation32_spill] sm:$0xff]  ;;  %v8764_v58 = vld [vmem:[#allocation39_spill] sm:$0xff] }
 0x2af   : > { %1010 = vst.msk [vmem:[#allocation3 + $0x10] sm:$0xff] %vm1007_vm2, %v993_v30  ;;  %v949_v7 = vmul.f32 %v8763_v14, %v933_v19  ;;  %v948_v30 = vmul.f32 %v8764_v58, %v932_v18  ;;  %v936_v14 = vld [vmem:[#allocation3 + $0x48] sm:$0xff] }
 0x2b0   : > { %1009 = vst.msk [vmem:[#allocation3 + $0x8] sm:$0xff] %vm1007_vm2, %v992_v49  ;;  %v935_v49 = vld [vmem:[#allocation3 + $0x40] sm:$0xff] }
 0x2b1   : > { %1912 = vperm.xlu0 %5207, %v6684_v34   ;;  %v968_v45 = vpop.xlane.xlu1 %967  ;;  %v966_v32 = vpop.xlane.xlu0 %965 }
 0x2b2   : > { %v995_v24 = vadd.f32 %v968_v45, %v947_v13  ;;  %v994_v38 = vadd.f32 %v966_v32, %v946_v23  ;;  %v6697_v13 = vpop.eup %5335  ;;  %v8765_v23 = vld [vmem:[#allocation35_spill] sm:$0xff]  ;;  %v8766_v32 = vld [vmem:[#allocation41_spill] sm:$0xff] }
 0x2b3   : > { %v951_v45 = vmul.f32 %v8765_v23, %v935_v49  ;;  %v950_v19 = vmul.f32 %v8766_v32, %v934_v42  ;;  %v939_v42 = vld [vmem:[#allocation3 + $0x60] sm:$0xff]  ;;  %v938_v23 = vld [vmem:[#allocation3 + $0x58] sm:$0xff]  ;;  %v5483_v32 = vld [vmem:[%s5797_s9 + $0x8] sm:$0xff]  }
 0x2b4   : > { %1012 = vst.msk [vmem:[#allocation3 + $0x20] sm:$0xff] %vm1007_vm2, %v995_v24  ;;  %1011 = vst.msk [vmem:[#allocation3 + $0x18] sm:$0xff] %vm1007_vm2, %v994_v38  ;;  %v937_v38 = vld [vmem:[#allocation3 + $0x50] sm:$0xff] }
 0x2b5   : > { %1922 = vperm.xlu0 %5207, %v6690_v46   ;;  %v972_v36 = vpop.xlane.xlu1 %971  ;;  %v970_v53 = vpop.xlane.xlu0 %969 }
 0x2b6   : > { %v997_v3 = vadd.f32 %v972_v36, %v949_v7  ;;  %v996_v40 = vadd.f32 %v970_v53, %v948_v30  ;;  %v8767_v30 = vld [vmem:[#allocation38_spill] sm:$0xff] }
 0x2b7   : > { %v953_v36 = vmul.f32 %v8767_v30, %v937_v38  ;;  %v954_v38 = vmul.f32 %v6496_v21, %v938_v23  ;;  %v940_v30 = vld [vmem:[#allocation3 + $0x68] sm:$0xff]  ;;  %v942_v23 = vld [vmem:[#allocation3 + $0x78] sm:$0xff] }
 0x2b8   : > { %1014 = vst.msk [vmem:[#allocation3 + $0x30] sm:$0xff] %vm1007_vm2, %v997_v3  ;;  %1013 = vst.msk [vmem:[#allocation3 + $0x28] sm:$0xff] %vm1007_vm2, %v996_v40  ;;  %v8768_v40 = vld [vmem:[#allocation46_spill] sm:$0xff] }
 0x2b9   : > { %1932 = vperm.xlu0 %5207, %v6697_v13   ;;  %v976_v18 = vpop.xlane.xlu1 %975  ;;  %v974_v24 = vpop.xlane.xlu0 %973  ;;  %v952_v53 = vmul.f32 %v8768_v40, %v936_v14  ;;  %v5484_v40 = vld [vmem:[%s5797_s9 + $0x18] sm:$0xff]  }
 0x2ba   : > { %v999_v58 = vadd.f32 %v976_v18, %v951_v45  ;;  %v998_v7 = vadd.f32 %v974_v24, %v950_v19  ;;  %v8583_v19 = vmov 2   ;;  %v8769_v18 = vld [vmem:[#allocation42_spill] sm:$0xff] }
 0x2bb   : > { %v955_v24 = vmul.f32 %v8769_v18, %v939_v42 }
 0x2bc   : > { %1016 = vst.msk [vmem:[#allocation3 + $0x40] sm:$0xff] %vm1007_vm2, %v999_v58  ;;  %1015 = vst.msk [vmem:[#allocation3 + $0x38] sm:$0xff] %vm1007_vm2, %v998_v7  ;;  %v941_v7 = vld [vmem:[#allocation3 + $0x70] sm:$0xff] }
 0x2bd   : > { %v980_v49 = vpop.xlane.xlu1 %979  ;;  %v978_v3 = vpop.xlane.xlu0 %977  ;;  %1961 = vrot.lane.b32.xlu0 %v5483_v32, %s5685_s4  ;;  %v5485_v32 = vld [vmem:[%s5797_s9 + $0x28] sm:$0xff]  }
 0x2be   : > { %v1001_v1 = vadd.f32 %v980_v49, %v953_v36  ;;  %v1000_v45 = vadd.f32 %v978_v3, %v952_v53  ;;  %5212 = vset.pattern.permute.xlu0 %v8583_v19  ;;  %v956_v3 = vmul.f32 %v6509_v33, %v940_v30  ;;  %v5489_v30 = vld [vmem:[%s5807_s17 + $0x30] sm:$0xff] }
 0x2c0   : > { %1018 = vst.msk [vmem:[#allocation3 + $0x50] sm:$0xff] %vm1007_vm2, %v1001_v1  ;;  %1017 = vst.msk [vmem:[#allocation3 + $0x48] sm:$0xff] %vm1007_vm2, %v1000_v45  ;;  %v8770_v1 = vld [vmem:[#allocation45_spill] sm:$0xff] }
 0x2c1   : > { %v984_v14 = vpop.xlane.xlu1 %983  ;;  %v982_v58 = vpop.xlane.xlu0 %981  ;;  %1965 = vrot.lane.b32.xlu0 %v5484_v40, %s5685_s4  ;;  %v957_v49 = vmul.f32 %v8770_v1, %v941_v7  ;;  %v6734_v7 = vld [vmem:[%s5807_s17 + $0x20] sm:$0xff]  ;;  %v5491_v40 = vld [vmem:[%s5807_s17 + $0x50] sm:$0xff] }
 0x2c2   : > { %v1003_v36 = vadd.f32 %v984_v14, %v955_v24  ;;  %v1002_v53 = vadd.f32 %v982_v58, %v954_v38  ;;  %v958_v24 = vmul.f32 %v6523_v5, %v942_v23  ;;  %v5486_v38 = vld [vmem:[%s5797_s9 + $0x38] sm:$0xff]   ;;  %v6730_v58 = vld [vmem:[%s5807_s17 + $0x8] sm:$0xff]  ;;  %v5490_v5 = vld [vmem:[%s5807_s17 + $0x40] sm:$0xff] }
 0x2c3   : > { %v1742_v1 = vld [vmem:[#allocation3] sm:$0xff]  ;;  %v5493_v23 = vld [vmem:[%s5807_s17 + $0x70] sm:$0xff] }
 0x2c4   : > { %1020 = vst.msk [vmem:[#allocation3 + $0x60] sm:$0xff] %vm1007_vm2, %v1003_v36  ;;  %1019 = vst.msk [vmem:[#allocation3 + $0x58] sm:$0xff] %vm1007_vm2, %v1002_v53  ;;  %v8771_v36 = vld [vmem:[#allocation31_spill] sm:$0xff] }
 0x2c5   : > { %v988_v21 = vpop.xlane.xlu1 %987  ;;  %v986_v42 = vpop.xlane.xlu0 %985  ;;  %1969 = vrot.lane.b32.xlu0 %v5485_v32, %s5685_s4  ;;  %v1584_v53 = vmul.f32 1.442695, %v8771_v36 }
 0x2c6   : > { %v1005_v45 = vadd.f32 %v988_v21, %v957_v49  ;;  %v1004_v18 = vadd.f32 %v986_v42, %v956_v3  ;;  %v5492_v49 = vld [vmem:[%s5807_s17 + $0x60] sm:$0xff]  ;;  %v1758_v3 = vmul.f32 %v6660_v28, %v1742_v1  ;;  %v1745_v42 = vld [vmem:[#allocation3 + $0x18] sm:$0xff] }
 0x2c7   : > { %5337 = vpow2.f32 %v1584_v53 }
 0x2c8   : > { %1022 = vst.msk [vmem:[#allocation3 + $0x70] sm:$0xff] %vm1007_vm2, %v1005_v45  ;;  %1021 = vst.msk [vmem:[#allocation3 + $0x68] sm:$0xff] %vm1007_vm2, %v1004_v18  ;;  %v8772_v45 = vld [vmem:[#allocation34_spill] sm:$0xff] }
 0x2c9   : > { %v990_v33 = vpop.xlane.xlu0 %989  ;;  %1973 = vrot.lane.b32.xlu0 %v5486_v38, %s5685_s4  ;;  %v1586_v18 = vmul.f32 1.442695, %v8772_v45  ;;  %v1747_v38 = vld [vmem:[#allocation3 + $0x28] sm:$0xff] }
 0x2ca   : > { %v1006_v14 = vadd.f32 %v990_v33, %v958_v24  ;;  %v1761_v24 = vmul.f32 %v6664_v57, %v1745_v42  ;;  %v1763_v36 = vmul.f32 %v6668_v54, %v1747_v38  ;;  %v8774_v42 = vld [vmem:[#allocation40_spill] sm:$0xff] }
 0x2cb   : > { %5339 = vpow2.f32 %v1586_v18  ;;  %v1751_v18 = vld [vmem:[#allocation3 + $0x48] sm:$0xff]  ;;  %v8775_v54 = vld [vmem:[#allocation44_spill] sm:$0xff] }
 0x2cc   : > { %1023 = vst.msk [vmem:[#allocation3 + $0x78] sm:$0xff] %vm1007_vm2, %v1006_v14  ;;  %v1767_v38 = vmul.f32 %v6679_v48, %v1751_v18 }
 0x2cd   : > { %2198 = vperm.xlu0 %5212, %v6730_v58  }
 0x2d1   : > { %2210 = vperm.xlu0 %5212, %v6734_v7  }
 0x2d5   : > { %2218 = vperm.xlu0 %5212, %v5489_v30   ;;  %v1743_v30 = vld [vmem:[#allocation3 + $0x8] sm:$0xff] }
 0x2d9   : > { %2226 = vperm.xlu0 %5212, %v5490_v5   ;;  %v6747_v5 = vpop.eup %5337 }
 0x2da   : > { %v1759_v1 = vmul.f32 %v6747_v5, %v1743_v30  ;;  %v1026_v30 = vld [vmem:[#allocation4 + $0x10] sm:$0xff] }
 0x2dd   : > { %2234 = vperm.xlu0 %5212, %v5491_v40   ;;  %v8773_v40 = vld [vmem:[#allocation37_spill] sm:$0xff] }
 0x2de   : > { %v1590_v28 = vmul.f32 1.442695, %v8773_v40 }
 0x2e0   : > { %5341 = vpow2.f32 %v1590_v28  ;;  %v1753_v28 = vld [vmem:[#allocation3 + $0x58] sm:$0xff] }
 0x2e1   : > { %2242 = vperm.xlu0 %5212, %v5492_v49   ;;  %v1749_v49 = vld [vmem:[#allocation3 + $0x38] sm:$0xff] }
 0x2e5   : > { %v1775_v21 = vpop.xlane.xlu1 %1774  ;;  %2250 = vperm.xlu0 %5212, %v5493_v23   ;;  %v1594_v23 = vmul.f32 1.442695, %v8774_v42  ;;  %v1122_v42 = vmul.f32 %v6564_v37, %v1026_v30 }
 0x2e6   : > { %v1806_v32 = vadd.f32 %v1775_v21, %v1758_v3 }
 0x2e7   : > { %5343 = vpow2.f32 %v1594_v23  ;;  %v1769_v23 = vmul.f32 %v6684_v34, %v1753_v28 }
 0x2e8   : > { %1823 = vst.msk [vmem:[#allocation3] sm:$0xff] %vm1822_vm3, %v1806_v32  ;;  %v1765_v32 = vmul.f32 %v6673_v47, %v1749_v49 }
 0x2e9   : > { %v1781_v33 = vpop.xlane.xlu1 %1780 }
 0x2ea   : > { %v1809_v14 = vadd.f32 %v1781_v33, %v1761_v24  ;;  %v1598_v33 = vmul.f32 1.442695, %v8775_v54 }
 0x2ec   : > { %1826 = vst.msk [vmem:[#allocation3 + $0x18] sm:$0xff] %vm1822_vm3, %v1809_v14  ;;  %v1744_v14 = vld [vmem:[#allocation3 + $0x10] sm:$0xff]  ;;  %5345 = vpow2.f32 %v1598_v33 }
 0x2ed   : > { %v1785_v53 = vpop.xlane.xlu1 %1784 }
 0x2ee   : > { %v1811_v3 = vadd.f32 %v1785_v53, %v1763_v36  ;;  %v1777_v21 = vpop.xlane.xlu0 %1776  ;;  %v6760_v36 = vpop.eup %5339  ;;  %v1024_v53 = vld [vmem:[#allocation4] sm:$0xff] }
 0x2ef   : > { %v1807_v57 = vadd.f32 %v1777_v21, %v1759_v1  ;;  %v1027_v1 = vld [vmem:[#allocation4 + $0x18] sm:$0xff]  ;;  %v1760_v49 = vmul.f32 %v6760_v36, %v1744_v14  ;;  %v6768_v14 = vpop.eup %5341 }
 0x2f0   : > { %1828 = vst.msk [vmem:[#allocation3 + $0x28] sm:$0xff] %vm1822_vm3, %v1811_v3  ;;  %v8776_v3 = vld [vmem:[#allocation47_spill] sm:$0xff]  ;;  %v1123_v33 = vmul.f32 %v6568_v4, %v1027_v1 }
 0x2f1   : > { %1824 = vst.msk [vmem:[#allocation3 + $0x8] sm:$0xff] %vm1822_vm3, %v1807_v57  ;;  %v1789_v45 = vpop.xlane.xlu1 %1788  ;;  %v1602_v21 = vmul.f32 1.442695, %v8776_v3  ;;  %v1025_v57 = vld [vmem:[#allocation4 + $0x8] sm:$0xff] }
 0x2f2   : > { %v1813_v24 = vadd.f32 %v1789_v45, %v1765_v32  ;;  %v1746_v32 = vld [vmem:[#allocation3 + $0x20] sm:$0xff]  ;;  %v1120_v45 = vmul.f32 %v6560_v60, %v1024_v53  ;;  %v1121_v30 = vmul.f32 %v6555_v56, %v1025_v57  ;;  %v1606_v53 = vmul.f32 1.442695, %v6502_v29  ;;  %v1030_v56 = vld [vmem:[#allocation4 + $0x30] sm:$0xff] }
 0x2f3   : > { %v1762_v60 = vmul.f32 %v6768_v14, %v1746_v32  ;;  %5347 = vpow2.f32 %v1602_v21  ;;  %v6779_v32 = vpop.eup %5343  ;;  %v1028_v21 = vld [vmem:[#allocation4 + $0x20] sm:$0xff] }
 0x2f4   : > { %1830 = vst.msk [vmem:[#allocation3 + $0x38] sm:$0xff] %vm1822_vm3, %v1813_v24  ;;  %5349 = vpow2.f32 %v1606_v53 }
 0x2f5   : > { %v1793_v40 = vpop.xlane.xlu1 %1792 }
 0x2f6   : > { %v1815_v47 = vadd.f32 %v1793_v40, %v1767_v38  ;;  %v1755_v38 = vld [vmem:[#allocation3 + $0x68] sm:$0xff] }
 0x2f8   : > { %1832 = vst.msk [vmem:[#allocation3 + $0x48] sm:$0xff] %vm1822_vm3, %v1815_v47  ;;  %v1779_v48 = vpop.xlane.xlu0 %1778 }
 0x2f9   : > { %v1808_v18 = vadd.f32 %v1779_v48, %v1760_v49  ;;  %v5020_v24 = vpop.f32.mrb[0].mxu0  ;;  %v1797_v54 = vpop.xlane.xlu1 %1796  ;;  %v1771_v49 = vmul.f32 %v6690_v46, %v1755_v38 }
 0x2fa   : > { %v1291_v40 = vadd.f32 %v5020_v24, %v1122_v42  ;;  %v1226_v3 = vpop.f32.mrb[1].mxu0  ;;  %v1817_v37 = vadd.f32 %v1797_v54, %v1769_v23  ;;  %v1748_v42 = vld [vmem:[#allocation3 + $0x30] sm:$0xff]  ;;  %v1126_v24 = vmul.f32 %v6562_v44, %v1030_v56  ;;  %v1029_v54 = vld [vmem:[#allocation4 + $0x28] sm:$0xff] }
 0x2fb   : > { %1825 = vst.msk [vmem:[#allocation3 + $0x10] sm:$0xff] %vm1822_vm3, %v1808_v18  ;;  %v1289_v34 = vadd.f32 %v1226_v3, %v1120_v45  ;;  %v5021_v28 = vpop.f32.mrb[2].mxu0  ;;  %v1031_v45 = vld [vmem:[#allocation4 + $0x38] sm:$0xff]  ;;  %v1764_v46 = vmul.f32 %v6779_v32, %v1748_v42  ;;  %v1610_v18 = vmul.f32 1.442695, %v6511_v39  ;;  %v1125_v53 = vmul.f32 %v6572_v15, %v1029_v54  ;;  %v1034_v42 = vld [vmem:[#allocation4 + $0x50] sm:$0xff] }
 0x2fc   : > { %1308 = vst.msk [vmem:[#allocation4 + $0x10] sm:$0xff] %vm1305_vm4, %v1291_v40  ;;  %v1292_v47 = vadd.f32 %v5021_v28, %v1123_v33  ;;  %v1229_v4 = vpop.f32.mrb[3].mxu0  ;;  %v1783_v1 = vpop.xlane.xlu0 %1782  ;;  %v1750_v33 = vld [vmem:[#allocation3 + $0x40] sm:$0xff]  ;;  %v1124_v40 = vmul.f32 %v6558_v62, %v1028_v21  ;;  %v1130_v21 = vmul.f32 %v6570_v11, %v1034_v42  ;;  %v1037_v42 = vld [vmem:[#allocation4 + $0x68] sm:$0xff] }
 0x2fd   : > { %1834 = vst.msk [vmem:[#allocation3 + $0x58] sm:$0xff] %vm1822_vm3, %v1817_v37  ;;  %v1290_v57 = vadd.f32 %v1229_v4, %v1121_v30  ;;  %v1810_v48 = vadd.f32 %v1783_v1, %v1762_v60  ;;  %v1801_v23 = vpop.xlane.xlu1 %1800  ;;  %v6789_v30 = vpop.eup %5345  ;;  %5351 = vpow2.f32 %v1610_v18  ;;  %v1032_v15 = vld [vmem:[#allocation4 + $0x40] sm:$0xff] }
 0x2fe   : > { %1306 = vst.msk [vmem:[#allocation4] sm:$0xff] %vm1305_vm4, %v1289_v34  ;;  %1309 = vst.msk [vmem:[#allocation4 + $0x18] sm:$0xff] %vm1305_vm4, %v1292_v47  ;;  %v1819_v29 = vadd.f32 %v1801_v23, %v1771_v49  ;;  %v1127_v34 = vmul.f32 %v6576_v52, %v1031_v45  ;;  %v1766_v47 = vmul.f32 %v6789_v30, %v1750_v33  ;;  %v1752_v49 = vld [vmem:[#allocation3 + $0x50] sm:$0xff] }
 0x2ff   : > { %1307 = vst.msk [vmem:[#allocation4 + $0x8] sm:$0xff] %vm1305_vm4, %v1290_v57  ;;  %v6797_v57 = vpop.eup %5347  ;;  %v1128_v18 = vmul.f32 %v6566_v63, %v1032_v15  ;;  %v1756_v63 = vld [vmem:[#allocation3 + $0x70] sm:$0xff] }
 0x300   : > { %1827 = vst.msk [vmem:[#allocation3 + $0x20] sm:$0xff] %vm1822_vm3, %v1810_v48  ;;  %1836 = vst.msk [vmem:[#allocation3 + $0x68] sm:$0xff] %vm1822_vm3, %v1819_v29  ;;  %v1787_v38 = vpop.xlane.xlu0 %1786  ;;  %v1035_v48 = vld [vmem:[#allocation4 + $0x58] sm:$0xff]  ;;  %v1768_v23 = vmul.f32 %v6797_v57, %v1752_v49  ;;  %v1033_v29 = vld [vmem:[#allocation4 + $0x48] sm:$0xff] }
 0x301   : > { %v1812_v3 = vadd.f32 %v1787_v38, %v1764_v46  ;;  %v5024_v37 = vpop.f32.mrb[4].mxu0  ;;  %v1754_v46 = vld [vmem:[#allocation3 + $0x60] sm:$0xff]  ;;  %v5350_v38 = vpop.eup %5349  ;;  %v1131_v33 = vmul.f32 %v6582_v27, %v1035_v48 }
 0x302   : > { %v1295_v28 = vadd.f32 %v5024_v37, %v1126_v24  ;;  %v1242_v60 = vpop.f32.mrb[5].mxu0  ;;  %v1129_v37 = vmul.f32 %v6580_v16, %v1033_v29  ;;  %v1039_v16 = vld [vmem:[#allocation4 + $0x78] sm:$0xff] }
 0x303   : > { %1829 = vst.msk [vmem:[#allocation3 + $0x30] sm:$0xff] %vm1822_vm3, %v1812_v3  ;;  %v1293_v39 = vadd.f32 %v1242_v60, %v1124_v40  ;;  %v5025_v44 = vpop.f32.mrb[6].mxu0  ;;  %v1770_v60 = vmul.f32 %v5350_v38, %v1754_v46 }
 0x304   : > { %1312 = vst.msk [vmem:[#allocation4 + $0x30] sm:$0xff] %vm1305_vm4, %v1295_v28  ;;  %v1296_v62 = vadd.f32 %v5025_v44, %v1127_v34  ;;  %v1245_v4 = vpop.f32.mrb[7].mxu0  ;;  %v1791_v1 = vpop.xlane.xlu0 %1790  ;;  %v1038_v44 = vld [vmem:[#allocation4 + $0x70] sm:$0xff] }
 0x305   : > { %1310 = vst.msk [vmem:[#allocation4 + $0x20] sm:$0xff] %vm1305_vm4, %v1293_v39  ;;  %v1294_v52 = vadd.f32 %v1245_v4, %v1125_v53  ;;  %v1814_v56 = vadd.f32 %v1791_v1, %v1766_v47  ;;  %v1036_v4 = vld [vmem:[#allocation4 + $0x60] sm:$0xff]  ;;  %v1134_v49 = vmul.f32 %v6578_v8, %v1038_v44  ;;  %v6872_v44 = vld [vmem:[%s5807_s17 + $0x28] sm:$0xff] }
 0x306   : > { %1313 = vst.msk [vmem:[#allocation4 + $0x38] sm:$0xff] %vm1305_vm4, %v1296_v62 }
 0x307   : > { %1311 = vst.msk [vmem:[#allocation4 + $0x28] sm:$0xff] %vm1305_vm4, %v1294_v52  ;;  %v5352_v62 = vpop.eup %5351 }
 0x308   : > { %1831 = vst.msk [vmem:[#allocation3 + $0x40] sm:$0xff] %vm1822_vm3, %v1814_v56  ;;  %v1795_v45 = vpop.xlane.xlu0 %1794  ;;  %v1772_v1 = vmul.f32 %v5352_v62, %v1756_v63  ;;  %v1132_v56 = vmul.f32 %v6574_v59, %v1036_v4 }
 0x309   : > { %v1816_v24 = vadd.f32 %v1795_v45, %v1768_v23  ;;  %v5028_v54 = vpop.f32.mrb[8].mxu0  ;;  %v1135_v23 = vmul.f32 %v6591_v0, %v1039_v16  ;;  %v1133_v45 = vmul.f32 %v6585_v20, %v1037_v42  ;;  %v8777_v0 = vld [vmem:[#allocation25_spill] sm:$0xff] }
 0x30a   : > { %v1299_v40 = vadd.f32 %v5028_v54, %v1130_v21  ;;  %v1258_v3 = vpop.f32.mrb[9].mxu0  ;;  %v6888_v16 = vld [vmem:[%s5807_s17 + $0x58] sm:$0xff] }
 0x30b   : > { %1833 = vst.msk [vmem:[#allocation3 + $0x50] sm:$0xff] %vm1822_vm3, %v1816_v24  ;;  %v1297_v34 = vadd.f32 %v1258_v3, %v1128_v18  ;;  %v5029_v28 = vpop.f32.mrb[10].mxu0 }
 0x30c   : > { %1316 = vst.msk [vmem:[#allocation4 + $0x50] sm:$0xff] %vm1305_vm4, %v1299_v40  ;;  %v1300_v11 = vadd.f32 %v5029_v28, %v1131_v33  ;;  %v1261_v53 = vpop.f32.mrb[11].mxu0  ;;  %v1799_v39 = vpop.xlane.xlu0 %1798  ;;  %v6854_v28 = vld [vmem:[%s5807_s17] sm:$0xff] }
 0x30d   : > { %1314 = vst.msk [vmem:[#allocation4 + $0x40] sm:$0xff] %vm1305_vm4, %v1297_v34  ;;  %v1298_v47 = vadd.f32 %v1261_v53, %v1129_v37  ;;  %v1818_v27 = vadd.f32 %v1799_v39, %v1770_v60  ;;  %v6866_v39 = vld [vmem:[%s5807_s17 + $0x18] sm:$0xff] }
 0x30e   : > { %1317 = vst.msk [vmem:[#allocation4 + $0x58] sm:$0xff] %vm1305_vm4, %v1300_v11  ;;  %v6860_v11 = vld [vmem:[%s5807_s17 + $0x10] sm:$0xff] }
 0x30f   : > { %1315 = vst.msk [vmem:[#allocation4 + $0x48] sm:$0xff] %vm1305_vm4, %v1298_v47  ;;  %v6876_v47 = vld [vmem:[%s5807_s17 + $0x38] sm:$0xff] }
 0x310   : > { %1835 = vst.msk [vmem:[#allocation3 + $0x60] sm:$0xff] %vm1822_vm3, %v1818_v27  ;;  %v1803_v52 = vpop.xlane.xlu0 %1802 }
 0x311   : > { %v1820_v15 = vadd.f32 %v1803_v52, %v1772_v1  ;;  %v5032_v48 = vpop.f32.mrb[12].mxu0  ;;  %v6892_v1 = vld [vmem:[%s5807_s17 + $0x68] sm:$0xff]  ;;  %v8778_v52 = vld [vmem:[#allocation6_spill] sm:$0xff] }
 0x312   : > { %v1303_v21 = vadd.f32 %v5032_v48, %v1134_v49  ;;  %v1274_v29 = vpop.f32.mrb[13].mxu0  ;;  %v6899_v48 = vld [vmem:[%s5802_s13] sm:$0xf] }
 0x313   : > { %1837 = vst.msk [vmem:[#allocation3 + $0x70] sm:$0xff] %vm1822_vm3, %v1820_v15  ;;  %v1301_v46 = vadd.f32 %v1274_v29, %v1132_v56  ;;  %v5033_v18 = vpop.f32.mrb[14].mxu0  ;;  %v2259_v56 = vsub.s32 2, %v8778_v52 }
 0x314   : > { %1320 = vst.msk [vmem:[#allocation4 + $0x70] sm:$0xff] %vm1305_vm4, %v1303_v21  ;;  %v1304_v24 = vadd.f32 %v5033_v18, %v1135_v23  ;;  %v1277_v8 = vpop.f32.mrb[15].mxu0 }
 0x315   : > { %1318 = vst.msk [vmem:[#allocation4 + $0x60] sm:$0xff] %vm1305_vm4, %v1301_v46  ;;  %v1302_v54 = vadd.f32 %v1277_v8, %v1133_v45  ;;  %v6902_v23 = vrot.slane %v6899_v48, %v2259_v56 }
 0x316   : > { %1321 = vst.msk [vmem:[#allocation4 + $0x78] sm:$0xff] %vm1305_vm4, %v1304_v24 }
 0x317   : > { %1319 = vst.msk [vmem:[#allocation4 + $0x68] sm:$0xff] %vm1305_vm4, %v1302_v54 }
 0x318   : > { %v1692_v59 = vpop.permute.xlu0 %1691 }
 0x319   : > { %v1709_v33 = vsub.f32 %v8777_v0, %v1692_v59 }
 0x31b   : > { %v1740_v40 = vmul.f32 1.442695, %v1709_v33 }
 0x31c   : > { %v6830_v3 = vpop.permute.xlu0 %1857 }
 0x31d   : > { %5353 = vpow2.f32 %v1740_v40  ;;  %v8779_v40 = vld [vmem:[#allocation9_spill] sm:$0xff] }
 0x320   : > { %v6833_v37 = vpop.permute.xlu0 %1872 }
 0x324   : > { %v6836_v34 = vpop.permute.xlu0 %1882 }
 0x327   : > { %v6823_v20 = vpop.eup %5353 }
 0x328   : > { %1804 = vadd.xlane.f32.xlu1 %v6823_v20 }
 0x339   : > { %1862 = vperm.xlu1 %5210, %v6747_v5   ;;  %v6838_v5 = vpop.permute.xlu0 %1892 }
 0x33d   : > { %1867 = vperm.xlu1 %5210, %v6760_v36   ;;  %v5494_v36 = vld [vmem:[%s5797_s9] sm:$0xff]  }
 0x341   : > { %1877 = vperm.xlu1 %5210, %v6768_v14   ;;  %v5495_v14 = vld [vmem:[%s5797_s9 + $0x10] sm:$0xff]  }
 0x345   : > { %1887 = vperm.xlu1 %5210, %v6779_v32   ;;  %v6845_v32 = vpop.permute.xlu0 %1902 }
 0x349   : > { %1897 = vperm.xlu1 %5210, %v6789_v30   ;;  %v5496_v30 = vld [vmem:[%s5797_s9 + $0x20] sm:$0xff]  }
 0x34d   : > { %1907 = vperm.xlu1 %5210, %v6797_v57   ;;  %v6849_v57 = vpop.permute.xlu0 %1912 }
 0x351   : > { %1917 = vperm.xlu1 %5210, %v5350_v38   ;;  %v5497_v38 = vld [vmem:[%s5797_s9 + $0x30] sm:$0xff]   ;;  %v6857_v60 = vpop.permute.xlu0 %1922 }
 0x355   : > { %1927 = vperm.xlu1 %5210, %v5352_v62   ;;  %v6863_v53 = vpop.permute.xlu0 %1932  ;;  %v6882_v62 = vld [vmem:[%s5807_s17 + $0x48] sm:$0xff] }
 0x359   : > { %1959 = vrot.lane.b32.xlu1 %v5494_v36, %s5685_s4  ;;  %v6869_v63 = vpop.permute.xlu0 %1961 }
 0x35a   : > { %5211 = vset.pattern.permute.xlu1 %v8583_v19 }
 0x35d   : > { %1963 = vrot.lane.b32.xlu1 %v5495_v14, %s5685_s4  ;;  %v6879_v27 = vpop.permute.xlu0 %1965 }
 0x361   : > { %1967 = vrot.lane.b32.xlu1 %v5496_v30, %s5685_s4  ;;  %v6885_v4 = vpop.permute.xlu0 %1969 }
 0x365   : > { %1971 = vrot.lane.b32.xlu1 %v5497_v38, %s5685_s4  ;;  %v6895_v49 = vpop.permute.xlu0 %1973  ;;  %v8780_v38 = vld [vmem:[#allocation10_spill] sm:$0xff] }
 0x369   : > { %2194 = vperm.xlu1 %5211, %v6854_v28   ;;  %v2199_v42 = vpop.permute.xlu0 %2198 }
 0x36a   : > { %v2262_v29 = vadd.f32 %v6902_v23, %v2199_v42 }
 0x36c   : > { %v2278_v45 = vmul.f32 0.2, %v2262_v29 }
 0x36d   : > { %2202 = vperm.xlu1 %5211, %v6860_v11   ;;  %v2211_v15 = vpop.permute.xlu0 %2210 }
 0x36e   : > { %v2265_v46 = vadd.f32 %v6902_v23, %v2211_v15  ;;  %v2294_v24 = vmax.f32 %v2262_v29, %v2278_v45 }
 0x370   : > { %v2281_v8 = vmul.f32 0.2, %v2265_v46  ;;  %v6908_v36 = vadd.f32 %v2294_v24, %v8779_v40 }
 0x371   : > { %2206 = vperm.xlu1 %5211, %v6866_v39   ;;  %v2219_v21 = vpop.permute.xlu0 %2218 }
 0x372   : > { %v2267_v54 = vadd.f32 %v6902_v23, %v2219_v21  ;;  %v2297_v0 = vmax.f32 %v2265_v46, %v2281_v8  ;;  %v8782_v21 = vld [vmem:[#allocation12_spill] sm:$0xff] }
 0x374   : > { %v2283_v33 = vmul.f32 0.2, %v2267_v54  ;;  %v6913_v42 = vadd.f32 %v2297_v0, %v8780_v38 }
 0x375   : > { %2214 = vperm.xlu1 %5211, %v6872_v44   ;;  %v2227_v18 = vpop.permute.xlu0 %2226 }
 0x376   : > { %v2269_v14 = vadd.f32 %v6902_v23, %v2227_v18  ;;  %v2299_v30 = vmax.f32 %v2267_v54, %v2283_v33  ;;  %8781 = vst [vmem:[#allocation23_spill] sm:$0xff] %v6913_v42  ;;  %v1757_v54 = vld [vmem:[#allocation3 + $0x78] sm:$0xff] }
 0x378   : > { %v2285_v15 = vmul.f32 0.2, %v2269_v14  ;;  %v6918_v45 = vadd.f32 %v2299_v30, %v8782_v21 }
 0x379   : > { %2222 = vperm.xlu1 %5211, %v6876_v47   ;;  %v2235_v59 = vpop.permute.xlu0 %2234 }
 0x37a   : > { %v2271_v29 = vadd.f32 %v6902_v23, %v2235_v59  ;;  %8783 = vst [vmem:[#allocation24_spill] sm:$0xff] %v6918_v45  ;;  %v2301_v46 = vmax.f32 %v2269_v14, %v2285_v15  ;;  %v1773_v59 = vmul.f32 %v6697_v13, %v1757_v54 }
 0x37c   : > { %v2287_v24 = vmul.f32 0.2, %v2271_v29  ;;  %v6924_v6 = vadd.f32 %v2301_v46, %v8784_v22 }
 0x37d   : > { %2230 = vperm.xlu1 %5211, %v6882_v62   ;;  %v2243_v56 = vpop.permute.xlu0 %2242 }
 0x37e   : > { %v2273_v8 = vadd.f32 %v6902_v23, %v2243_v56  ;;  %v2303_v33 = vmax.f32 %v2271_v29, %v2287_v24  ;;  %8785 = vst [vmem:[#allocation26_spill] sm:$0xff] %v6924_v6  ;;  %v8786_v56 = vld [vmem:[#allocation16_spill] sm:$0xff]  ;;  %v8788_v24 = vld [vmem:[#allocation18_spill] sm:$0xff] }
 0x380   : > { %v2289_v0 = vmul.f32 0.2, %v2273_v8  ;;  %v6929_v50 = vadd.f32 %v2303_v33, %v8786_v56 }
 0x381   : > { %2238 = vperm.xlu1 %5211, %v6888_v16   ;;  %v2251_v18 = vpop.permute.xlu0 %2250 }
 0x382   : > { %v2275_v19 = vadd.f32 %v6902_v23, %v2251_v18  ;;  %v2305_v30 = vmax.f32 %v2273_v8, %v2289_v0  ;;  %8787 = vst [vmem:[#allocation28_spill] sm:$0xff] %v6929_v50 }
 0x384   : > { %v2291_v15 = vmul.f32 0.2, %v2275_v19  ;;  %v6936_v18 = vadd.f32 %v2305_v30, %v8788_v24 }
 0x385   : > { %2246 = vperm.xlu1 %5211, %v6892_v1  }
 0x386   : > { %v2307_v46 = vmax.f32 %v2275_v19, %v2291_v15  ;;  %8789 = vst [vmem:[#allocation43_spill] sm:$0xff] %v6936_v18 }
 0x3a9   : > { %2343 = vmax.xlane.f32.xlu1 %v6908_v36 }
 0x3ad   : > { %2349 = vmax.xlane.f32.xlu1 %v6913_v42 }
 0x3b1   : > { %2353 = vmax.xlane.f32.xlu1 %v6918_v45 }
 0x3b5   : > { %v1805_v31 = vpop.xlane.xlu1 %1804  ;;  %2357 = vmax.xlane.f32.xlu1 %v6924_v6 }
 0x3b6   : > { %v1821_v14 = vadd.f32 %v1805_v31, %v1773_v59  ;;  %v8790_v31 = vld [vmem:[#allocation20_spill] sm:$0xff] }
 0x3b7   : > { %v6942_v8 = vadd.f32 %v2307_v46, %v8790_v31  ;;  %v8792_v31 = vld [vmem:[#allocation7_spill] sm:$0xff] }
 0x3b8   : > { %1838 = vst.msk [vmem:[#allocation3 + $0x78] sm:$0xff] %vm1822_vm3, %v1821_v14  ;;  %v6956_v14 = vld [vmem:[%s5807_s17 + $0x78] sm:$0xff] }
 0x3b9   : > { %v6932_v29 = vpop.permute.xlu1 %1862  ;;  %2361 = vmax.xlane.f32.xlu1 %v6929_v50  ;;  %8791 = vst [vmem:[#allocation29_spill] sm:$0xff] %v6942_v8 }
 0x3bd   : > { %v6938_v13 = vpop.permute.xlu1 %1867  ;;  %2365 = vmax.xlane.f32.xlu1 %v6936_v18 }
 0x3c1   : > { %v6944_v54 = vpop.permute.xlu1 %1877  ;;  %2369 = vmax.xlane.f32.xlu1 %v6942_v8 }
 0x3c5   : > { %v6947_v33 = vpop.permute.xlu1 %1887 }
 0x3c9   : > { %v6949_v0 = vpop.permute.xlu1 %1897 }
 0x3cd   : > { %v6951_v59 = vpop.permute.xlu1 %1907 }
 0x3d1   : > { %v6953_v19 = vpop.permute.xlu1 %1917 }
 0x3d2   : > { %2254 = vperm.xlu1 %5211, %v6956_v14  }
 0x3d5   : > { %v6959_v30 = vpop.permute.xlu1 %1927 }
 0x3d9   : > { %v1960_v15 = vpop.permute.xlu1 %1959 }
 0x3da   : > { %5034 = vmatprep.subr.bf16.mxu1 %v1960_v15 }
 0x3db   : > { %5035 = vmatpush3.bf16.msra.mxu1 %v1960_v15 }
 0x3dc   : > { %5036 = vmatprep.subr.bf16.mxu1 %v6869_v63 }
 0x3dd   : > { %v1964_v46 = vpop.permute.xlu1 %1963 }
 0x3df   : > { %5037 = vmatpush3.bf16.msra.mxu1 %v6869_v63 }
 0x3e0   : > { %5038 = vmatprep.subr.bf16.mxu1 %v1964_v46 }
 0x3e1   : > { %v1968_v8 = vpop.permute.xlu1 %1967 }
 0x3e3   : > { %5039 = vmatpush3.bf16.msra.mxu1 %v1964_v46 }
 0x3e4   : > { %5040 = vmatprep.subr.bf16.mxu1 %v6879_v27 }
 0x3e5   : > { %v1972_v18 = vpop.permute.xlu1 %1971 }
 0x3e7   : > { %5041 = vmatpush3.bf16.msra.mxu1 %v6879_v27 }
 0x3e8   : > { %5042 = vmatprep.subr.bf16.mxu1 %v1968_v8 }
 0x3e9   : > { %v2195_v50 = vpop.permute.xlu1 %2194 }
 0x3ea   : > { %v2261_v6 = vadd.f32 %v6902_v23, %v2195_v50 }
 0x3eb   : > { %5043 = vmatpush3.bf16.msra.mxu1 %v1968_v8 }
 0x3ec   : > { %v2277_v45 = vmul.f32 0.2, %v2261_v6  ;;  %5044 = vmatprep.subr.bf16.mxu1 %v6885_v4 }
 0x3ed   : > { %v2203_v15 = vpop.permute.xlu1 %2202 }
 0x3ee   : > { %v2293_v42 = vmax.f32 %v2261_v6, %v2277_v45  ;;  %v2263_v63 = vadd.f32 %v6902_v23, %v2203_v15  ;;  %v8793_v6 = vld [vmem:[#allocation8_spill] sm:$0xff] }
 0x3ef   : > { %5045 = vmatpush3.bf16.msra.mxu1 %v6885_v4 }
 0x3f0   : > { %v2279_v46 = vmul.f32 0.2, %v2263_v63  ;;  %5046 = vmatprep.subr.bf16.mxu1 %v1972_v18  ;;  %v6970_v24 = vadd.f32 %v2293_v42, %v8792_v31 }
 0x3f1   : > { %v2207_v27 = vpop.permute.xlu1 %2206 }
 0x3f2   : > { %v2295_v56 = vmax.f32 %v2263_v63, %v2279_v46  ;;  %v2264_v22 = vadd.f32 %v6902_v23, %v2207_v27  ;;  %2341 = vmax.xlane.f32.xlu0 %v6970_v24  ;;  %v8795_v63 = vld [vmem:[#allocation11_spill] sm:$0xff] }
 0x3f3   : > { %5047 = vmatpush3.bf16.msra.mxu1 %v1972_v18 }
 0x3f4   : > { %v2280_v50 = vmul.f32 0.2, %v2264_v22  ;;  %5048 = vmatprep.subr.bf16.mxu1 %v6895_v49  ;;  %v6976_v45 = vadd.f32 %v2295_v56, %v8793_v6  ;;  %v8797_v56 = vpack.c.bf16 %v6594_v41, %v6612_v35 }
 0x3f5   : > { %v2215_v8 = vpop.permute.xlu1 %2214 }
 0x3f6   : > { %8794 = vst [vmem:[#allocation33_spill] sm:$0xff] %v6976_v45  ;;  %v2296_v4 = vmax.f32 %v2264_v22, %v2280_v50  ;;  %v2266_v15 = vadd.f32 %v6902_v23, %v2215_v8  ;;  %2345 = vmax.xlane.f32.xlu0 %v6976_v45  ;;  %v8798_v22 = vpack.c.bf16 %v6599_v2, %v6621_v43 }
 0x3f7   : > { %5049 = vmatpush3.bf16.msra.mxu1 %v6895_v49  ;;  %v8799_v49 = vld [vmem:[#allocation13_spill] sm:$0xff]  ;;  %v8801_v2 = vpack.c.bf16 %v6604_v10, %v6630_v55  ;;  %v8802_v43 = vpack.c.bf16 %v6608_v61, %v6636_v17  ;;  %v8805_v61 = vpack.c.bf16 %v6614_v9, %v6641_v12  ;;  %v8806_v55 = vpack.c.bf16 %v6623_v26, %v6646_v25  ;;  %v7036_v26 = vld [vmem:[#allocation2 + $0x20] sm:$0xff] }
 0x3f8   : > { %v2282_v42 = vmul.f32 0.2, %v2266_v15  ;;  %v6982_v46 = vadd.f32 %v2296_v4, %v8795_v63  ;;  %v8807_v17 = vld [vmem:[#allocation21_spill] sm:$0xff]  ;;  %8810 = vst [vmem:[#allocation32_spill] sm:$0xff] %v7036_v26 }
 0x3f9   : > { %v2223_v27 = vpop.permute.xlu1 %2222 }
 0x3fa   : > { %8796 = vst [vmem:[#allocation27_spill] sm:$0xff] %v6982_v46  ;;  %v2298_v18 = vmax.f32 %v2266_v15, %v2282_v42  ;;  %v2268_v21 = vadd.f32 %v6902_v23, %v2223_v27  ;;  %2347 = vmax.xlane.f32.xlu0 %v6982_v46  ;;  %5051 = vmatmul.mubr.bf16.vlgmr.msra.gmra.mrb[0].mxu1 %v8797_v56  ;;  %v8800_v27 = vld [vmem:[#allocation15_spill] sm:$0xff] }
 0x3fb   : > { %5054 = vmatprep.mubr.bf16.mxu1 %v8798_v22 }
 0x3fc   : > { %v2284_v50 = vmul.f32 0.2, %v2268_v21  ;;  %v6993_v8 = vadd.f32 %v2298_v18, %v8799_v49  ;;  %v8803_v18 = vld [vmem:[#allocation17_spill] sm:$0xff] }
 0x3fd   : > { %v2231_v4 = vpop.permute.xlu1 %2230 }
 0x3fe   : > { %v2300_v45 = vmax.f32 %v2268_v21, %v2284_v50  ;;  %v2270_v15 = vadd.f32 %v6902_v23, %v2231_v4  ;;  %2351 = vmax.xlane.f32.xlu0 %v6993_v8 }
 0x400   : > { %v2286_v42 = vmul.f32 0.2, %v2270_v15  ;;  %v6998_v46 = vadd.f32 %v2300_v45, %v8800_v27 }
 0x401   : > { %v2239_v41 = vpop.permute.xlu1 %2238 }
 0x402   : > { %v2302_v35 = vmax.f32 %v2270_v15, %v2286_v42  ;;  %v2272_v56 = vadd.f32 %v6902_v23, %v2239_v41  ;;  %2355 = vmax.xlane.f32.xlu0 %v6998_v46  ;;  %5055 = vmatmul.mubr.bf16.gmra.mrb[4].mxu1 %v8801_v2  ;;  %v8804_v42 = vld [vmem:[#allocation19_spill] sm:$0xff] }
 0x403   : > { %5058 = vmatprep.mubr.bf16.mxu1 %v8802_v43  ;;  %v7029_v2 = vld [vmem:[#allocation2 + $0x8] sm:$0xff] }
 0x404   : > { %v2288_v21 = vmul.f32 0.2, %v2272_v56  ;;  %v7009_v22 = vadd.f32 %v2302_v35, %v8803_v18  ;;  %8808 = vst [vmem:[#allocation30_spill] sm:$0xff] %v7029_v2 }
 0x405   : > { %v2247_v45 = vpop.permute.xlu1 %2246 }
 0x406   : > { %v2304_v50 = vmax.f32 %v2272_v56, %v2288_v21  ;;  %v2274_v4 = vadd.f32 %v6902_v23, %v2247_v45  ;;  %2359 = vmax.xlane.f32.xlu0 %v7009_v22  ;;  %v1958_v56 = vpack.c.bf16 %v6823_v20, %v6651_v51  ;;  %v7043_v51 = vld [vmem:[#allocation2 + $0x30] sm:$0xff]  ;;  %v7050_v45 = vld [vmem:[#allocation2 + $0x40] sm:$0xff] }
 0x407   : > { %8812 = vst [vmem:[#allocation35_spill] sm:$0xff] %v7043_v51  ;;  %8814 = vst [vmem:[#allocation38_spill] sm:$0xff] %v7050_v45 }
 0x408   : > { %v2290_v15 = vmul.f32 0.2, %v2274_v4  ;;  %v7014_v41 = vadd.f32 %v2304_v50, %v8804_v42 }
 0x40a   : > { %v2306_v10 = vmax.f32 %v2274_v4, %v2290_v15  ;;  %2363 = vmax.xlane.f32.xlu0 %v7014_v41  ;;  %5059 = vmatmul.mubr.bf16.gmra.mrb[8].mxu1 %v8805_v61  ;;  %v7057_v15 = vld [vmem:[#allocation2 + $0x50] sm:$0xff] }
 0x40b   : > { %5062 = vmatprep.mubr.bf16.mxu1 %v8806_v55  ;;  %8816 = vst [vmem:[#allocation42_spill] sm:$0xff] %v7057_v15  ;;  %v7064_v55 = vld [vmem:[#allocation2 + $0x60] sm:$0xff] }
 0x40c   : > { %v7024_v35 = vadd.f32 %v2306_v10, %v8807_v17  ;;  %8818 = vst [vmem:[#allocation31_spill] sm:$0xff] %v7064_v55 }
 0x40e   : > { %2367 = vmax.xlane.f32.xlu0 %v7024_v35 }
 0x412   : > { %5063 = vmatmul.mubr.bf16.gmra.mrb[12].mxu1 %v1958_v56 }
 0x436   : > { %v2344_v43 = vpop.xlane.xlu1 %2343 }
 0x437   : > { %v7032_v9 = vmax.f32 %v7029_v2, %v2344_v43 }
 0x439   : > { %8809 = vst [vmem:[#allocation36_spill] sm:$0xff] %v7032_v9  ;;  %3033 = vst.msk [vmem:[#allocation2 + $0x8] sm:$0xff] %vm2677_vm5, %v7032_v9 }
 0x43a   : > { %v2350_v12 = vpop.xlane.xlu1 %2349 }
 0x43b   : > { %v7039_v25 = vmax.f32 %v7036_v26, %v2350_v12  ;;  %v7071_v12 = vld [vmem:[#allocation2 + $0x70] sm:$0xff]  ;;  %v8822_v26 = vld [vmem:[#allocation22_spill] sm:$0xff] }
 0x43c   : > { %8820 = vst [vmem:[#allocation37_spill] sm:$0xff] %v7071_v12 }
 0x43d   : > { %8811 = vst [vmem:[#allocation39_spill] sm:$0xff] %v7039_v25  ;;  %3036 = vst.msk [vmem:[#allocation2 + $0x20] sm:$0xff] %vm2677_vm5, %v7039_v25 }
 0x43e   : > { %v2354_v20 = vpop.xlane.xlu1 %2353 }
 0x43f   : > { %v7046_v21 = vmax.f32 %v7043_v51, %v2354_v20 }
 0x441   : > { %8813 = vst [vmem:[#allocation41_spill] sm:$0xff] %v7046_v21  ;;  %3038 = vst.msk [vmem:[#allocation2 + $0x30] sm:$0xff] %vm2677_vm5, %v7046_v21 }
 0x442   : > { %v2358_v50 = vpop.xlane.xlu1 %2357 }
 0x443   : > { %v7053_v4 = vmax.f32 %v7050_v45, %v2358_v50 }
 0x445   : > { %8815 = vst [vmem:[#allocation46_spill] sm:$0xff] %v7053_v4  ;;  %3040 = vst.msk [vmem:[#allocation2 + $0x40] sm:$0xff] %vm2677_vm5, %v7053_v4 }
 0x446   : > { %v2362_v10 = vpop.xlane.xlu1 %2361 }
 0x447   : > { %v7060_v61 = vmax.f32 %v7057_v15, %v2362_v10 }
 0x449   : > { %8817 = vst [vmem:[#allocation45_spill] sm:$0xff] %v7060_v61  ;;  %3042 = vst.msk [vmem:[#allocation2 + $0x50] sm:$0xff] %vm2677_vm5, %v7060_v61 }
 0x44a   : > { %v2366_v56 = vpop.xlane.xlu1 %2365 }
 0x44b   : > { %v7067_v43 = vmax.f32 %v7064_v55, %v2366_v56  ;;  %v8600_v55 = vmax.f32 %v7032_v9, -1e+28 }
 0x44d   : > { %8819 = vst [vmem:[#allocation34_spill] sm:$0xff] %v7067_v43  ;;  %3044 = vst.msk [vmem:[#allocation2 + $0x60] sm:$0xff] %vm2677_vm5, %v7067_v43 }
 0x44e   : > { %v2370_v20 = vpop.xlane.xlu1 %2369 }
 0x44f   : > { %v7074_v50 = vmax.f32 %v7071_v12, %v2370_v20  ;;  %v8599_v20 = vmax.f32 %v7039_v25, -1e+28  ;;  %v8601_v12 = vmax.f32 %v7046_v21, -1e+28 }
 0x451   : > { %8821 = vst [vmem:[#allocation40_spill] sm:$0xff] %v7074_v50  ;;  %3046 = vst.msk [vmem:[#allocation2 + $0x70] sm:$0xff] %vm2677_vm5, %v7074_v50 }
 0x452   : > { %v2255_v10 = vpop.permute.xlu1 %2254 }
 0x453   : > { %v2276_v15 = vadd.f32 %v6902_v23, %v2255_v10  ;;  %v8602_v23 = vmax.f32 %v7053_v4, -1e+28 }
 0x455   : > { %v2292_v45 = vmul.f32 0.2, %v2276_v15 }
 0x457   : > { %v2308_v51 = vmax.f32 %v2276_v15, %v2292_v45 }
 0x459   : > { %v7080_v56 = vadd.f32 %v2308_v51, %v8822_v26  ;;  %v7095_v51 = vld [vmem:[#allocation2] sm:$0xff] }
 0x45b   : > { %8823 = vst [vmem:[#allocation44_spill] sm:$0xff] %v7080_v56  ;;  %2371 = vmax.xlane.f32.xlu0 %v7080_v56 }
 0x471   : > { %2476 = vperm.xlu0 %5212, %v8600_v55  }
 0x475   : > { %2491 = vperm.xlu0 %5212, %v8599_v20   ;;  %v7103_v20 = vld [vmem:[#allocation2 + $0x10] sm:$0xff] }
 0x476   : > { %8824 = vst [vmem:[#allocation47_spill] sm:$0xff] %v7103_v20 }
 0x479   : > { %2501 = vperm.xlu0 %5212, %v8601_v12  }
 0x47d   : > { %2511 = vperm.xlu0 %5212, %v8602_v23  }
 0x47f   : > { %v2342_v45 = vpop.xlane.xlu0 %2341 }
 0x480   : > { %v7098_v15 = vmax.f32 %v7095_v51, %v2342_v45  ;;  %v7113_v45 = vld [vmem:[#allocation2 + $0x18] sm:$0xff] }
 0x481   : > { %8826 = vst [vmem:[#allocation6_spill] sm:$0xff] %v7113_v45 }
 0x482   : > { %v8605_v10 = vmax.f32 %v7098_v15, -1e+28  ;;  %3032 = vst.msk [vmem:[#allocation2] sm:$0xff] %vm2677_vm5, %v7098_v15 }
 0x483   : > { %v2346_v55 = vpop.xlane.xlu0 %2345 }
 0x484   : > { %v7106_v12 = vmax.f32 %v7103_v20, %v2346_v55  ;;  %2471 = vperm.xlu1 %5211, %v8605_v10   ;;  %v7123_v10 = vld [vmem:[#allocation2 + $0x28] sm:$0xff] }
 0x485   : > { %8828 = vst [vmem:[#allocation10_spill] sm:$0xff] %v7123_v10 }
 0x486   : > { %8825 = vst [vmem:[#allocation25_spill] sm:$0xff] %v7106_v12  ;;  %v8608_v23 = vmax.f32 %v7106_v12, -1e+28  ;;  %3034 = vst.msk [vmem:[#allocation2 + $0x10] sm:$0xff] %vm2677_vm5, %v7106_v12 }
 0x487   : > { %v2348_v4 = vpop.xlane.xlu0 %2347 }
 0x488   : > { %v7116_v21 = vmax.f32 %v7113_v45, %v2348_v4  ;;  %2481 = vperm.xlu1 %5211, %v8608_v23   ;;  %v7133_v23 = vld [vmem:[#allocation2 + $0x38] sm:$0xff] }
 0x489   : > { %8830 = vst [vmem:[#allocation8_spill] sm:$0xff] %v7133_v23 }
 0x48a   : > { %8827 = vst [vmem:[#allocation9_spill] sm:$0xff] %v7116_v21  ;;  %v8611_v55 = vmax.f32 %v7116_v21, -1e+28  ;;  %3035 = vst.msk [vmem:[#allocation2 + $0x18] sm:$0xff] %vm2677_vm5, %v7116_v21 }
 0x48b   : > { %v2352_v25 = vpop.xlane.xlu0 %2351 }
 0x48c   : > { %v7126_v20 = vmax.f32 %v7123_v10, %v2352_v25  ;;  %2486 = vperm.xlu1 %5211, %v8611_v55   ;;  %v7143_v55 = vld [vmem:[#allocation2 + $0x48] sm:$0xff] }
 0x48d   : > { %8832 = vst [vmem:[#allocation13_spill] sm:$0xff] %v7143_v55 }
 0x48e   : > { %8829 = vst [vmem:[#allocation7_spill] sm:$0xff] %v7126_v20  ;;  %v8614_v4 = vmax.f32 %v7126_v20, -1e+28  ;;  %3037 = vst.msk [vmem:[#allocation2 + $0x28] sm:$0xff] %vm2677_vm5, %v7126_v20 }
 0x48f   : > { %v2356_v45 = vpop.xlane.xlu0 %2355 }
 0x490   : > { %v7136_v12 = vmax.f32 %v7133_v23, %v2356_v45  ;;  %2496 = vperm.xlu1 %5211, %v8614_v4   ;;  %v7153_v4 = vld [vmem:[#allocation2 + $0x58] sm:$0xff] }
 0x491   : > { %8834 = vst [vmem:[#allocation17_spill] sm:$0xff] %v7153_v4 }
 0x492   : > { %8831 = vst [vmem:[#allocation11_spill] sm:$0xff] %v7136_v12  ;;  %v8617_v25 = vmax.f32 %v7136_v12, -1e+28  ;;  %3039 = vst.msk [vmem:[#allocation2 + $0x38] sm:$0xff] %vm2677_vm5, %v7136_v12 }
 0x493   : > { %v2360_v10 = vpop.xlane.xlu0 %2359 }
 0x494   : > { %v7146_v21 = vmax.f32 %v7143_v55, %v2360_v10  ;;  %2506 = vperm.xlu1 %5211, %v8617_v25   ;;  %v7162_v10 = vld [vmem:[#allocation2 + $0x68] sm:$0xff] }
 0x495   : > { %8835 = vst [vmem:[#allocation19_spill] sm:$0xff] %v7162_v10 }
 0x496   : > { %8833 = vst [vmem:[#allocation15_spill] sm:$0xff] %v7146_v21  ;;  %v8622_v45 = vmax.f32 %v7146_v21, -1e+28  ;;  %3041 = vst.msk [vmem:[#allocation2 + $0x48] sm:$0xff] %vm2677_vm5, %v7146_v21 }
 0x497   : > { %v2364_v23 = vpop.xlane.xlu0 %2363 }
 0x498   : > { %v7156_v20 = vmax.f32 %v7153_v4, %v2364_v23  ;;  %2516 = vperm.xlu1 %5211, %v8622_v45  }
 0x49a   : > { %3043 = vst.msk [vmem:[#allocation2 + $0x58] sm:$0xff] %vm2677_vm5, %v7156_v20 }
 0x49b   : > { %v2368_v25 = vpop.xlane.xlu0 %2367 }
 0x49c   : > { %v7165_v12 = vmax.f32 %v7162_v10, %v2368_v25 }
 0x49e   : > { %3045 = vst.msk [vmem:[#allocation2 + $0x68] sm:$0xff] %vm2677_vm5, %v7165_v12 }
 0x4cd   : > { %v5052_v55 = vpop.f32.mrb[0].mxu1 }
 0x4ce   : > { %v2017_v9 = vpop.f32.mrb[1].mxu1  ;;  %2100 = vrot.lane.b32.xlu1 %v5052_v55, %s5687_s27 }
 0x4cf   : > { %v5053_v23 = vpop.f32.mrb[2].mxu1 }
 0x4d0   : > { %v2020_v4 = vpop.f32.mrb[3].mxu1  ;;  %2102 = vrot.lane.b32.xlu0 %v5053_v23, %s5687_s27 }
 0x4d2   : > { %2096 = vrot.lane.b32.xlu1 %v2017_v9, %s5687_s27 }
 0x4d4   : > { %2098 = vrot.lane.b32.xlu0 %v2020_v4, %s5687_s27 }
 0x4d5   : > { %v5056_v45 = vpop.f32.mrb[4].mxu1 }
 0x4d6   : > { %v2033_v21 = vpop.f32.mrb[5].mxu1  ;;  %2108 = vrot.lane.b32.xlu1 %v5056_v45, %s5687_s27 }
 0x4d7   : > { %v5057_v25 = vpop.f32.mrb[6].mxu1 }
 0x4d8   : > { %v2036_v10 = vpop.f32.mrb[7].mxu1  ;;  %2110 = vrot.lane.b32.xlu0 %v5057_v25, %s5687_s27 }
 0x4da   : > { %2104 = vrot.lane.b32.xlu1 %v2033_v21, %s5687_s27 }
 0x4dc   : > { %2106 = vrot.lane.b32.xlu0 %v2036_v10, %s5687_s27  ;;  %v7183_v10 = vld [vmem:[#allocation2 + $0x78] sm:$0xff] }
 0x4dd   : > { %v5060_v55 = vpop.f32.mrb[8].mxu1 }
 0x4de   : > { %v2049_v2 = vpop.f32.mrb[9].mxu1  ;;  %2116 = vrot.lane.b32.xlu1 %v5060_v55, %s5687_s27 }
 0x4df   : > { %v5061_v23 = vpop.f32.mrb[10].mxu1 }
 0x4e0   : > { %v2052_v9 = vpop.f32.mrb[11].mxu1  ;;  %2118 = vrot.lane.b32.xlu0 %v5061_v23, %s5687_s27  ;;  %v8627_v23 = vmax.f32 %v7060_v61, -1e+28 }
 0x4e2   : > { %2112 = vrot.lane.b32.xlu1 %v2049_v2, %s5687_s27  ;;  %v8634_v2 = vmax.f32 %v7156_v20, -1e+28 }
 0x4e4   : > { %2114 = vrot.lane.b32.xlu0 %v2052_v9, %s5687_s27  ;;  %v8629_v9 = vmax.f32 %v7165_v12, -1e+28 }
 0x4e5   : > { %v5064_v4 = vpop.f32.mrb[12].mxu1 }
 0x4e6   : > { %v2065_v45 = vpop.f32.mrb[13].mxu1  ;;  %2124 = vrot.lane.b32.xlu1 %v5064_v4, %s5687_s27 }
 0x4e7   : > { %v5065_v25 = vpop.f32.mrb[14].mxu1 }
 0x4e8   : > { %v2068_v21 = vpop.f32.mrb[15].mxu1  ;;  %2126 = vrot.lane.b32.xlu0 %v5065_v25, %s5687_s27  ;;  %v2372_v56 = vpop.xlane.xlu0 %2371  ;;  %v8632_v25 = vmov 3  }
 0x4e9   : > { %v7186_v55 = vmax.f32 %v7183_v10, %v2372_v56  ;;  %v8628_v56 = vmax.f32 %v7067_v43, -1e+28 }
 0x4ea   : > { %2120 = vrot.lane.b32.xlu1 %v2065_v45, %s5687_s27  ;;  %v8631_v45 = vmax.f32 %v7074_v50, -1e+28 }
 0x4eb   : > { %3047 = vst.msk [vmem:[#allocation2 + $0x78] sm:$0xff] %vm2677_vm5, %v7186_v55  ;;  %v8630_v4 = vmax.f32 %v7186_v55, -1e+28 }
 0x4ec   : > { %2122 = vrot.lane.b32.xlu0 %v2068_v21, %s5687_s27 }
 0x4ee   : > { %2526 = vperm.xlu1 %5211, %v8634_v2  }
 0x4f0   : > { %2521 = vperm.xlu0 %5212, %v8627_v23   ;;  %v2477_v21 = vpop.permute.xlu0 %2476 }
 0x4f1   : > { %v2550_v23 = vsub.f32 %v6908_v36, %v2477_v21  ;;  %v5508_v36 = vld [vmem:[%s5807_s17 + $0x30] sm:$0xff] }
 0x4f2   : > { %2536 = vperm.xlu1 %5211, %v8629_v9  }
 0x4f4   : > { %2531 = vperm.xlu0 %5212, %v8628_v56   ;;  %v2567_v56 = vmul.f32 1.442695, %v2550_v23  ;;  %v5511_v23 = vld [vmem:[%s5807_s17 + $0x40] sm:$0xff] }
 0x4f6   : > { %2546 = vperm.xlu1 %5211, %v8630_v4   ;;  %5355 = vpow2.f32 %v2567_v56 }
 0x4f8   : > { %2541 = vperm.xlu0 %5212, %v8631_v45  }
 0x4fa   : > { %5213 = vset.pattern.permute.xlu1 %v8632_v25 }
 0x4fb   : > { %3049 = vperm.xlu1 %5213, %v6854_v28  }
 0x4fc   : > { %5214 = vset.pattern.permute.xlu0 %v8632_v25  ;;  %v1840_v25 = vld [vmem:[#allocation4 + $0x8] sm:$0xff] }
 0x4fd   : > { %v1936_v50 = vmul.f32 %v6932_v29, %v1840_v25  ;;  %v1844_v25 = vld [vmem:[#allocation4 + $0x28] sm:$0xff] }
 0x4ff   : > { %3053 = vperm.xlu1 %5213, %v6730_v58  }
 0x500   : > { %v7220_v28 = vpop.eup %5355 }
 0x503   : > { %v2472_v9 = vpop.permute.xlu1 %2471  ;;  %3057 = vperm.xlu1 %5213, %v6860_v11  }
 0x504   : > { %v2549_v4 = vsub.f32 %v6970_v24, %v2472_v9  ;;  %v5512_v9 = vld [vmem:[%s5807_s17 + $0x70] sm:$0xff] }
 0x506   : > { %v2565_v45 = vmul.f32 1.442695, %v2549_v4 }
 0x507   : > { %3061 = vperm.xlu1 %5213, %v6866_v39   ;;  %v5509_v39 = vld [vmem:[%s5807_s17 + $0x50] sm:$0xff] }
 0x508   : > { %5357 = vpow2.f32 %v2565_v45  ;;  %v1841_v45 = vld [vmem:[#allocation4 + $0x10] sm:$0xff] }
 0x50b   : > { %3065 = vperm.xlu1 %5213, %v6734_v7   ;;  %v7228_v7 = vpop.permute.xlu1 %2481 }
 0x50f   : > { %3069 = vperm.xlu1 %5213, %v6872_v44   ;;  %v5510_v44 = vld [vmem:[%s5807_s17 + $0x60] sm:$0xff]  ;;  %v7231_v24 = vpop.permute.xlu1 %2486 }
 0x512   : > { %v5358_v58 = vpop.eup %5357 }
 0x513   : > { %3073 = vperm.xlu1 %5213, %v5508_v36   ;;  %v2806_v11 = vpack.c.bf16 %v7220_v28, %v5358_v58  ;;  %v7236_v56 = vpop.permute.xlu1 %2496 }
 0x515   : > { %5082 = vmatprep.mubr.bf16.mxu0 %v2806_v11 }
 0x517   : > { %2629 = vadd.xlane.f32.xlu0 %v5358_v58  ;;  %3077 = vperm.xlu1 %5213, %v6876_v47   ;;  %v7238_v47 = vpop.permute.xlu0 %2491  ;;  %v1842_v58 = vld [vmem:[#allocation4 + $0x18] sm:$0xff] }
 0x518   : > { %v1938_v11 = vmul.f32 %v6833_v37, %v1842_v58 }
 0x51b   : > { %3085 = vperm.xlu1 %5213, %v6882_v62   ;;  %v7241_v62 = vpop.permute.xlu1 %2506 }
 0x51f   : > { %3089 = vperm.xlu1 %5213, %v5509_v39   ;;  %v7245_v4 = vpop.permute.xlu1 %2516 }
 0x523   : > { %3093 = vperm.xlu1 %5213, %v6888_v16   ;;  %v7243_v16 = vpop.permute.xlu0 %2501 }
 0x527   : > { %3097 = vperm.xlu1 %5213, %v5510_v44   ;;  %v7247_v21 = vpop.permute.xlu0 %2511  ;;  %v1839_v44 = vld [vmem:[#allocation4] sm:$0xff] }
 0x52b   : > { %3101 = vperm.xlu1 %5213, %v6892_v1   ;;  %v1937_v1 = vmul.f32 %v6938_v13, %v1841_v45  ;;  %v1845_v45 = vld [vmem:[#allocation4 + $0x30] sm:$0xff] }
 0x52c   : > { %v1941_v61 = vmul.f32 %v6947_v33, %v1845_v45  ;;  %v1940_v33 = vmul.f32 %v6836_v34, %v1844_v25  ;;  %v1847_v45 = vld [vmem:[#allocation4 + $0x40] sm:$0xff] }
 0x52d   : > { %3081 = vperm.xlu0 %5214, %v5511_v23   ;;  %v1943_v34 = vmul.f32 %v6949_v0, %v1847_v45 }
 0x52f   : > { %3105 = vperm.xlu1 %5213, %v5512_v9  }
 0x533   : > { %3109 = vperm.xlu1 %5213, %v6956_v14   ;;  %v1935_v14 = vmul.f32 %v6830_v3, %v1839_v44 }
 0x540   : > { %v2101_v36 = vpop.permute.xlu1 %2100 }
 0x541   : > { %v2146_v39 = vadd.f32 %v2101_v36, %v1937_v1  ;;  %v1846_v1 = vld [vmem:[#allocation4 + $0x38] sm:$0xff] }
 0x542   : > { %v2103_v23 = vpop.permute.xlu0 %2102  ;;  %v1942_v3 = vmul.f32 %v6838_v5, %v1846_v1 }
 0x543   : > { %2163 = vst.msk [vmem:[#allocation4 + $0x10] sm:$0xff] %vm2160_vm6, %v2146_v39  ;;  %v2147_v9 = vadd.f32 %v2103_v23, %v1938_v11  ;;  %v1843_v11 = vld [vmem:[#allocation4 + $0x20] sm:$0xff] }
 0x544   : > { %v2097_v2 = vpop.permute.xlu1 %2096  ;;  %v1939_v29 = vmul.f32 %v6944_v54, %v1843_v11  ;;  %v1853_v11 = vld [vmem:[#allocation4 + $0x70] sm:$0xff] }
 0x545   : > { %2164 = vst.msk [vmem:[#allocation4 + $0x18] sm:$0xff] %vm2160_vm6, %v2147_v9  ;;  %v2144_v13 = vadd.f32 %v2097_v2, %v1935_v14  ;;  %v1850_v14 = vld [vmem:[#allocation4 + $0x58] sm:$0xff] }
 0x546   : > { %v2099_v43 = vpop.permute.xlu0 %2098  ;;  %v1946_v54 = vmul.f32 %v6849_v57, %v1850_v14  ;;  %v1949_v57 = vmul.f32 %v6959_v30, %v1853_v11 }
 0x547   : > { %2161 = vst.msk [vmem:[#allocation4] sm:$0xff] %vm2160_vm6, %v2144_v13  ;;  %v2145_v37 = vadd.f32 %v2099_v43, %v1936_v50  ;;  %v1849_v50 = vld [vmem:[#allocation4 + $0x50] sm:$0xff] }
 0x548   : > { %v2109_v58 = vpop.permute.xlu1 %2108  ;;  %v1945_v5 = vmul.f32 %v6951_v59, %v1849_v50 }
 0x549   : > { %2162 = vst.msk [vmem:[#allocation4 + $0x8] sm:$0xff] %vm2160_vm6, %v2145_v37  ;;  %v2150_v36 = vadd.f32 %v2109_v58, %v1941_v61  ;;  %v1848_v58 = vld [vmem:[#allocation4 + $0x48] sm:$0xff] }
 0x54a   : > { %v2111_v39 = vpop.permute.xlu0 %2110  ;;  %v1944_v59 = vmul.f32 %v6845_v32, %v1848_v58 }
 0x54b   : > { %2167 = vst.msk [vmem:[#allocation4 + $0x30] sm:$0xff] %vm2160_vm6, %v2150_v36  ;;  %v2151_v2 = vadd.f32 %v2111_v39, %v1942_v3 }
 0x54c   : > { %v2105_v44 = vpop.permute.xlu1 %2104 }
 0x54d   : > { %2168 = vst.msk [vmem:[#allocation4 + $0x38] sm:$0xff] %vm2160_vm6, %v2151_v2  ;;  %v2148_v43 = vadd.f32 %v2105_v44, %v1939_v29  ;;  %v1854_v2 = vld [vmem:[#allocation4 + $0x78] sm:$0xff] }
 0x54e   : > { %v2107_v23 = vpop.permute.xlu0 %2106  ;;  %v1950_v0 = vmul.f32 %v6863_v53, %v1854_v2 }
 0x54f   : > { %2165 = vst.msk [vmem:[#allocation4 + $0x20] sm:$0xff] %vm2160_vm6, %v2148_v43  ;;  %v2149_v61 = vadd.f32 %v2107_v23, %v1940_v33  ;;  %v1851_v33 = vld [vmem:[#allocation4 + $0x60] sm:$0xff]  ;;  %v1852_v23 = vld [vmem:[#allocation4 + $0x68] sm:$0xff] }
 0x550   : > { %v2117_v9 = vpop.permute.xlu1 %2116  ;;  %v1947_v32 = vmul.f32 %v6953_v19, %v1851_v33  ;;  %v1948_v30 = vmul.f32 %v6857_v60, %v1852_v23  ;;  %v3114_v19 = vsub.s32 3, %v8778_v52  ;;  %v8836_v23 = vmax.f32 %v7098_v15, -1e+28 }
 0x551   : > { %2166 = vst.msk [vmem:[#allocation4 + $0x28] sm:$0xff] %vm2160_vm6, %v2149_v61  ;;  %v2154_v13 = vadd.f32 %v2117_v9, %v1945_v5 }
 0x552   : > { %v2119_v37 = vpop.permute.xlu0 %2118  ;;  %v7289_v45 = vrot.slane %v6899_v48, %v3114_v19 }
 0x553   : > { %2171 = vst.msk [vmem:[#allocation4 + $0x50] sm:$0xff] %vm2160_vm6, %v2154_v13  ;;  %v2155_v1 = vadd.f32 %v2119_v37, %v1946_v54 }
 0x554   : > { %v2113_v3 = vpop.permute.xlu1 %2112 }
 0x555   : > { %2172 = vst.msk [vmem:[#allocation4 + $0x58] sm:$0xff] %vm2160_vm6, %v2155_v1  ;;  %v2152_v36 = vadd.f32 %v2113_v3, %v1943_v34 }
 0x556   : > { %v2115_v39 = vpop.permute.xlu0 %2114 }
 0x557   : > { %2169 = vst.msk [vmem:[#allocation4 + $0x40] sm:$0xff] %vm2160_vm6, %v2152_v36  ;;  %v2153_v29 = vadd.f32 %v2115_v39, %v1944_v59 }
 0x558   : > { %v2125_v25 = vpop.permute.xlu1 %2124 }
 0x559   : > { %2170 = vst.msk [vmem:[#allocation4 + $0x48] sm:$0xff] %vm2160_vm6, %v2153_v29  ;;  %v2158_v44 = vadd.f32 %v2125_v25, %v1949_v57 }
 0x55a   : > { %v2127_v43 = vpop.permute.xlu0 %2126 }
 0x55b   : > { %2175 = vst.msk [vmem:[#allocation4 + $0x70] sm:$0xff] %vm2160_vm6, %v2158_v44  ;;  %v2159_v50 = vadd.f32 %v2127_v43, %v1950_v0 }
 0x55c   : > { %v2121_v5 = vpop.permute.xlu1 %2120 }
 0x55d   : > { %2176 = vst.msk [vmem:[#allocation4 + $0x78] sm:$0xff] %vm2160_vm6, %v2159_v50  ;;  %v2156_v61 = vadd.f32 %v2121_v5, %v1947_v32  ;;  %v2389_v32 = vmax.f32 %v7095_v51, -1e+28 }
 0x55e   : > { %v2123_v14 = vpop.permute.xlu0 %2122 }
 0x55f   : > { %2173 = vst.msk [vmem:[#allocation4 + $0x60] sm:$0xff] %vm2160_vm6, %v2156_v61  ;;  %v2157_v53 = vadd.f32 %v2123_v14, %v1948_v30  ;;  %v2421_v5 = vsub.f32 %v2389_v32, %v8836_v23 }
 0x561   : > { %2174 = vst.msk [vmem:[#allocation4 + $0x68] sm:$0xff] %vm2160_vm6, %v2157_v53  ;;  %v2437_v19 = vmul.f32 1.442695, %v2421_v5 }
 0x563   : > { %5359 = vpow2.f32 %v2437_v19 }
 0x56d   : > { %v7281_v9 = vpop.permute.xlu1 %2526 }
 0x571   : > { %v7283_v54 = vpop.permute.xlu1 %2536 }
 0x575   : > { %v7286_v13 = vpop.permute.xlu1 %2546 }
 0x57a   : > { %v3050_v60 = vpop.permute.xlu1 %3049 }
 0x57b   : > { %v3116_v37 = vadd.f32 %v7289_v45, %v3050_v60 }
 0x57d   : > { %v3132_v34 = vmul.f32 0.2, %v3116_v37 }
 0x57e   : > { %v3054_v1 = vpop.permute.xlu1 %3053 }
 0x57f   : > { %v3148_v58 = vmax.f32 %v3116_v37, %v3132_v34  ;;  %v3117_v3 = vadd.f32 %v7289_v45, %v3054_v1 }
 0x581   : > { %v3133_v59 = vmul.f32 0.2, %v3117_v3  ;;  %v7294_v36 = vadd.f32 %v3148_v58, %v8792_v31 }
 0x582   : > { %v3058_v11 = vpop.permute.xlu1 %3057 }
 0x583   : > { %v3149_v39 = vmax.f32 %v3117_v3, %v3133_v59  ;;  %v3118_v52 = vadd.f32 %v7289_v45, %v3058_v11  ;;  %3196 = vmax.xlane.f32.xlu1 %v7294_v36  ;;  %v8837_v59 = vld [vmem:[#allocation12_spill] sm:$0xff] }
 0x585   : > { %v3134_v48 = vmul.f32 0.2, %v3118_v52  ;;  %v7299_v57 = vadd.f32 %v3149_v39, %v8779_v40 }
 0x586   : > { %v3062_v29 = vpop.permute.xlu1 %3061 }
 0x587   : > { %v3150_v2 = vmax.f32 %v3118_v52, %v3134_v48  ;;  %v3119_v25 = vadd.f32 %v7289_v45, %v3062_v29  ;;  %3198 = vmax.xlane.f32.xlu0 %v7299_v57 }
 0x589   : > { %v3135_v0 = vmul.f32 0.2, %v3119_v25  ;;  %v7304_v31 = vadd.f32 %v3150_v2, %v8793_v6 }
 0x58a   : > { %v3066_v44 = vpop.permute.xlu1 %3065 }
 0x58b   : > { %v3151_v33 = vmax.f32 %v3119_v25, %v3135_v0  ;;  %v3120_v43 = vadd.f32 %v7289_v45, %v3066_v44  ;;  %3200 = vmax.xlane.f32.xlu1 %v7304_v31  ;;  %v7339_v44 = vpop.eup %5359 }
 0x58d   : > { %v3136_v40 = vmul.f32 0.2, %v3120_v43  ;;  %v7310_v50 = vadd.f32 %v3151_v33, %v8795_v63  ;;  %v7321_v63 = vpop.permute.xlu0 %2521 }
 0x58e   : > { %v3070_v30 = vpop.permute.xlu1 %3069 }
 0x58f   : > { %v3152_v61 = vmax.f32 %v3120_v43, %v3136_v40  ;;  %v3121_v6 = vadd.f32 %v7289_v45, %v3070_v30  ;;  %3202 = vmax.xlane.f32.xlu1 %v7310_v50  ;;  %v2597_v40 = vld [vmem:[#allocation3] sm:$0xff] }
 0x591   : > { %v3137_v14 = vmul.f32 0.2, %v3121_v6  ;;  %v7317_v53 = vadd.f32 %v3152_v61, %v8780_v38  ;;  %v7331_v39 = vpop.permute.xlu0 %2531 }
 0x592   : > { %v3074_v60 = vpop.permute.xlu1 %3073 }
 0x593   : > { %v3153_v51 = vmax.f32 %v3121_v6, %v3137_v14  ;;  %v3122_v37 = vadd.f32 %v7289_v45, %v3074_v60  ;;  %3204 = vmax.xlane.f32.xlu1 %v7317_v53 }
 0x595   : > { %v3138_v15 = vmul.f32 0.2, %v3122_v37  ;;  %v7324_v34 = vadd.f32 %v3153_v51, %v8799_v49  ;;  %v7341_v33 = vpop.permute.xlu0 %2541 }
 0x596   : > { %v3078_v1 = vpop.permute.xlu1 %3077 }
 0x597   : > { %v3154_v58 = vmax.f32 %v3122_v37, %v3138_v15  ;;  %v3123_v3 = vadd.f32 %v7289_v45, %v3078_v1  ;;  %3206 = vmax.xlane.f32.xlu0 %v7324_v34 }
 0x599   : > { %v3139_v38 = vmul.f32 0.2, %v3123_v3  ;;  %v7329_v11 = vadd.f32 %v3154_v58, %v8837_v59 }
 0x59a   : > { %v3086_v52 = vpop.permute.xlu1 %3085 }
 0x59b   : > { %v3155_v48 = vmax.f32 %v3123_v3, %v3139_v38  ;;  %v3125_v29 = vadd.f32 %v7289_v45, %v3086_v52  ;;  %3208 = vmax.xlane.f32.xlu1 %v7329_v11 }
 0x59d   : > { %v3141_v49 = vmul.f32 0.2, %v3125_v29  ;;  %v7336_v2 = vadd.f32 %v3155_v48, %v8800_v27  ;;  %v2613_v27 = vmul.f32 %v7339_v44, %v2597_v40  ;;  %v8838_v40 = vld [vmem:[#allocation14_spill] sm:$0xff] }
 0x59e   : > { %v3090_v25 = vpop.permute.xlu1 %3089 }
 0x59f   : > { %v3157_v0 = vmax.f32 %v3125_v29, %v3141_v49  ;;  %3210 = vmax.xlane.f32.xlu0 %v7336_v2 }
 0x5a1   : > { %v7344_v43 = vadd.f32 %v3157_v0, %v8803_v18  ;;  %v3126_v18 = vadd.f32 %v7289_v45, %v3090_v25 }
 0x5a2   : > { %v3094_v32 = vpop.permute.xlu1 %3093 }
 0x5a3   : > { %v3127_v23 = vadd.f32 %v7289_v45, %v3094_v32  ;;  %3214 = vmax.xlane.f32.xlu0 %v7344_v43  ;;  %v3142_v58 = vmul.f32 0.2, %v3126_v18 }
 0x5a4   : > { %v2630_v5 = vpop.xlane.xlu0 %2629 }
 0x5a5   : > { %v3143_v30 = vmul.f32 0.2, %v3127_v23  ;;  %v2661_v61 = vadd.f32 %v2630_v5, %v2613_v27  ;;  %v3158_v29 = vmax.f32 %v3126_v18, %v3142_v58  ;;  %v8840_v18 = vld [vmem:[#allocation18_spill] sm:$0xff]  ;;  %v5516_v58 = vld [vmem:[%s5797_s9 + $0x18] sm:$0xff]  }
 0x5a6   : > { %v3098_v6 = vpop.permute.xlu1 %3097 }
 0x5a7   : > { %v3159_v14 = vmax.f32 %v3127_v23, %v3143_v30  ;;  %2678 = vst.msk [vmem:[#allocation3] sm:$0xff] %vm2677_vm5, %v2661_v61  ;;  %v3128_v38 = vadd.f32 %v7289_v45, %v3098_v6  ;;  %v8839_v61 = vld [vmem:[#allocation16_spill] sm:$0xff] }
 0x5a8   : > { %v7369_v6 = vadd.f32 %v3158_v29, %v8839_v61  ;;  %v7404_v29 = vld [vmem:[#allocation2 + $0x8] sm:$0xff] }
 0x5a9   : > { %v7351_v19 = vadd.f32 %v3159_v14, %v8804_v42  ;;  %v3144_v25 = vmul.f32 0.2, %v3128_v38 }
 0x5aa   : > { %v3102_v60 = vpop.permute.xlu1 %3101 }
 0x5ab   : > { %v3129_v51 = vadd.f32 %v7289_v45, %v3102_v60  ;;  %3218 = vmax.xlane.f32.xlu0 %v7351_v19  ;;  %v3160_v5 = vmax.f32 %v3128_v38, %v3144_v25  ;;  %v7396_v38 = vld [vmem:[#allocation2] sm:$0xff] }
 0x5ac   : > { %v3082_v37 = vpop.permute.xlu0 %3081 }
 0x5ad   : > { %v3145_v15 = vmul.f32 0.2, %v3129_v51  ;;  %v3124_v1 = vadd.f32 %v7289_v45, %v3082_v37  ;;  %v7377_v60 = vadd.f32 %v3160_v5, %v8840_v18  ;;  %v5518_v5 = vld [vmem:[%s5797_s9 + $0x28] sm:$0xff]  }
 0x5ae   : > { %v3106_v3 = vpop.permute.xlu1 %3105 }
 0x5af   : > { %v3161_v59 = vmax.f32 %v3129_v51, %v3145_v15  ;;  %v3140_v52 = vmul.f32 0.2, %v3124_v1  ;;  %v3130_v0 = vadd.f32 %v7289_v45, %v3106_v3  ;;  %v8841_v51 = vld [vmem:[#allocation20_spill] sm:$0xff]  ;;  %v5513_v15 = vld [vmem:[%s5797_s9 + $0x8] sm:$0xff]   ;;  %v5517_v3 = vld [vmem:[%s5797_s9 + $0x20] sm:$0xff]  }
 0x5b1   : > { %v3156_v48 = vmax.f32 %v3124_v1, %v3140_v52  ;;  %v7359_v42 = vadd.f32 %v3161_v59, %v8807_v17  ;;  %v3146_v17 = vmul.f32 0.2, %v3130_v0  ;;  %v5515_v1 = vld [vmem:[%s5797_s9 + $0x10] sm:$0xff]  }
 0x5b2   : > { %v3110_v49 = vpop.permute.xlu1 %3109 }
 0x5b3   : > { %v3131_v32 = vadd.f32 %v7289_v45, %v3110_v49  ;;  %3222 = vmax.xlane.f32.xlu0 %v7359_v42  ;;  %v7365_v23 = vadd.f32 %v3156_v48, %v8838_v40  ;;  %v3162_v14 = vmax.f32 %v3130_v0, %v3146_v17 }
 0x5b5   : > { %v3147_v27 = vmul.f32 0.2, %v3131_v32  ;;  %3212 = vmax.xlane.f32.xlu1 %v7365_v23  ;;  %v7381_v37 = vadd.f32 %v3162_v14, %v8841_v51  ;;  %v7436_v51 = vld [vmem:[#allocation2 + $0x20] sm:$0xff] }
 0x5b6   : > { %8842 = vst [vmem:[#allocation21_spill] sm:$0xff] %v7436_v51 }
 0x5b7   : > { %v3163_v30 = vmax.f32 %v3131_v32, %v3147_v27  ;;  %v7414_v32 = vld [vmem:[#allocation2 + $0x10] sm:$0xff] }
 0x5b9   : > { %3216 = vmax.xlane.f32.xlu1 %v7369_v6  ;;  %v7373_v45 = vadd.f32 %v3163_v30, %v8822_v26  ;;  %v5514_v26 = vld [vmem:[%s5797_s9] sm:$0xff]   ;;  %v7426_v30 = vld [vmem:[#allocation2 + $0x18] sm:$0xff] }
 0x5bb   : > { %3226 = vmax.xlane.f32.xlu0 %v7373_v45 }
 0x5bd   : > { %3220 = vmax.xlane.f32.xlu1 %v7377_v60 }
 0x5c1   : > { %3224 = vmax.xlane.f32.xlu1 %v7381_v37 }
 0x5d1   : > { %2816 = vrot.lane.b32.xlu0 %v5513_v15, %s5689_s30 }
 0x5d2   : > { %2814 = vrot.lane.b32.xlu1 %v5514_v26, %s5689_s30 }
 0x5d5   : > { %3669 = vrot.lane.b32.xlu0 %v5514_v26, %s5690_s7 }
 0x5d6   : > { %2818 = vrot.lane.b32.xlu1 %v5515_v1, %s5689_s30 }
 0x5d9   : > { %3671 = vrot.lane.b32.xlu0 %v5513_v15, %s5690_s7 }
 0x5da   : > { %2820 = vrot.lane.b32.xlu1 %v5516_v58, %s5689_s30 }
 0x5de   : > { %2822 = vrot.lane.b32.xlu1 %v5517_v3, %s5689_s30 }
 0x610   : > { %v3197_v59 = vpop.xlane.xlu1 %3196 }
 0x611   : > { %v7399_v52 = vmax.f32 %v7396_v38, %v3197_v59  ;;  %v7446_v59 = vld [vmem:[#allocation2 + $0x28] sm:$0xff] }
 0x612   : > { %8844 = vst [vmem:[#allocation12_spill] sm:$0xff] %v7446_v59 }
 0x613   : > { %v8641_v48 = vmax.f32 %v7399_v52, -1e+28  ;;  %3887 = vst.msk [vmem:[#allocation2] sm:$0xff] %vm3532_vm7, %v7399_v52 }
 0x614   : > { %v3199_v49 = vpop.xlane.xlu0 %3198 }
 0x615   : > { %v7407_v25 = vmax.f32 %v7404_v29, %v3199_v49  ;;  %3326 = vperm.xlu1 %5213, %v8641_v48  }
 0x617   : > { %v8638_v0 = vmax.f32 %v7407_v25, -1e+28  ;;  %3888 = vst.msk [vmem:[#allocation2 + $0x8] sm:$0xff] %vm3532_vm7, %v7407_v25 }
 0x618   : > { %v3201_v40 = vpop.xlane.xlu1 %3200 }
 0x619   : > { %v7417_v27 = vmax.f32 %v7414_v32, %v3201_v40  ;;  %3331 = vperm.xlu0 %5214, %v8638_v0   ;;  %2824 = vrot.lane.b32.xlu1 %v5518_v5, %s5689_s30  ;;  %v7461_v0 = vld [vmem:[#allocation2 + $0x30] sm:$0xff] }
 0x61a   : > { %8846 = vst [vmem:[#allocation16_spill] sm:$0xff] %v7461_v0 }
 0x61b   : > { %v8640_v17 = vmax.f32 %v7417_v27, -1e+28  ;;  %3889 = vst.msk [vmem:[#allocation2 + $0x10] sm:$0xff] %vm3532_vm7, %v7417_v27 }
 0x61c   : > { %v3203_v61 = vpop.xlane.xlu1 %3202 }
 0x61d   : > { %v7429_v14 = vmax.f32 %v7426_v30, %v3203_v61  ;;  %3336 = vperm.xlu0 %5214, %v8640_v17   ;;  %v7452_v61 = vld [vmem:[%s5797_s9 + $0x30] sm:$0xff]   ;;  %v7473_v17 = vld [vmem:[#allocation2 + $0x38] sm:$0xff] }
 0x61e   : > { %8848 = vst [vmem:[#allocation20_spill] sm:$0xff] %v7473_v17 }
 0x61f   : > { %v8639_v18 = vmax.f32 %v7429_v14, -1e+28  ;;  %3890 = vst.msk [vmem:[#allocation2 + $0x18] sm:$0xff] %vm3532_vm7, %v7429_v14 }
 0x620   : > { %v3205_v15 = vpop.xlane.xlu1 %3204 }
 0x621   : > { %v7439_v26 = vmax.f32 %v7436_v51, %v3205_v15  ;;  %3341 = vperm.xlu1 %5213, %v8639_v18   ;;  %3673 = vrot.lane.b32.xlu0 %v5515_v1, %s5690_s7  ;;  %v5520_v51 = vld [vmem:[%s5797_s9 + $0x38] sm:$0xff]   ;;  %s5692_s9 = smov 24  }
 0x623   : > { %8843 = vst [vmem:[#allocation22_spill] sm:$0xff] %v7439_v26  ;;  %3891 = vst.msk [vmem:[#allocation2 + $0x20] sm:$0xff] %vm3532_vm7, %v7439_v26  ;;  %v8645_v15 = vmax.f32 %v7439_v26, -1e+28 }
 0x624   : > { %v3207_v49 = vpop.xlane.xlu0 %3206 }
 0x625   : > { %v7449_v40 = vmax.f32 %v7446_v59, %v3207_v49  ;;  %2826 = vrot.lane.b32.xlu1 %v7452_v61, %s5689_s30  ;;  %3675 = vrot.lane.b32.xlu0 %v5516_v58, %s5690_s7 }
 0x627   : > { %8845 = vst [vmem:[#allocation14_spill] sm:$0xff] %v7449_v40  ;;  %v8644_v1 = vmax.f32 %v7449_v40, -1e+28  ;;  %3892 = vst.msk [vmem:[#allocation2 + $0x28] sm:$0xff] %vm3532_vm7, %v7449_v40 }
 0x628   : > { %v3209_v18 = vpop.xlane.xlu1 %3208 }
 0x629   : > { %v7464_v49 = vmax.f32 %v7461_v0, %v3209_v18  ;;  %3346 = vperm.xlu1 %5213, %v8645_v15   ;;  %3351 = vperm.xlu0 %5214, %v8644_v1   ;;  %v7485_v1 = vld [vmem:[#allocation2 + $0x48] sm:$0xff] }
 0x62a   : > { %8850 = vst [vmem:[#allocation49_spill] sm:$0xff] %v7485_v1 }
 0x62b   : > { %8847 = vst [vmem:[#allocation18_spill] sm:$0xff] %v7464_v49  ;;  %v8647_v58 = vmax.f32 %v7464_v49, -1e+28  ;;  %3893 = vst.msk [vmem:[#allocation2 + $0x30] sm:$0xff] %vm3532_vm7, %v7464_v49 }
 0x62c   : > { %v3211_v48 = vpop.xlane.xlu0 %3210 }
 0x62d   : > { %v7476_v59 = vmax.f32 %v7473_v17, %v3211_v48  ;;  %2828 = vrot.lane.b32.xlu1 %v5520_v51, %s5689_s30  ;;  %3356 = vperm.xlu0 %5214, %v8647_v58   ;;  %v7497_v58 = vld [vmem:[#allocation2 + $0x58] sm:$0xff] }
 0x62e   : > { %8852 = vst [vmem:[#allocation51_spill] sm:$0xff] %v7497_v58 }
 0x62f   : > { %8849 = vst [vmem:[#allocation48_spill] sm:$0xff] %v7476_v59  ;;  %v8650_v18 = vmax.f32 %v7476_v59, -1e+28  ;;  %3894 = vst.msk [vmem:[#allocation2 + $0x38] sm:$0xff] %vm3532_vm7, %v7476_v59 }
 0x630   : > { %v3215_v15 = vpop.xlane.xlu0 %3214 }
 0x631   : > { %v7488_v0 = vmax.f32 %v7485_v1, %v3215_v15  ;;  %3361 = vperm.xlu1 %5213, %v8650_v18   ;;  %3677 = vrot.lane.b32.xlu0 %v5517_v3, %s5690_s7  ;;  %v7509_v3 = vld [vmem:[#allocation2 + $0x68] sm:$0xff] }
 0x632   : > { %8854 = vst [vmem:[#allocation53_spill] sm:$0xff] %v7509_v3 }
 0x633   : > { %8851 = vst [vmem:[#allocation50_spill] sm:$0xff] %v7488_v0  ;;  %3896 = vst.msk [vmem:[#allocation2 + $0x48] sm:$0xff] %vm3532_vm7, %v7488_v0  ;;  %v8652_v48 = vmax.f32 %v7488_v0, -1e+28 }
 0x635   : > { %3679 = vrot.lane.b32.xlu1 %v5518_v5, %s5690_s7 }
 0x638   : > { %v3219_v17 = vpop.xlane.xlu0 %3218 }
 0x639   : > { %v7500_v49 = vmax.f32 %v7497_v58, %v3219_v17  ;;  %3371 = vperm.xlu1 %5213, %v8652_v48   ;;  %v7515_v17 = vld [vmem:[#allocation2 + $0x40] sm:$0xff] }
 0x63a   : > { %8856 = vst [vmem:[#allocation55_spill] sm:$0xff] %v7515_v17 }
 0x63b   : > { %8853 = vst [vmem:[#allocation52_spill] sm:$0xff] %v7500_v49  ;;  %v8654_v15 = vmax.f32 %v7500_v49, -1e+28  ;;  %3898 = vst.msk [vmem:[#allocation2 + $0x58] sm:$0xff] %vm3532_vm7, %v7500_v49  ;;  %v7535_v49 = vld [vmem:[#allocation2 + $0x78] sm:$0xff] }
 0x63c   : > { %8860 = vst [vmem:[#allocation59_spill] sm:$0xff] %v7535_v49 }
 0x63d   : > { %3381 = vperm.xlu1 %5213, %v8654_v15  }
 0x640   : > { %v3223_v5 = vpop.xlane.xlu0 %3222 }
 0x641   : > { %v7512_v18 = vmax.f32 %v7509_v3, %v3223_v5  ;;  %3683 = vrot.lane.b32.xlu1 %v5520_v51, %s5690_s7  ;;  %v7528_v51 = vld [vmem:[#allocation2 + $0x50] sm:$0xff] }
 0x642   : > { %v3213_v58 = vpop.xlane.xlu1 %3212  ;;  %8858 = vst [vmem:[#allocation57_spill] sm:$0xff] %v7528_v51 }
 0x643   : > { %8855 = vst [vmem:[#allocation54_spill] sm:$0xff] %v7512_v18  ;;  %v8659_v48 = vmax.f32 %v7512_v18, -1e+28  ;;  %3900 = vst.msk [vmem:[#allocation2 + $0x68] sm:$0xff] %vm3532_vm7, %v7512_v18  ;;  %v7521_v0 = vmax.f32 %v7515_v17, %v3213_v58 }
 0x645   : > { %8857 = vst [vmem:[#allocation56_spill] sm:$0xff] %v7521_v0  ;;  %v8661_v15 = vmax.f32 %v7521_v0, -1e+28  ;;  %3895 = vst.msk [vmem:[#allocation2 + $0x40] sm:$0xff] %vm3532_vm7, %v7521_v0  ;;  %3391 = vperm.xlu1 %5213, %v8659_v48   ;;  %v7543_v48 = vld [vmem:[#allocation2 + $0x60] sm:$0xff] }
 0x646   : > { %v3217_v5 = vpop.xlane.xlu1 %3216  ;;  %8862 = vst [vmem:[#allocation61_spill] sm:$0xff] %v7543_v48 }
 0x647   : > { %v7531_v3 = vmax.f32 %v7528_v51, %v3217_v5  ;;  %3366 = vperm.xlu0 %5214, %v8661_v15  }
 0x648   : > { %v3227_v58 = vpop.xlane.xlu0 %3226 }
 0x649   : > { %8859 = vst [vmem:[#allocation58_spill] sm:$0xff] %v7531_v3  ;;  %v8666_v1 = vmax.f32 %v7531_v3, -1e+28  ;;  %3897 = vst.msk [vmem:[#allocation2 + $0x50] sm:$0xff] %vm3532_vm7, %v7531_v3  ;;  %v7541_v18 = vmax.f32 %v7535_v49, %v3227_v58  ;;  %v7557_v58 = vld [vmem:[#allocation2 + $0x70] sm:$0xff] }
 0x64a   : > { %v3221_v17 = vpop.xlane.xlu1 %3220  ;;  %8864 = vst [vmem:[#allocation63_spill] sm:$0xff] %v7557_v58 }
 0x64b   : > { %8861 = vst [vmem:[#allocation60_spill] sm:$0xff] %v7541_v18  ;;  %v8668_v5 = vmax.f32 %v7541_v18, -1e+28  ;;  %3902 = vst.msk [vmem:[#allocation2 + $0x78] sm:$0xff] %vm3532_vm7, %v7541_v18  ;;  %v7549_v15 = vmax.f32 %v7543_v48, %v3221_v17  ;;  %3376 = vperm.xlu0 %5214, %v8666_v1   ;;  %v8866_v1 = vmov 2  }
 0x64c   : > { %v2817_v0 = vpop.permute.xlu0 %2816 }
 0x64d   : > { %8863 = vst [vmem:[#allocation62_spill] sm:$0xff] %v7549_v15  ;;  %3899 = vst.msk [vmem:[#allocation2 + $0x60] sm:$0xff] %vm3532_vm7, %v7549_v15  ;;  %3401 = vperm.xlu1 %5213, %v8668_v5   ;;  %v8670_v48 = vmax.f32 %v7549_v15, -1e+28 }
 0x64e   : > { %v3225_v49 = vpop.xlane.xlu1 %3224 }
 0x64f   : > { %v7560_v59 = vmax.f32 %v7557_v58, %v3225_v49  ;;  %3681 = vrot.lane.b32.xlu0 %v7452_v61, %s5690_s7 }
 0x650   : > { %v3670_v17 = vpop.permute.xlu0 %3669 }
 0x651   : > { %8865 = vst [vmem:[#allocation64_spill] sm:$0xff] %v7560_v59  ;;  %3901 = vst.msk [vmem:[#allocation2 + $0x70] sm:$0xff] %vm3532_vm7, %v7560_v59  ;;  %5216 = vset.pattern.permute.xlu1 %v8866_v1  ;;  %5098 = vmatprep.subr.bf16.mxu1 %v3670_v17  ;;  %v8672_v5 = vmax.f32 %v7560_v59, -1e+28 }
 0x652   : > { %v2815_v18 = vpop.permute.xlu1 %2814  ;;  %5099 = vmatpush3.bf16.msra.mxu1 %v3670_v17  ;;  %v8867_v17 = vld [vmem:[#allocation33_spill] sm:$0xff] }
 0x653   : > { %3386 = vperm.xlu0 %5214, %v8670_v48   ;;  %5066 = vmatprep.subr.bf16.mxu0 %v2815_v18 }
 0x654   : > { %5067 = vmatpush3.bf16.msra.mxu0 %v2815_v18  ;;  %v3672_v49 = vpop.permute.xlu0 %3671  ;;  %v2551_v18 = vsub.f32 %v8867_v17, %v7228_v7  ;;  %v2558_v7 = vsub.f32 %v7009_v22, %v7245_v4 }
 0x655   : > { %5068 = vmatprep.subr.bf16.mxu0 %v2817_v0  ;;  %5100 = vmatprep.subr.bf16.mxu1 %v3672_v49 }
 0x656   : > { %v2819_v61 = vpop.permute.xlu1 %2818  ;;  %5101 = vmatpush3.bf16.msra.mxu1 %v3672_v49  ;;  %v2569_v15 = vmul.f32 1.442695, %v2551_v18  ;;  %v2554_v49 = vsub.f32 %v6993_v8, %v7236_v56  ;;  %v2583_v8 = vmul.f32 1.442695, %v2558_v7  ;;  %v2560_v56 = vsub.f32 %v7014_v41, %v7281_v9  ;;  %v8872_v9 = vld [vmem:[#allocation44_spill] sm:$0xff] }
 0x657   : > { %3396 = vperm.xlu0 %5214, %v8672_v5  }
 0x658   : > { %5069 = vmatpush3.bf16.msra.mxu0 %v2817_v0  ;;  %5361 = vpow2.f32 %v2569_v15  ;;  %v2575_v5 = vmul.f32 1.442695, %v2554_v49  ;;  %v2556_v0 = vsub.f32 %v6998_v46, %v7241_v62  ;;  %v8870_v46 = vld [vmem:[#allocation24_spill] sm:$0xff]  ;;  %v2587_v22 = vmul.f32 1.442695, %v2560_v56 }
 0x659   : > { %5070 = vmatprep.subr.bf16.mxu0 %v2819_v61  ;;  %v2555_v62 = vsub.f32 %v8870_v46, %v7243_v16 }
 0x65a   : > { %v2821_v58 = vpop.permute.xlu1 %2820  ;;  %5363 = vpow2.f32 %v2575_v5  ;;  %v2579_v59 = vmul.f32 1.442695, %v2556_v0  ;;  %v2564_v5 = vsub.f32 %v8872_v9, %v7286_v13  ;;  %v8874_v13 = vld [vmem:[#allocation43_spill] sm:$0xff] }
 0x65b   : > { %5215 = vset.pattern.permute.xlu0 %v8866_v1  ;;  %v8868_v1 = vld [vmem:[#allocation27_spill] sm:$0xff]  ;;  %v2577_v4 = vmul.f32 1.442695, %v2555_v62  ;;  %v8876_v62 = vld [vmem:[#allocation30_spill] sm:$0xff] }
 0x65c   : > { %5071 = vmatpush3.bf16.msra.mxu0 %v2819_v61  ;;  %v2552_v61 = vsub.f32 %v8868_v1, %v7231_v24  ;;  %5365 = vpow2.f32 %v2579_v59  ;;  %v8871_v59 = vld [vmem:[#allocation26_spill] sm:$0xff] }
 0x65d   : > { %5072 = vmatprep.subr.bf16.mxu0 %v2821_v58  ;;  %v2557_v15 = vsub.f32 %v8871_v59, %v7247_v21  ;;  %v2595_v21 = vmul.f32 1.442695, %v2564_v5 }
 0x65e   : > { %v2823_v48 = vpop.permute.xlu1 %2822  ;;  %v2571_v18 = vmul.f32 1.442695, %v2552_v61 }
 0x65f   : > { %v2581_v49 = vmul.f32 1.442695, %v2557_v15 }
 0x660   : > { %5073 = vmatpush3.bf16.msra.mxu0 %v2821_v58  ;;  %v8869_v58 = vld [vmem:[#allocation23_spill] sm:$0xff]  ;;  %5367 = vpow2.f32 %v2571_v18 }
 0x661   : > { %5074 = vmatprep.subr.bf16.mxu0 %v2823_v48  ;;  %v2553_v17 = vsub.f32 %v8869_v58, %v7238_v47  ;;  %5369 = vpow2.f32 %v2583_v8  ;;  %v2562_v47 = vsub.f32 %v7024_v35, %v7283_v54  ;;  %v8873_v35 = vld [vmem:[#allocation28_spill] sm:$0xff] }
 0x662   : > { %v7590_v24 = vpop.eup %5361  ;;  %v2559_v54 = vsub.f32 %v8873_v35, %v7321_v63 }
 0x663   : > { %v2591_v16 = vmul.f32 1.442695, %v2562_v47 }
 0x664   : > { %5075 = vmatpush3.bf16.msra.mxu0 %v2823_v48  ;;  %v2573_v48 = vmul.f32 1.442695, %v2553_v17  ;;  %v7597_v41 = vpop.eup %5363  ;;  %v2585_v61 = vmul.f32 1.442695, %v2559_v54  ;;  %v8875_v17 = vld [vmem:[#allocation29_spill] sm:$0xff] }
 0x665   : > { %v2563_v18 = vsub.f32 %v8875_v17, %v7341_v33  ;;  %v8877_v33 = vld [vmem:[#allocation36_spill] sm:$0xff] }
 0x666   : > { %5371 = vpow2.f32 %v2573_v48  ;;  %v7605_v0 = vpop.eup %5365  ;;  %v8878_v47 = vmax.f32 %v8877_v33, -1e+28  ;;  %v8886_v33 = vld [vmem:[#allocation39_spill] sm:$0xff] }
 0x667   : > { %5373 = vpow2.f32 %v2587_v22  ;;  %v2390_v22 = vmax.f32 %v8876_v62, -1e+28  ;;  %v8885_v62 = vld [vmem:[#allocation32_spill] sm:$0xff] }
 0x668   : > { %5375 = vpow2.f32 %v2577_v4 }
 0x669   : > { %5377 = vpow2.f32 %v2591_v16  ;;  %v2422_v4 = vsub.f32 %v2390_v22, %v8878_v47  ;;  %v8879_v16 = vld [vmem:[#allocation47_spill] sm:$0xff]  ;;  %v2393_v22 = vmax.f32 %v8885_v62, -1e+28  ;;  %v8887_v47 = vmax.f32 %v8886_v33, -1e+28 }
 0x66a   : > { %v7607_v1 = vpop.eup %5367  ;;  %5379 = vpow2.f32 %v2581_v49  ;;  %v2391_v9 = vmax.f32 %v8879_v16, -1e+28  ;;  %v8880_v49 = vld [vmem:[#allocation25_spill] sm:$0xff] }
 0x66b   : > { %v7613_v7 = vpop.eup %5369  ;;  %5381 = vpow2.f32 %v2595_v21  ;;  %v2439_v5 = vmul.f32 1.442695, %v2422_v4  ;;  %v8881_v35 = vmax.f32 %v8880_v49, -1e+28  ;;  %v2425_v4 = vsub.f32 %v2393_v22, %v8887_v47  ;;  %v8888_v49 = vld [vmem:[#allocation10_spill] sm:$0xff]  ;;  %v8892_v22 = vld [vmem:[#allocation35_spill] sm:$0xff] }
 0x66c   : > { %5383 = vpow2.f32 %v2585_v61  ;;  %v8882_v61 = vld [vmem:[#allocation6_spill] sm:$0xff] }
 0x66d   : > { %v2423_v54 = vsub.f32 %v2391_v9, %v8881_v35  ;;  %v2394_v35 = vmax.f32 %v8888_v49, -1e+28 }
 0x670   : > { %v7615_v58 = vpop.eup %5371 }
 0x671   : > { %2633 = vadd.xlane.f32.xlu1 %v7590_v24  ;;  %v7621_v8 = vpop.eup %5373 }
 0x672   : > { %v7623_v56 = vpop.eup %5375 }
 0x673   : > { %v7627_v48 = vpop.eup %5377 }
 0x674   : > { %v7629_v46 = vpop.eup %5379 }
 0x675   : > { %2639 = vadd.xlane.f32.xlu1 %v7597_v41  ;;  %v7636_v59 = vpop.eup %5381 }
 0x676   : > { %2631 = vadd.xlane.f32.xlu0 %v7220_v28  ;;  %v2561_v28 = vsub.f32 %v8874_v13, %v7331_v39  ;;  %v2593_v39 = vmul.f32 1.442695, %v2563_v18  ;;  %v7638_v15 = vpop.eup %5383  ;;  %v2392_v13 = vmax.f32 %v8882_v61, -1e+28  ;;  %v8889_v61 = vld [vmem:[#allocation7_spill] sm:$0xff] }
 0x678   : > { %v2589_v63 = vmul.f32 1.442695, %v2561_v28  ;;  %v2441_v28 = vmul.f32 1.442695, %v2423_v54  ;;  %v2445_v54 = vmul.f32 1.442695, %v2425_v4 }
 0x679   : > { %2643 = vadd.xlane.f32.xlu1 %v7605_v0 }
 0x67a   : > { %2635 = vadd.xlane.f32.xlu0 %v7607_v1  ;;  %5385 = vpow2.f32 %v2589_v63  ;;  %v8883_v63 = vld [vmem:[#allocation9_spill] sm:$0xff] }
 0x67b   : > { %5387 = vpow2.f32 %v2593_v39  ;;  %v8884_v17 = vmax.f32 %v8883_v63, -1e+28 }
 0x67c   : > { %5389 = vpow2.f32 %v2439_v5 }
 0x67d   : > { %2647 = vadd.xlane.f32.xlu1 %v7613_v7  ;;  %v2424_v18 = vsub.f32 %v2392_v13, %v8884_v17  ;;  %5391 = vpow2.f32 %v2441_v28  ;;  %v8890_v13 = vmax.f32 %v8889_v61, -1e+28  ;;  %v8891_v17 = vld [vmem:[#allocation13_spill] sm:$0xff]  ;;  %v2395_v28 = vmax.f32 %v8892_v22, -1e+28 }
 0x67e   : > { %2637 = vadd.xlane.f32.xlu0 %v7615_v58  ;;  %v2398_v40 = vmax.f32 %v8891_v17, -1e+28 }
 0x67f   : > { %v2443_v16 = vmul.f32 1.442695, %v2424_v18  ;;  %v2426_v63 = vsub.f32 %v2394_v35, %v8890_v13  ;;  %v8893_v18 = vld [vmem:[#allocation15_spill] sm:$0xff] }
 0x680   : > { %v8894_v33 = vmax.f32 %v8893_v18, -1e+28 }
 0x681   : > { %2651 = vadd.xlane.f32.xlu1 %v7621_v8  ;;  %5393 = vpow2.f32 %v2443_v16  ;;  %v8896_v16 = vld [vmem:[#allocation41_spill] sm:$0xff] }
 0x682   : > { %2641 = vadd.xlane.f32.xlu0 %v7623_v56  ;;  %v2430_v47 = vsub.f32 %v2398_v40, %v8894_v33  ;;  %5395 = vpow2.f32 %v2445_v54  ;;  %v8898_v40 = vld [vmem:[#allocation8_spill] sm:$0xff]  ;;  %v8900_v54 = vld [vmem:[#allocation11_spill] sm:$0xff] }
 0x683   : > { %v2396_v22 = vmax.f32 %v8898_v40, -1e+28  ;;  %v8902_v33 = vld [vmem:[#allocation19_spill] sm:$0xff] }
 0x684   : > { %v7645_v21 = vpop.eup %5385 }
 0x685   : > { %2655 = vadd.xlane.f32.xlu1 %v7627_v48  ;;  %v7651_v39 = vpop.eup %5387 }
 0x686   : > { %2645 = vadd.xlane.f32.xlu0 %v7629_v46  ;;  %v7662_v26 = vpop.eup %5389 }
 0x687   : > { %v7674_v17 = vpop.eup %5391 }
 0x689   : > { %2659 = vadd.xlane.f32.xlu1 %v7636_v59 }
 0x68a   : > { %2649 = vadd.xlane.f32.xlu0 %v7638_v15 }
 0x68e   : > { %2653 = vadd.xlane.f32.xlu0 %v7645_v21 }
 0x692   : > { %2657 = vadd.xlane.f32.xlu0 %v7651_v39 }
 0x694   : > { %v3327_v9 = vpop.permute.xlu1 %3326 }
 0x695   : > { %v3404_v5 = vsub.f32 %v7294_v36, %v3327_v9  ;;  %v8895_v36 = vld [vmem:[#allocation17_spill] sm:$0xff]  ;;  %v8897_v9 = vmax.f32 %v8896_v16, -1e+28  ;;  %v7685_v16 = vpop.eup %5393 }
 0x696   : > { %v2400_v4 = vmax.f32 %v8895_v36, -1e+28 }
 0x697   : > { %v3420_v62 = vmul.f32 1.442695, %v3404_v5  ;;  %v2427_v35 = vsub.f32 %v2395_v28, %v8897_v9  ;;  %v2447_v5 = vmul.f32 1.442695, %v2426_v63  ;;  %v8901_v28 = vmax.f32 %v8900_v54, -1e+28 }
 0x698   : > { %v2825_v3 = vpop.permute.xlu1 %2824  ;;  %v3332_v51 = vpop.permute.xlu0 %3331  ;;  %v8903_v9 = vld [vmem:[#allocation38_spill] sm:$0xff] }
 0x699   : > { %v3405_v49 = vsub.f32 %v7299_v57, %v3332_v51  ;;  %5076 = vmatprep.subr.bf16.mxu0 %v2825_v3  ;;  %5397 = vpow2.f32 %v3420_v62  ;;  %v2455_v57 = vmul.f32 1.442695, %v2430_v47  ;;  %v8899_v51 = vmax.f32 %v7156_v20, -1e+28 }
 0x69a   : > { %2717 = vperm.xlu1 %5216, %v7662_v26   ;;  %5077 = vmatpush3.bf16.msra.mxu0 %v2825_v3  ;;  %v2449_v3 = vmul.f32 1.442695, %v2427_v35  ;;  %v2428_v63 = vsub.f32 %v2396_v22, %v8901_v28  ;;  %v2402_v62 = vmax.f32 %v8902_v33, -1e+28  ;;  %v2397_v47 = vmax.f32 %v8903_v9, -1e+28  ;;  %v7694_v33 = vpop.eup %5395 }
 0x69b   : > { %v3422_v61 = vmul.f32 1.442695, %v3405_v49  ;;  %v2432_v18 = vsub.f32 %v2400_v4, %v8899_v51  ;;  %v8904_v4 = vmax.f32 %v7165_v12, -1e+28  ;;  %v8905_v35 = vld [vmem:[#allocation46_spill] sm:$0xff] }
 0x69c   : > { %v7672_v13 = vpop.permute.xlu0 %3336  ;;  %v2451_v22 = vmul.f32 1.442695, %v2428_v63  ;;  %v2404_v51 = vmax.f32 %v7183_v10, -1e+28 }
 0x69d   : > { %5399 = vpow2.f32 %v3422_v61  ;;  %v2459_v20 = vmul.f32 1.442695, %v2432_v18  ;;  %v2434_v61 = vsub.f32 %v2402_v62, %v8904_v4  ;;  %v8908_v62 = vmax.f32 %v7186_v55, -1e+28 }
 0x69e   : > { %2722 = vperm.xlu1 %5216, %v7674_v17   ;;  %5401 = vpow2.f32 %v2447_v5  ;;  %v8906_v5 = vmax.f32 %v8905_v35, -1e+28 }
 0x69f   : > { %5403 = vpow2.f32 %v2455_v57  ;;  %v8907_v57 = vld [vmem:[#allocation42_spill] sm:$0xff]  ;;  %v2463_v12 = vmul.f32 1.442695, %v2434_v61  ;;  %v2436_v9 = vsub.f32 %v2404_v51, %v8908_v62 }
 0x6a0   : > { %v7683_v49 = vpop.permute.xlu1 %3341  ;;  %v3674_v36 = vpop.permute.xlu0 %3673  ;;  %5405 = vpow2.f32 %v2449_v3  ;;  %v2429_v40 = vsub.f32 %v2397_v47, %v8906_v5  ;;  %v2399_v18 = vmax.f32 %v8907_v57, -1e+28  ;;  %v8911_v5 = vld [vmem:[#allocation31_spill] sm:$0xff] }
 0x6a1   : > { %5102 = vmatprep.subr.bf16.mxu1 %v3674_v36  ;;  %5407 = vpow2.f32 %v2459_v20  ;;  %v2401_v51 = vmax.f32 %v8911_v5, -1e+28 }
 0x6a2   : > { %2727 = vperm.xlu1 %5216, %v7685_v16   ;;  %5103 = vmatpush3.bf16.msra.mxu1 %v3674_v36  ;;  %v2453_v10 = vmul.f32 1.442695, %v2429_v40  ;;  %v8909_v36 = vld [vmem:[#allocation45_spill] sm:$0xff]  ;;  %5409 = vpow2.f32 %v2451_v22  ;;  %v2467_v40 = vmul.f32 1.442695, %v2436_v9 }
 0x6a3   : > { %v7699_v3 = vpop.eup %5397  ;;  %v8910_v47 = vmax.f32 %v8909_v36, -1e+28  ;;  %5411 = vpow2.f32 %v2463_v12 }
 0x6a4   : > { %v2827_v54 = vpop.permute.xlu1 %2826  ;;  %v3676_v28 = vpop.permute.xlu0 %3675  ;;  %5413 = vpow2.f32 %v2453_v10 }
 0x6a5   : > { %5078 = vmatprep.subr.bf16.mxu0 %v2827_v54  ;;  %5104 = vmatprep.subr.bf16.mxu1 %v3676_v28  ;;  %v2431_v4 = vsub.f32 %v2399_v18, %v8910_v47  ;;  %v8914_v47 = vld [vmem:[#allocation37_spill] sm:$0xff]  ;;  %5415 = vpow2.f32 %v2467_v40  ;;  %v2808_v40 = vpack.c.bf16 %v7597_v41, %v7615_v58  ;;  %v2809_v58 = vpack.c.bf16 %v7605_v0, %v7623_v56 }
 0x6a6   : > { %2732 = vperm.xlu1 %5216, %v7694_v33   ;;  %5079 = vmatpush3.bf16.msra.mxu0 %v2827_v54  ;;  %v2403_v12 = vmax.f32 %v8914_v47, -1e+28  ;;  %v3407_v0 = vsub.f32 %v7310_v50, %v7683_v49  ;;  %v2811_v56 = vpack.c.bf16 %v7621_v8, %v7638_v15 }
 0x6a7   : > { %v7702_v63 = vpop.eup %5399  ;;  %5105 = vmatpush3.bf16.msra.mxu1 %v3676_v28  ;;  %v2457_v54 = vmul.f32 1.442695, %v2431_v4  ;;  %v8912_v28 = vld [vmem:[#allocation34_spill] sm:$0xff]  ;;  %v8915_v4 = vld [vmem:[#allocation40_spill] sm:$0xff] }
 0x6a8   : > { %v7706_v20 = vpop.permute.xlu1 %3346  ;;  %2712 = vperm.xlu0 %5215, %v7339_v44   ;;  %v7709_v55 = vpop.permute.xlu0 %3351  ;;  %v3661_v61 = vpack.c.bf16 %v7702_v63, %v7699_v3  ;;  %v8913_v44 = vmax.f32 %v8912_v28, -1e+28  ;;  %v3426_v50 = vmul.f32 1.442695, %v3407_v0 }
 0x6a9   : > { %v7713_v35 = vpop.eup %5401  ;;  %5417 = vpow2.f32 %v2457_v54 }
 0x6aa   : > { %2737 = vperm.xlu1 %5216, %v7713_v35   ;;  %5114 = vmatprep.mubr.bf16.mxu1 %v3661_v61  ;;  %v7717_v22 = vpop.eup %5403  ;;  %v2433_v57 = vsub.f32 %v2401_v51, %v8913_v44  ;;  %v8916_v61 = vmax.f32 %v8915_v4, -1e+28  ;;  %v2807_v51 = vpack.c.bf16 %v7607_v1, %v7590_v24 }
 0x6ab   : > { %v7724_v36 = vpop.eup %5405 }
 0x6ac   : > { %v2829_v18 = vpop.permute.xlu1 %2828  ;;  %2757 = vperm.xlu0 %5215, %v7717_v22   ;;  %v7722_v62 = vpop.permute.xlu0 %3356  ;;  %v2461_v10 = vmul.f32 1.442695, %v2433_v57  ;;  %v2435_v5 = vsub.f32 %v2403_v12, %v8916_v61 }
 0x6ad   : > { %5080 = vmatprep.subr.bf16.mxu0 %v2829_v18  ;;  %v7728_v9 = vpop.eup %5407 }
 0x6ae   : > { %2742 = vperm.xlu1 %5216, %v7724_v36   ;;  %5081 = vmatpush3.bf16.msra.mxu0 %v2829_v18  ;;  %v7737_v47 = vpop.eup %5409  ;;  %5419 = vpow2.f32 %v2461_v10  ;;  %v2465_v57 = vmul.f32 1.442695, %v2435_v5  ;;  %v2810_v18 = vpack.c.bf16 %v7613_v7, %v7629_v46  ;;  %v8917_v10 = vmov 3  }
 0x6af   : > { %v7740_v54 = vpop.eup %5411  ;;  %v3408_v7 = vsub.f32 %v7317_v53, %v7706_v20  ;;  %v2812_v46 = vpack.c.bf16 %v7627_v48, %v7645_v21  ;;  %v2813_v48 = vpack.c.bf16 %v7636_v59, %v7651_v39  ;;  %v3410_v21 = vsub.f32 %v7329_v11, %v7722_v62 }
 0x6b0   : > { %2767 = vperm.xlu0 %5215, %v7728_v9   ;;  %v3362_v28 = vpop.permute.xlu1 %3361  ;;  %v3678_v44 = vpop.permute.xlu0 %3677  ;;  %5421 = vpow2.f32 %v2465_v57 }
 0x6b1   : > { %5083 = vmatmul.mubr.bf16.vlgmr.msra.gmra.mrb[16].mxu0 %v2807_v51  ;;  %5106 = vmatprep.subr.bf16.mxu1 %v3678_v44  ;;  %v7743_v1 = vpop.eup %5413  ;;  %v3409_v51 = vsub.f32 %v7324_v34, %v7709_v55  ;;  %v3428_v8 = vmul.f32 1.442695, %v3408_v7  ;;  %5423 = vpow2.f32 %v3426_v50  ;;  %v3411_v34 = vsub.f32 %v7336_v2, %v3362_v28 }
 0x6b2   : > { %2747 = vperm.xlu1 %5216, %v7737_v47   ;;  %5086 = vmatprep.mubr.bf16.mxu0 %v2808_v40  ;;  %v7746_v41 = vpop.eup %5415  ;;  %v3406_v40 = vsub.f32 %v7304_v31, %v7672_v13 }
 0x6b3   : > { %5107 = vmatpush3.bf16.msra.mxu1 %v3678_v44  ;;  %v7753_v12 = vpop.eup %5417  ;;  %v3430_v49 = vmul.f32 1.442695, %v3409_v51  ;;  %5425 = vpow2.f32 %v3428_v8  ;;  %v3434_v57 = vmul.f32 1.442695, %v3411_v34 }
 0x6b4   : > { %2777 = vperm.xlu0 %5215, %v7740_v54   ;;  %v3680_v24 = vpop.permute.xlu1 %3679  ;;  %v3424_v53 = vmul.f32 1.442695, %v3406_v40 }
 0x6b5   : > { %5108 = vmatprep.subr.bf16.mxu1 %v3680_v24  ;;  %5427 = vpow2.f32 %v3430_v49 }
 0x6b6   : > { %2752 = vperm.xlu1 %5216, %v7743_v1   ;;  %5429 = vpow2.f32 %v3424_v53 }
 0x6b7   : > { %5109 = vmatpush3.bf16.msra.mxu1 %v3680_v24  ;;  %5431 = vpow2.f32 %v3434_v57 }
 0x6b8   : > { %2787 = vperm.xlu0 %5215, %v7746_v41   ;;  %v7757_v4 = vpop.eup %5419  ;;  %v3372_v61 = vpop.permute.xlu1 %3371 }
 0x6b9   : > { %5087 = vmatmul.mubr.bf16.gmra.mrb[20].mxu0 %v2809_v58  ;;  %v3413_v44 = vsub.f32 %v7344_v43, %v3372_v61  ;;  %v3432_v58 = vmul.f32 1.442695, %v3410_v21 }
 0x6ba   : > { %2762 = vperm.xlu1 %5216, %v7753_v12   ;;  %5090 = vmatprep.mubr.bf16.mxu0 %v2810_v18  ;;  %v7768_v5 = vpop.eup %5421 }
 0x6bb   : > { %v3438_v59 = vmul.f32 1.442695, %v3413_v44 }
 0x6bc   : > { %5218 = vset.pattern.permute.xlu0 %v8917_v10  ;;  %v3382_v15 = vpop.permute.xlu1 %3381 }
 0x6bd   : > { %v3415_v43 = vsub.f32 %v7351_v19, %v3382_v15 }
 0x6be   : > { %2772 = vperm.xlu1 %5216, %v7757_v4  }
 0x6c0   : > { %v3684_v13 = vpop.permute.xlu1 %3683 }
 0x6c1   : > { %5091 = vmatmul.mubr.bf16.gmra.mrb[24].mxu0 %v2811_v56 }
 0x6c2   : > { %2782 = vperm.xlu1 %5216, %v7768_v5   ;;  %5094 = vmatprep.mubr.bf16.mxu0 %v2812_v46  ;;  %v3442_v46 = vmul.f32 1.442695, %v3415_v43  ;;  %v2602_v43 = vld [vmem:[#allocation3 + $0x28] sm:$0xff] }
 0x6c4   : > { %v3392_v2 = vpop.permute.xlu1 %3391 }
 0x6c6   : > { %v3367_v20 = vpop.permute.xlu0 %3366  ;;  %5217 = vset.pattern.permute.xlu1 %v8917_v10  ;;  %v3417_v10 = vsub.f32 %v7359_v42, %v3392_v2 }
 0x6c7   : > { %v3412_v31 = vsub.f32 %v7365_v23, %v3367_v20  ;;  %v7784_v23 = vpop.eup %5423 }
 0x6c8   : > { %v7786_v11 = vpop.eup %5425  ;;  %v3446_v40 = vmul.f32 1.442695, %v3417_v10  ;;  %v2598_v10 = vld [vmem:[#allocation3 + $0x8] sm:$0xff] }
 0x6c9   : > { %5095 = vmatmul.mubr.bf16.gmra.mrb[28].mxu0 %v2813_v48  ;;  %v3436_v24 = vmul.f32 1.442695, %v3412_v31  ;;  %v7789_v28 = vpop.eup %5427 }
 0x6ca   : > { %v3377_v55 = vpop.permute.xlu0 %3376  ;;  %v7793_v0 = vpop.eup %5429  ;;  %v3663_v19 = vpack.c.bf16 %v7789_v28, %v7786_v11 }
 0x6cb   : > { %v3414_v39 = vsub.f32 %v7369_v6, %v3377_v55  ;;  %5433 = vpow2.f32 %v3436_v24  ;;  %v3662_v7 = vpack.c.bf16 %v7784_v23, %v7793_v0 }
 0x6cc   : > { %5435 = vpow2.f32 %v3432_v58  ;;  %v3402_v50 = vpop.permute.xlu1 %3401 }
 0x6cd   : > { %5437 = vpow2.f32 %v3438_v59  ;;  %v3440_v6 = vmul.f32 1.442695, %v3414_v39  ;;  %v3419_v8 = vsub.f32 %v7373_v45, %v3402_v50 }
 0x6ce   : > { %v3682_v18 = vpop.permute.xlu0 %3681 }
 0x6cf   : > { %5110 = vmatprep.subr.bf16.mxu1 %v3682_v18  ;;  %5439 = vpow2.f32 %v3440_v6  ;;  %v3450_v34 = vmul.f32 1.442695, %v3419_v8  ;;  %v2614_v6 = vmul.f32 %v7662_v26, %v2598_v10  ;;  %v2605_v10 = vld [vmem:[#allocation3 + $0x40] sm:$0xff] }
 0x6d0   : > { %5111 = vmatpush3.bf16.msra.mxu1 %v3682_v18  ;;  %v2599_v18 = vld [vmem:[#allocation3 + $0x10] sm:$0xff] }
 0x6d1   : > { %5112 = vmatprep.subr.bf16.mxu1 %v3684_v13  ;;  %v2615_v59 = vmul.f32 %v7674_v17, %v2599_v18  ;;  %v2600_v17 = vld [vmem:[#allocation3 + $0x18] sm:$0xff]  ;;  %v2603_v18 = vld [vmem:[#allocation3 + $0x30] sm:$0xff] }
 0x6d2   : > { %v3387_v62 = vpop.permute.xlu0 %3386  ;;  %v2616_v50 = vmul.f32 %v7685_v16, %v2600_v17 }
 0x6d3   : > { %v3416_v61 = vsub.f32 %v7377_v60, %v3387_v62  ;;  %v7800_v60 = vpop.eup %5431  ;;  %v2618_v62 = vmul.f32 %v7713_v35, %v2602_v43 }
 0x6d4   : > { %5113 = vmatpush3.bf16.msra.mxu1 %v3684_v13 }
 0x6d5   : > { %v3444_v56 = vmul.f32 1.442695, %v3416_v61  ;;  %v7803_v15 = vpop.eup %5433 }
 0x6d6   : > { %v3397_v51 = vpop.permute.xlu0 %3396  ;;  %v7805_v49 = vpop.eup %5435 }
 0x6d7   : > { %5115 = vmatmul.mubr.bf16.vlgmr.msra.gmra.mrb[16].mxu1 %v3662_v7  ;;  %v3418_v42 = vsub.f32 %v7381_v37, %v3397_v51  ;;  %5441 = vpow2.f32 %v3444_v56  ;;  %v7807_v20 = vpop.eup %5437  ;;  %v3664_v48 = vpack.c.bf16 %v7800_v60, %v7805_v49  ;;  %v2604_v51 = vld [vmem:[#allocation3 + $0x38] sm:$0xff] }
 0x6d8   : > { %5118 = vmatprep.mubr.bf16.mxu1 %v3663_v19  ;;  %5443 = vpow2.f32 %v3442_v46  ;;  %v3665_v37 = vpack.c.bf16 %v7807_v20, %v7803_v15  ;;  %v2620_v19 = vmul.f32 %v7737_v47, %v2604_v51  ;;  %v2607_v51 = vld [vmem:[#allocation3 + $0x50] sm:$0xff] }
 0x6d9   : > { %5445 = vpow2.f32 %v3446_v40  ;;  %v3448_v53 = vmul.f32 1.442695, %v3418_v42  ;;  %v7813_v31 = vpop.eup %5439 }
 0x6db   : > { %5447 = vpow2.f32 %v3448_v53  ;;  %v2606_v53 = vld [vmem:[#allocation3 + $0x48] sm:$0xff] }
 0x6dc   : > { %5449 = vpow2.f32 %v3450_v34  ;;  %v2622_v26 = vmul.f32 %v7717_v22, %v2606_v53  ;;  %v2619_v22 = vmul.f32 %v7724_v36, %v2603_v18  ;;  %v2611_v53 = vld [vmem:[#allocation3 + $0x70] sm:$0xff] }
 0x6df   : > { %5119 = vmatmul.mubr.bf16.gmra.mrb[20].mxu1 %v3664_v48  ;;  %v2601_v48 = vld [vmem:[#allocation3 + $0x20] sm:$0xff] }
 0x6e0   : > { %5122 = vmatprep.mubr.bf16.mxu1 %v3665_v37  ;;  %v2617_v47 = vmul.f32 %v7694_v33, %v2601_v48 }
 0x6e1   : > { %v7815_v45 = vpop.eup %5441 }
 0x6e2   : > { %v7817_v21 = vpop.eup %5443 }
 0x6e3   : > { %v7819_v13 = vpop.eup %5445  ;;  %v3666_v55 = vpack.c.bf16 %v7817_v21, %v7813_v31 }
 0x6e4   : > { %v3667_v44 = vpack.c.bf16 %v7819_v13, %v7815_v45 }
 0x6e5   : > { %v7825_v57 = vpop.eup %5447 }
 0x6e6   : > { %v7827_v24 = vpop.eup %5449 }
 0x6e7   : > { %5123 = vmatmul.mubr.bf16.gmra.mrb[24].mxu1 %v3666_v55  ;;  %v3668_v58 = vpack.c.bf16 %v7827_v24, %v7825_v57 }
 0x6e8   : > { %5126 = vmatprep.mubr.bf16.mxu1 %v3667_v44 }
 0x6ef   : > { %5127 = vmatmul.mubr.bf16.gmra.mrb[28].mxu1 %v3668_v58  ;;  %v2608_v58 = vld [vmem:[#allocation3 + $0x58] sm:$0xff] }
 0x6f0   : > { %v2624_v16 = vmul.f32 %v7728_v9, %v2608_v58  ;;  %v2621_v9 = vmul.f32 %v7743_v1, %v2605_v10  ;;  %v2609_v1 = vld [vmem:[#allocation3 + $0x60] sm:$0xff] }
 0x6fe   : > { %v2634_v2 = vpop.xlane.xlu1 %2633 }
 0x6ff   : > { %v2663_v39 = vadd.f32 %v2634_v2, %v2615_v59 }
 0x701   : > { %2680 = vst.msk [vmem:[#allocation3 + $0x10] sm:$0xff] %vm2677_vm5, %v2663_v39 }
 0x702   : > { %v2640_v61 = vpop.xlane.xlu1 %2639 }
 0x703   : > { %v2666_v56 = vadd.f32 %v2640_v61, %v2618_v62  ;;  %v2632_v7 = vpop.xlane.xlu0 %2631  ;;  %v2610_v62 = vld [vmem:[#allocation3 + $0x68] sm:$0xff] }
 0x704   : > { %v2662_v46 = vadd.f32 %v2632_v7, %v2614_v6  ;;  %v2626_v33 = vmul.f32 %v7740_v54, %v2610_v62  ;;  %v2623_v54 = vmul.f32 %v7753_v12, %v2607_v51 }
 0x705   : > { %2683 = vst.msk [vmem:[#allocation3 + $0x28] sm:$0xff] %vm2677_vm5, %v2666_v56 }
 0x706   : > { %2679 = vst.msk [vmem:[#allocation3 + $0x8] sm:$0xff] %vm2677_vm5, %v2662_v46  ;;  %v2644_v40 = vpop.xlane.xlu1 %2643  ;;  %v2612_v46 = vld [vmem:[#allocation3 + $0x78] sm:$0xff] }
 0x707   : > { %v2668_v42 = vadd.f32 %v2644_v40, %v2620_v19  ;;  %v2636_v35 = vpop.xlane.xlu0 %2635  ;;  %v2628_v36 = vmul.f32 %v7746_v41, %v2612_v46  ;;  %v2627_v41 = vmul.f32 %v7768_v5, %v2611_v53 }
 0x708   : > { %v2664_v8 = vadd.f32 %v2636_v35, %v2616_v50 }
 0x709   : > { %2685 = vst.msk [vmem:[#allocation3 + $0x38] sm:$0xff] %vm2677_vm5, %v2668_v42  ;;  %v2625_v42 = vmul.f32 %v7757_v4, %v2609_v1 }
 0x70a   : > { %2681 = vst.msk [vmem:[#allocation3 + $0x18] sm:$0xff] %vm2677_vm5, %v2664_v8  ;;  %v2648_v34 = vpop.xlane.xlu1 %2647 }
 0x70b   : > { %v2670_v37 = vadd.f32 %v2648_v34, %v2622_v26  ;;  %v2638_v55 = vpop.xlane.xlu0 %2637 }
 0x70c   : > { %v2665_v44 = vadd.f32 %v2638_v55, %v2617_v47 }
 0x70d   : > { %2687 = vst.msk [vmem:[#allocation3 + $0x48] sm:$0xff] %vm2677_vm5, %v2670_v37 }
 0x70e   : > { %2682 = vst.msk [vmem:[#allocation3 + $0x20] sm:$0xff] %vm2677_vm5, %v2665_v44  ;;  %v2652_v59 = vpop.xlane.xlu1 %2651 }
 0x70f   : > { %v2672_v2 = vadd.f32 %v2652_v59, %v2624_v16  ;;  %v2642_v39 = vpop.xlane.xlu0 %2641 }
 0x710   : > { %v2667_v43 = vadd.f32 %v2642_v39, %v2619_v22 }
 0x711   : > { %2689 = vst.msk [vmem:[#allocation3 + $0x58] sm:$0xff] %vm2677_vm5, %v2672_v2 }
 0x712   : > { %2684 = vst.msk [vmem:[#allocation3 + $0x30] sm:$0xff] %vm2677_vm5, %v2667_v43  ;;  %v2656_v61 = vpop.xlane.xlu1 %2655 }
 0x713   : > { %v2674_v6 = vadd.f32 %v2656_v61, %v2626_v33  ;;  %v2646_v56 = vpop.xlane.xlu0 %2645 }
 0x714   : > { %v2669_v7 = vadd.f32 %v2646_v56, %v2621_v9 }
 0x715   : > { %2691 = vst.msk [vmem:[#allocation3 + $0x68] sm:$0xff] %vm2677_vm5, %v2674_v6 }
 0x716   : > { %2686 = vst.msk [vmem:[#allocation3 + $0x40] sm:$0xff] %vm2677_vm5, %v2669_v7  ;;  %v2660_v19 = vpop.xlane.xlu1 %2659 }
 0x717   : > { %v2676_v17 = vadd.f32 %v2660_v19, %v2628_v36  ;;  %v2650_v40 = vpop.xlane.xlu0 %2649 }
 0x718   : > { %v2671_v50 = vadd.f32 %v2650_v40, %v2623_v54 }
 0x719   : > { %2693 = vst.msk [vmem:[#allocation3 + $0x78] sm:$0xff] %vm2677_vm5, %v2676_v17 }
 0x71a   : > { %2688 = vst.msk [vmem:[#allocation3 + $0x50] sm:$0xff] %vm2677_vm5, %v2671_v50  ;;  %v7877_v46 = vpop.permute.xlu1 %2717 }
 0x71b   : > { %v2654_v35 = vpop.xlane.xlu0 %2653 }
 0x71c   : > { %v2673_v8 = vadd.f32 %v2654_v35, %v2625_v42 }
 0x71e   : > { %2690 = vst.msk [vmem:[#allocation3 + $0x60] sm:$0xff] %vm2677_vm5, %v2673_v8  ;;  %v7887_v17 = vpop.permute.xlu1 %2722 }
 0x71f   : > { %v2658_v26 = vpop.xlane.xlu0 %2657 }
 0x720   : > { %v2675_v48 = vadd.f32 %v2658_v26, %v2627_v41 }
 0x722   : > { %2692 = vst.msk [vmem:[#allocation3 + $0x70] sm:$0xff] %vm2677_vm5, %v2675_v48  ;;  %v7894_v1 = vpop.permute.xlu1 %2727  ;;  %v8923_v48 = vld [vmem:[#allocation22_spill] sm:$0xff] }
 0x726   : > { %v7902_v8 = vpop.permute.xlu1 %2732 }
 0x784   : > { %v5084_v12 = vpop.f32.mrb[16].mxu0 }
 0x785   : > { %v2872_v34 = vpop.f32.mrb[17].mxu0 }
 0x786   : > { %2951 = vrot.lane.b32.xlu1 %v2872_v34, %s5691_s8  ;;  %v5085_v47 = vpop.f32.mrb[18].mxu0 }
 0x787   : > { %v2875_v37 = vpop.f32.mrb[19].mxu0 }
 0x788   : > { %2953 = vrot.lane.b32.xlu0 %v2875_v37, %s5691_s8 }
 0x78a   : > { %2955 = vrot.lane.b32.xlu1 %v5084_v12, %s5691_s8  ;;  %v8924_v12 = vmax.f32 %v8923_v48, -1e+28  ;;  %v8939_v48 = vld [vmem:[#allocation64_spill] sm:$0xff] }
 0x78c   : > { %2957 = vrot.lane.b32.xlu0 %v5085_v47, %s5691_s8  ;;  %v5088_v4 = vpop.f32.mrb[20].mxu0 }
 0x78d   : > { %v2888_v55 = vpop.f32.mrb[21].mxu0 }
 0x78e   : > { %2959 = vrot.lane.b32.xlu1 %v2888_v55, %s5691_s8  ;;  %v5089_v44 = vpop.f32.mrb[22].mxu0  ;;  %v8927_v55 = vld [vmem:[#allocation58_spill] sm:$0xff] }
 0x78f   : > { %v2891_v58 = vpop.f32.mrb[23].mxu0 }
 0x790   : > { %2961 = vrot.lane.b32.xlu0 %v2891_v58, %s5691_s8 }
 0x792   : > { %2963 = vrot.lane.b32.xlu1 %v5088_v4, %s5691_s8  ;;  %v8926_v4 = vld [vmem:[#allocation12_spill] sm:$0xff] }
 0x794   : > { %2965 = vrot.lane.b32.xlu0 %v5089_v44, %s5691_s8  ;;  %v5092_v5 = vpop.f32.mrb[24].mxu0  ;;  %v8928_v44 = vmax.f32 %v8927_v55, -1e+28 }
 0x795   : > { %v2904_v16 = vpop.f32.mrb[25].mxu0 }
 0x796   : > { %2967 = vrot.lane.b32.xlu1 %v2904_v16, %s5691_s8  ;;  %v5093_v18 = vpop.f32.mrb[26].mxu0  ;;  %v8929_v16 = vld [vmem:[#allocation14_spill] sm:$0xff] }
 0x797   : > { %v2907_v59 = vpop.f32.mrb[27].mxu0 }
 0x798   : > { %2969 = vrot.lane.b32.xlu0 %v2907_v59, %s5691_s8 }
 0x79a   : > { %2971 = vrot.lane.b32.xlu1 %v5092_v5, %s5691_s8 }
 0x79c   : > { %2973 = vrot.lane.b32.xlu0 %v5093_v18, %s5691_s8  ;;  %v5096_v22 = vpop.f32.mrb[28].mxu0  ;;  %v8930_v18 = vmax.f32 %v8929_v16, -1e+28  ;;  %v2694_v16 = vld [vmem:[#allocation4] sm:$0xff] }
 0x79d   : > { %v2920_v2 = vpop.f32.mrb[29].mxu0 }
 0x79e   : > { %2975 = vrot.lane.b32.xlu1 %v2920_v2, %s5691_s8  ;;  %v5097_v39 = vpop.f32.mrb[30].mxu0 }
 0x79f   : > { %v2923_v43 = vpop.f32.mrb[31].mxu0 }
 0x7a0   : > { %2977 = vrot.lane.b32.xlu0 %v2923_v43, %s5691_s8  ;;  %v8932_v43 = vld [vmem:[#allocation16_spill] sm:$0xff] }
 0x7a2   : > { %2979 = vrot.lane.b32.xlu1 %v5096_v22, %s5691_s8  ;;  %v8931_v22 = vld [vmem:[#allocation61_spill] sm:$0xff] }
 0x7a3   : > { %v3256_v2 = vmax.f32 %v8931_v22, -1e+28 }
 0x7a4   : > { %2981 = vrot.lane.b32.xlu0 %v5097_v39, %s5691_s8 }
 0x7aa   : > { %v7861_v62 = vpop.f32.mrb[16].mxu1 }
 0x7ab   : > { %v7863_v33 = vpop.f32.mrb[17].mxu1 }
 0x7ac   : > { %v7865_v10 = vpop.f32.mrb[18].mxu1 }
 0x7ad   : > { %v7867_v61 = vpop.f32.mrb[19].mxu1 }
 0x7b2   : > { %v7869_v9 = vpop.f32.mrb[20].mxu1 }
 0x7b3   : > { %v7871_v6 = vpop.f32.mrb[21].mxu1 }
 0x7b4   : > { %v7873_v56 = vpop.f32.mrb[22].mxu1 }
 0x7b5   : > { %v7875_v7 = vpop.f32.mrb[23].mxu1 }
 0x7ba   : > { %v7879_v36 = vpop.f32.mrb[24].mxu1 }
 0x7bb   : > { %v7881_v51 = vpop.f32.mrb[25].mxu1 }
 0x7bc   : > { %v7883_v19 = vpop.f32.mrb[26].mxu1 }
 0x7bd   : > { %v7885_v54 = vpop.f32.mrb[27].mxu1 }
 0x7c2   : > { %v7889_v40 = vpop.f32.mrb[28].mxu1 }
 0x7c3   : > { %3486 = vadd.xlane.f32.xlu0 %v7702_v63  ;;  %v7892_v50 = vpop.f32.mrb[29].mxu1  ;;  %v7908_v63 = vpop.permute.xlu1 %2737 }
 0x7c4   : > { %v7896_v42 = vpop.f32.mrb[30].mxu1 }
 0x7c5   : > { %v7898_v35 = vpop.f32.mrb[31].mxu1 }
 0x7c6   : > { %3484 = vadd.xlane.f32.xlu1 %v7699_v3  ;;  %v3244_v3 = vmax.f32 %v7396_v38, -1e+28 }
 0x7c7   : > { %3488 = vadd.xlane.f32.xlu0 %v7793_v0  ;;  %v7912_v53 = vpop.permute.xlu1 %2742  ;;  %v3246_v0 = vmax.f32 %v7414_v32, -1e+28  ;;  %v8920_v32 = vmax.f32 %v7429_v14, -1e+28  ;;  %v3249_v14 = vmax.f32 %v8926_v4, -1e+28 }
 0x7c9   : > { %v3281_v59 = vsub.f32 %v3249_v14, %v8930_v18 }
 0x7ca   : > { %3492 = vadd.xlane.f32.xlu1 %v7786_v11 }
 0x7cb   : > { %3490 = vadd.xlane.f32.xlu0 %v7784_v23  ;;  %v8918_v23 = vmax.f32 %v7399_v52, -1e+28  ;;  %v3245_v52 = vmax.f32 %v7404_v29, -1e+28 }
 0x7cd   : > { %v3276_v11 = vsub.f32 %v3244_v3, %v8918_v23  ;;  %v3250_v3 = vmax.f32 %v8932_v43, -1e+28  ;;  %v8944_v43 = vld [vmem:[#allocation56_spill] sm:$0xff] }
 0x7ce   : > { %3496 = vadd.xlane.f32.xlu1 %v7805_v49  ;;  %v8919_v49 = vmax.f32 %v7417_v27, -1e+28  ;;  %v8922_v27 = vld [vmem:[#allocation21_spill] sm:$0xff] }
 0x7cf   : > { %3494 = vadd.xlane.f32.xlu0 %v7789_v28  ;;  %v7921_v28 = vpop.permute.xlu1 %2747  ;;  %v3248_v26 = vmax.f32 %v8922_v27, -1e+28  ;;  %v8938_v27 = vld [vmem:[#allocation20_spill] sm:$0xff] }
 0x7d0   : > { %v3278_v38 = vsub.f32 %v3246_v0, %v8919_v49 }
 0x7d1   : > { %v3280_v34 = vsub.f32 %v3248_v26, %v8924_v12  ;;  %v3251_v26 = vmax.f32 %v8938_v27, -1e+28  ;;  %v8940_v12 = vmax.f32 %v8939_v48, -1e+28 }
 0x7d2   : > { %3500 = vadd.xlane.f32.xlu1 %v7803_v15  ;;  %v3292_v15 = vmul.f32 1.442695, %v3276_v11  ;;  %v8933_v11 = vld [vmem:[#allocation62_spill] sm:$0xff] }
 0x7d3   : > { %3498 = vadd.xlane.f32.xlu0 %v7800_v60  ;;  %v2713_v60 = vpop.permute.xlu0 %2712  ;;  %v8934_v0 = vmax.f32 %v8933_v11, -1e+28  ;;  %v2695_v11 = vld [vmem:[#allocation4 + $0x8] sm:$0xff] }
 0x7d4   : > { %5451 = vpow2.f32 %v3292_v15 }
 0x7d5   : > { %v3288_v15 = vsub.f32 %v3256_v2, %v8934_v0 }
 0x7d6   : > { %3504 = vadd.xlane.f32.xlu1 %v7813_v31  ;;  %v7929_v31 = vpop.permute.xlu1 %2752 }
 0x7d7   : > { %3502 = vadd.xlane.f32.xlu0 %v7807_v20  ;;  %v3247_v20 = vmax.f32 %v7426_v30, -1e+28 }
 0x7da   : > { %3508 = vadd.xlane.f32.xlu1 %v7815_v45  ;;  %v3296_v45 = vmul.f32 1.442695, %v3278_v38  ;;  %v7943_v37 = vpop.permute.xlu1 %2762  ;;  %v3302_v38 = vmul.f32 1.442695, %v3281_v59  ;;  %v2790_v59 = vmul.f32 %v2713_v60, %v2694_v16  ;;  %v8946_v60 = vld [vmem:[#allocation49_spill] sm:$0xff] }
 0x7db   : > { %3506 = vadd.xlane.f32.xlu0 %v7817_v21  ;;  %v3279_v21 = vsub.f32 %v3247_v20, %v8920_v32  ;;  %v8935_v20 = vld [vmem:[#allocation18_spill] sm:$0xff]  ;;  %v8937_v32 = vld [vmem:[#allocation63_spill] sm:$0xff] }
 0x7dc   : > { %5453 = vpow2.f32 %v3296_v45 }
 0x7dd   : > { %v3298_v30 = vmul.f32 1.442695, %v3279_v21  ;;  %v3258_v21 = vmax.f32 %v8937_v32, -1e+28 }
 0x7de   : > { %3512 = vadd.xlane.f32.xlu1 %v7825_v57  ;;  %v7935_v57 = vpop.permute.xlu0 %2757  ;;  %v7953_v39 = vpop.eup %5451 }
 0x7df   : > { %3510 = vadd.xlane.f32.xlu0 %v7819_v13  ;;  %v8921_v13 = vmax.f32 %v7407_v25, -1e+28  ;;  %5455 = vpow2.f32 %v3298_v30  ;;  %v3300_v25 = vmul.f32 1.442695, %v3280_v34  ;;  %v7958_v49 = vpop.permute.xlu1 %2772  ;;  %v3316_v30 = vmul.f32 1.442695, %v3288_v15 }
 0x7e0   : > { %v3290_v34 = vsub.f32 %v3258_v21, %v8940_v12  ;;  %v2791_v15 = vmul.f32 %v7877_v46, %v2695_v11  ;;  %v8947_v46 = vld [vmem:[#allocation50_spill] sm:$0xff]  ;;  %v2699_v11 = vld [vmem:[#allocation4 + $0x28] sm:$0xff] }
 0x7e1   : > { %v3277_v41 = vsub.f32 %v3245_v52, %v8921_v13  ;;  %v8936_v52 = vmax.f32 %v8935_v20, -1e+28 }
 0x7e2   : > { %v7948_v5 = vpop.permute.xlu0 %2767 }
 0x7e3   : > { %3514 = vadd.xlane.f32.xlu0 %v7827_v24  ;;  %v8925_v24 = vld [vmem:[#allocation57_spill] sm:$0xff]  ;;  %v3294_v29 = vmul.f32 1.442695, %v3277_v41  ;;  %v3282_v45 = vsub.f32 %v3250_v3, %v8936_v52  ;;  %v7974_v14 = vpop.permute.xlu1 %2782  ;;  %v8945_v3 = vmax.f32 %v8944_v43, -1e+28  ;;  %v8950_v43 = vld [vmem:[#allocation52_spill] sm:$0xff] }
 0x7e4   : > { %v3254_v47 = vmax.f32 %v8925_v24, -1e+28  ;;  %v3253_v52 = vmax.f32 %v8946_v60, -1e+28  ;;  %v8952_v60 = vld [vmem:[#allocation53_spill] sm:$0xff] }
 0x7e5   : > { %5457 = vpow2.f32 %v3294_v29  ;;  %v3304_v24 = vmul.f32 1.442695, %v3282_v45  ;;  %v2696_v45 = vld [vmem:[#allocation4 + $0x10] sm:$0xff] }
 0x7e6   : > { %v3286_v58 = vsub.f32 %v3254_v47, %v8928_v44  ;;  %5459 = vpow2.f32 %v3300_v25  ;;  %v7964_v13 = vpop.permute.xlu0 %2777  ;;  %v7966_v41 = vpop.eup %5453  ;;  %v8941_v47 = vld [vmem:[#allocation48_spill] sm:$0xff]  ;;  %v8943_v44 = vld [vmem:[#allocation55_spill] sm:$0xff]  ;;  %v3320_v25 = vmul.f32 1.442695, %v3290_v34  ;;  %v2792_v21 = vmul.f32 %v7887_v17, %v2696_v45  ;;  %v2697_v34 = vld [vmem:[#allocation4 + $0x18] sm:$0xff] }
 0x7e7   : > { %v8942_v29 = vmax.f32 %v8941_v47, -1e+28  ;;  %v2793_v47 = vmul.f32 %v7894_v1, %v2697_v34  ;;  %v2700_v45 = vld [vmem:[#allocation4 + $0x30] sm:$0xff]  ;;  %v2701_v34 = vld [vmem:[#allocation4 + $0x38] sm:$0xff] }
 0x7e8   : > { %v3312_v23 = vmul.f32 1.442695, %v3286_v58  ;;  %v3252_v58 = vmax.f32 %v8943_v44, -1e+28 }
 0x7e9   : > { %v3283_v4 = vsub.f32 %v3251_v26, %v8942_v29  ;;  %v7976_v55 = vpop.eup %5455 }
 0x7ea   : > { %5461 = vpow2.f32 %v3312_v23  ;;  %v7979_v18 = vpop.permute.xlu0 %2787  ;;  %v3284_v23 = vsub.f32 %v3252_v58, %v8945_v3  ;;  %v2698_v58 = vld [vmem:[#allocation4 + $0x20] sm:$0xff]  ;;  %v8951_v3 = vmax.f32 %v8950_v43, -1e+28 }
 0x7eb   : > { %5463 = vpow2.f32 %v3302_v38  ;;  %v3306_v2 = vmul.f32 1.442695, %v3283_v4  ;;  %v8949_v4 = vld [vmem:[#allocation51_spill] sm:$0xff]  ;;  %v2794_v16 = vmul.f32 %v7902_v8, %v2698_v58  ;;  %v2702_v58 = vld [vmem:[#allocation4 + $0x40] sm:$0xff] }
 0x7ec   : > { %5465 = vpow2.f32 %v3316_v30  ;;  %v8948_v30 = vmax.f32 %v8947_v46, -1e+28  ;;  %v3308_v12 = vmul.f32 1.442695, %v3284_v23  ;;  %v3255_v44 = vmax.f32 %v8949_v4, -1e+28 }
 0x7ed   : > { %5467 = vpow2.f32 %v3304_v24  ;;  %v8955_v4 = vld [vmem:[#allocation59_spill] sm:$0xff] }
 0x7ee   : > { %5469 = vpow2.f32 %v3320_v25  ;;  %v3285_v48 = vsub.f32 %v3253_v52, %v8948_v30  ;;  %v3287_v23 = vsub.f32 %v3255_v44, %v8951_v3  ;;  %v3257_v52 = vmax.f32 %v8952_v60, -1e+28  ;;  %v8953_v30 = vld [vmem:[#allocation54_spill] sm:$0xff] }
 0x7ef   : > { %3567 = vperm.xlu1 %5217, %v7953_v39   ;;  %v7982_v22 = vpop.eup %5457  ;;  %5471 = vpow2.f32 %v3306_v2  ;;  %v3259_v44 = vmax.f32 %v8955_v4, -1e+28 }
 0x7f0   : > { %v7988_v20 = vpop.eup %5459  ;;  %v3310_v1 = vmul.f32 1.442695, %v3285_v48  ;;  %5473 = vpow2.f32 %v3308_v12  ;;  %v8954_v48 = vmax.f32 %v8953_v30, -1e+28 }
 0x7f2   : > { %5475 = vpow2.f32 %v3310_v1  ;;  %v3289_v12 = vsub.f32 %v3257_v52, %v8954_v48  ;;  %v8956_v1 = vld [vmem:[#allocation60_spill] sm:$0xff] }
 0x7f3   : > { %3577 = vperm.xlu1 %5217, %v7966_v41   ;;  %v8957_v43 = vmax.f32 %v8956_v1, -1e+28 }
 0x7f4   : > { %v7994_v26 = vpop.eup %5461 }
 0x7f5   : > { %v8001_v17 = vpop.eup %5463  ;;  %v3291_v3 = vsub.f32 %v3259_v44, %v8957_v43 }
 0x7f6   : > { %v8007_v2 = vpop.eup %5465 }
 0x7f7   : > { %3582 = vperm.xlu1 %5217, %v7976_v55   ;;  %v8014_v8 = vpop.eup %5467 }
 0x7f8   : > { %v2952_v0 = vpop.permute.xlu1 %2951  ;;  %v8020_v46 = vpop.eup %5469 }
 0x7f9   : > { %v2999_v38 = vadd.f32 %v2952_v0, %v2790_v59  ;;  %3572 = vperm.xlu0 %5218, %v7982_v22  }
 0x7fa   : > { %v2954_v32 = vpop.permute.xlu0 %2953 }
 0x7fb   : > { %3016 = vst.msk [vmem:[#allocation4] sm:$0xff] %vm3015_vm8, %v2999_v38  ;;  %v3000_v27 = vadd.f32 %v2954_v32, %v2791_v15  ;;  %3587 = vperm.xlu1 %5217, %v7988_v20   ;;  %v2795_v15 = vmul.f32 %v7908_v63, %v2699_v11  ;;  %v3314_v63 = vmul.f32 1.442695, %v3287_v23  ;;  %v2703_v23 = vld [vmem:[#allocation4 + $0x48] sm:$0xff] }
 0x7fc   : > { %v2956_v24 = vpop.permute.xlu1 %2955 }
 0x7fd   : > { %3017 = vst.msk [vmem:[#allocation4 + $0x8] sm:$0xff] %vm3015_vm8, %v3000_v27  ;;  %v3001_v29 = vadd.f32 %v2956_v24, %v2792_v21  ;;  %3617 = vperm.xlu0 %5218, %v7994_v26   ;;  %v2796_v21 = vmul.f32 %v7912_v53, %v2700_v45  ;;  %v8027_v53 = vpop.eup %5471  ;;  %5477 = vpow2.f32 %v3314_v63 }
 0x7fe   : > { %v2958_v25 = vpop.permute.xlu0 %2957 }
 0x7ff   : > { %3018 = vst.msk [vmem:[#allocation4 + $0x10] sm:$0xff] %vm3015_vm8, %v3001_v29  ;;  %v3002_v59 = vadd.f32 %v2958_v25, %v2793_v47  ;;  %3592 = vperm.xlu1 %5217, %v8001_v17   ;;  %v2797_v47 = vmul.f32 %v7921_v28, %v2701_v34  ;;  %v3318_v28 = vmul.f32 1.442695, %v3289_v12  ;;  %v2707_v34 = vld [vmem:[#allocation4 + $0x68] sm:$0xff] }
 0x800   : > { %v2960_v0 = vpop.permute.xlu1 %2959 }
 0x801   : > { %3019 = vst.msk [vmem:[#allocation4 + $0x18] sm:$0xff] %vm3015_vm8, %v3002_v59  ;;  %v3003_v38 = vadd.f32 %v2960_v0, %v2794_v16  ;;  %3627 = vperm.xlu0 %5218, %v8007_v2   ;;  %v2798_v16 = vmul.f32 %v7929_v31, %v2702_v58  ;;  %v2799_v0 = vmul.f32 %v7935_v57, %v2703_v23  ;;  %v8039_v31 = vpop.eup %5473  ;;  %5479 = vpow2.f32 %v3318_v28  ;;  %v2709_v58 = vld [vmem:[#allocation4 + $0x78] sm:$0xff] }
 0x802   : > { %v2962_v32 = vpop.permute.xlu0 %2961  ;;  %v3322_v57 = vmul.f32 1.442695, %v3291_v3  ;;  %v8048_v63 = vpop.eup %5475  ;;  %v3455_v28 = vld [vmem:[#allocation3 + $0x18] sm:$0xff] }
 0x803   : > { %3020 = vst.msk [vmem:[#allocation4 + $0x20] sm:$0xff] %vm3015_vm8, %v3003_v38  ;;  %v3004_v27 = vadd.f32 %v2962_v32, %v2795_v15  ;;  %3597 = vperm.xlu1 %5217, %v8014_v8   ;;  %v2704_v38 = vld [vmem:[#allocation4 + $0x50] sm:$0xff]  ;;  %v2705_v32 = vld [vmem:[#allocation4 + $0x58] sm:$0xff]  ;;  %v3471_v43 = vmul.f32 %v7976_v55, %v3455_v28 }
 0x804   : > { %v2964_v24 = vpop.permute.xlu1 %2963  ;;  %v2800_v52 = vmul.f32 %v7943_v37, %v2704_v38  ;;  %v2706_v37 = vld [vmem:[#allocation4 + $0x60] sm:$0xff]  ;;  %5481 = vpow2.f32 %v3322_v57 }
 0x805   : > { %3021 = vst.msk [vmem:[#allocation4 + $0x28] sm:$0xff] %vm3015_vm8, %v3004_v27  ;;  %v3005_v29 = vadd.f32 %v2964_v24, %v2796_v21  ;;  %3637 = vperm.xlu0 %5218, %v8020_v46   ;;  %v2801_v27 = vmul.f32 %v7948_v5, %v2705_v32  ;;  %v2802_v48 = vmul.f32 %v7958_v49, %v2706_v37  ;;  %v3461_v37 = vld [vmem:[#allocation3 + $0x48] sm:$0xff] }
 0x806   : > { %v2966_v25 = vpop.permute.xlu0 %2965  ;;  %v2803_v24 = vmul.f32 %v7964_v13, %v2707_v34  ;;  %v2805_v13 = vmul.f32 %v7979_v18, %v2709_v58  ;;  %v3465_v58 = vld [vmem:[#allocation3 + $0x68] sm:$0xff] }
 0x807   : > { %3022 = vst.msk [vmem:[#allocation4 + $0x30] sm:$0xff] %vm3015_vm8, %v3005_v29  ;;  %v3006_v59 = vadd.f32 %v2966_v25, %v2797_v47  ;;  %3602 = vperm.xlu1 %5217, %v8027_v53   ;;  %v2708_v29 = vld [vmem:[#allocation4 + $0x70] sm:$0xff] }
 0x808   : > { %v2968_v11 = vpop.permute.xlu1 %2967  ;;  %v2804_v4 = vmul.f32 %v7974_v14, %v2708_v29 }
 0x809   : > { %3023 = vst.msk [vmem:[#allocation4 + $0x38] sm:$0xff] %vm3015_vm8, %v3006_v59  ;;  %v3007_v15 = vadd.f32 %v2968_v11, %v2798_v16  ;;  %3806 = vrot.lane.b32.xlu0 %v7863_v33, %s5692_s9  ;;  %v3457_v11 = vld [vmem:[#allocation3 + $0x28] sm:$0xff] }
 0x80a   : > { %v2970_v60 = vpop.permute.xlu0 %2969  ;;  %v3473_v38 = vmul.f32 %v8001_v17, %v3457_v11  ;;  %v3553_v11 = vld [vmem:[#allocation4 + $0x20] sm:$0xff] }
 0x80b   : > { %3024 = vst.msk [vmem:[#allocation4 + $0x40] sm:$0xff] %vm3015_vm8, %v3007_v15  ;;  %v3008_v45 = vadd.f32 %v2970_v60, %v2799_v0  ;;  %3607 = vperm.xlu1 %5217, %v8039_v31  }
 0x80c   : > { %v2972_v21 = vpop.permute.xlu1 %2971 }
 0x80d   : > { %3025 = vst.msk [vmem:[#allocation4 + $0x48] sm:$0xff] %vm3015_vm8, %v3008_v45  ;;  %v3009_v33 = vadd.f32 %v2972_v21, %v2800_v52  ;;  %3810 = vrot.lane.b32.xlu0 %v7861_v62, %s5692_s9  ;;  %v8057_v62 = vpop.eup %5477  ;;  %v3459_v45 = vld [vmem:[#allocation3 + $0x38] sm:$0xff] }
 0x80e   : > { %v2974_v30 = vpop.permute.xlu0 %2973  ;;  %v3475_v21 = vmul.f32 %v8027_v53, %v3459_v45 }
 0x80f   : > { %3026 = vst.msk [vmem:[#allocation4 + $0x50] sm:$0xff] %vm3015_vm8, %v3009_v33  ;;  %v3010_v12 = vadd.f32 %v2974_v30, %v2801_v27  ;;  %3612 = vperm.xlu1 %5217, %v8048_v63  }
 0x810   : > { %v2976_v5 = vpop.permute.xlu1 %2975 }
 0x811   : > { %3027 = vst.msk [vmem:[#allocation4 + $0x58] sm:$0xff] %vm3015_vm8, %v3010_v12  ;;  %v3011_v47 = vadd.f32 %v2976_v5, %v2802_v48  ;;  %3814 = vrot.lane.b32.xlu0 %v7871_v6, %s5692_s9  ;;  %v8066_v6 = vpop.eup %5479  ;;  %v3477_v12 = vmul.f32 %v8048_v63, %v3461_v37 }
 0x812   : > { %v2978_v49 = vpop.permute.xlu0 %2977  ;;  %v8073_v18 = vpop.eup %5481 }
 0x813   : > { %3028 = vst.msk [vmem:[#allocation4 + $0x60] sm:$0xff] %vm3015_vm8, %v3011_v47  ;;  %v3012_v44 = vadd.f32 %v2978_v49, %v2803_v24  ;;  %3622 = vperm.xlu1 %5217, %v8057_v62   ;;  %v3463_v24 = vld [vmem:[#allocation3 + $0x58] sm:$0xff] }
 0x814   : > { %v2980_v25 = vpop.permute.xlu1 %2979  ;;  %v3479_v49 = vmul.f32 %v8057_v62, %v3463_v24 }
 0x815   : > { %3029 = vst.msk [vmem:[#allocation4 + $0x68] sm:$0xff] %vm3015_vm8, %v3012_v44  ;;  %v3013_v16 = vadd.f32 %v2980_v25, %v2804_v4  ;;  %3818 = vrot.lane.b32.xlu0 %v7869_v9, %s5692_s9 }
 0x816   : > { %v2982_v59 = vpop.permute.xlu0 %2981 }
 0x817   : > { %3030 = vst.msk [vmem:[#allocation4 + $0x70] sm:$0xff] %vm3015_vm8, %v3013_v16  ;;  %v3014_v14 = vadd.f32 %v2982_v59, %v2805_v13  ;;  %3632 = vperm.xlu1 %5217, %v8066_v6   ;;  %v3481_v16 = vmul.f32 %v8066_v6, %v3465_v58 }
 0x819   : > { %3031 = vst.msk [vmem:[#allocation4 + $0x78] sm:$0xff] %vm3015_vm8, %v3014_v14  ;;  %3822 = vrot.lane.b32.xlu0 %v7881_v51, %s5692_s9  ;;  %v3452_v51 = vld [vmem:[#allocation3] sm:$0xff]  ;;  %v3467_v14 = vld [vmem:[#allocation3 + $0x78] sm:$0xff] }
 0x81b   : > { %3642 = vperm.xlu1 %5217, %v8073_v18  }
 0x81d   : > { %3826 = vrot.lane.b32.xlu0 %v7879_v36, %s5692_s9 }
 0x81f   : > { %3808 = vrot.lane.b32.xlu1 %v7867_v61, %s5692_s9 }
 0x821   : > { %3830 = vrot.lane.b32.xlu0 %v7892_v50, %s5692_s9 }
 0x823   : > { %3812 = vrot.lane.b32.xlu1 %v7865_v10, %s5692_s9  ;;  %v3453_v10 = vld [vmem:[#allocation3 + $0x8] sm:$0xff] }
 0x824   : > { %v3469_v61 = vmul.f32 %v7982_v22, %v3453_v10 }
 0x825   : > { %3834 = vrot.lane.b32.xlu0 %v7889_v40, %s5692_s9  ;;  %v3456_v40 = vld [vmem:[#allocation3 + $0x20] sm:$0xff] }
 0x827   : > { %3816 = vrot.lane.b32.xlu1 %v7875_v7, %s5692_s9  ;;  %v3454_v7 = vld [vmem:[#allocation3 + $0x10] sm:$0xff] }
 0x82b   : > { %3820 = vrot.lane.b32.xlu1 %v7873_v56, %s5692_s9  ;;  %v3468_v56 = vmul.f32 %v7953_v39, %v3452_v51  ;;  %v3458_v39 = vld [vmem:[#allocation3 + $0x30] sm:$0xff] }
 0x82f   : > { %3824 = vrot.lane.b32.xlu1 %v7885_v54, %s5692_s9 }
 0x833   : > { %3828 = vrot.lane.b32.xlu1 %v7883_v19, %s5692_s9  ;;  %v3470_v19 = vmul.f32 %v7966_v41, %v3454_v7  ;;  %v3474_v41 = vmul.f32 %v8014_v8, %v3458_v39  ;;  %v3462_v8 = vld [vmem:[#allocation3 + $0x50] sm:$0xff] }
 0x834   : > { %v3478_v17 = vmul.f32 %v7994_v26, %v3462_v8  ;;  %v3466_v26 = vld [vmem:[#allocation3 + $0x70] sm:$0xff] }
 0x835   : > { %v3482_v63 = vmul.f32 %v8020_v46, %v3466_v26 }
 0x837   : > { %3832 = vrot.lane.b32.xlu1 %v7898_v35, %s5692_s9 }
 0x83b   : > { %3836 = vrot.lane.b32.xlu1 %v7896_v42, %s5692_s9  ;;  %v3472_v42 = vmul.f32 %v7988_v20, %v3456_v40  ;;  %v3460_v20 = vld [vmem:[#allocation3 + $0x40] sm:$0xff] }
 0x83c   : > { %v3476_v55 = vmul.f32 %v8039_v31, %v3460_v20  ;;  %v3464_v31 = vld [vmem:[#allocation3 + $0x60] sm:$0xff]  ;;  %v3555_v20 = vld [vmem:[#allocation4 + $0x30] sm:$0xff] }
 0x83d   : > { %v3480_v53 = vmul.f32 %v8007_v2, %v3464_v31 }
 0x850   : > { %v3487_v9 = vpop.xlane.xlu0 %3486 }
 0x851   : > { %v3517_v36 = vadd.f32 %v3487_v9, %v3469_v61  ;;  %v3483_v61 = vmul.f32 %v8073_v18, %v3467_v14  ;;  %v3551_v18 = vld [vmem:[#allocation4 + $0x10] sm:$0xff] }
 0x853   : > { %3534 = vst.msk [vmem:[#allocation3 + $0x8] sm:$0xff] %vm3532_vm7, %v3517_v36  ;;  %v3485_v54 = vpop.xlane.xlu1 %3484 }
 0x854   : > { %v3516_v50 = vadd.f32 %v3485_v54, %v3468_v56  ;;  %v3489_v35 = vpop.xlane.xlu0 %3488 }
 0x855   : > { %v3518_v1 = vadd.f32 %v3489_v35, %v3470_v19  ;;  %v3549_v35 = vld [vmem:[#allocation4] sm:$0xff] }
 0x856   : > { %3533 = vst.msk [vmem:[#allocation3] sm:$0xff] %vm3532_vm7, %v3516_v50 }
 0x857   : > { %3535 = vst.msk [vmem:[#allocation3 + $0x10] sm:$0xff] %vm3532_vm7, %v3518_v1  ;;  %v3493_v22 = vpop.xlane.xlu1 %3492 }
 0x858   : > { %v3520_v3 = vadd.f32 %v3493_v22, %v3472_v42  ;;  %v3491_v23 = vpop.xlane.xlu0 %3490 }
 0x859   : > { %v3519_v0 = vadd.f32 %v3491_v23, %v3471_v43 }
 0x85a   : > { %3537 = vst.msk [vmem:[#allocation3 + $0x20] sm:$0xff] %vm3532_vm7, %v3520_v3 }
 0x85b   : > { %3536 = vst.msk [vmem:[#allocation3 + $0x18] sm:$0xff] %vm3532_vm7, %v3519_v0  ;;  %v3497_v15 = vpop.xlane.xlu1 %3496 }
 0x85c   : > { %v3522_v60 = vadd.f32 %v3497_v15, %v3474_v41  ;;  %v3495_v52 = vpop.xlane.xlu0 %3494 }
 0x85d   : > { %v3521_v57 = vadd.f32 %v3495_v52, %v3473_v38 }
 0x85e   : > { %3539 = vst.msk [vmem:[#allocation3 + $0x30] sm:$0xff] %vm3532_vm7, %v3522_v60 }
 0x85f   : > { %3538 = vst.msk [vmem:[#allocation3 + $0x28] sm:$0xff] %vm3532_vm7, %v3521_v57  ;;  %v3501_v32 = vpop.xlane.xlu1 %3500 }
 0x860   : > { %v3524_v27 = vadd.f32 %v3501_v32, %v3476_v55  ;;  %v3499_v33 = vpop.xlane.xlu0 %3498  ;;  %v3557_v55 = vld [vmem:[#allocation4 + $0x40] sm:$0xff] }
 0x861   : > { %v3523_v30 = vadd.f32 %v3499_v33, %v3475_v21  ;;  %v3559_v33 = vld [vmem:[#allocation4 + $0x50] sm:$0xff] }
 0x862   : > { %3541 = vst.msk [vmem:[#allocation3 + $0x40] sm:$0xff] %vm3532_vm7, %v3524_v27 }
 0x863   : > { %3540 = vst.msk [vmem:[#allocation3 + $0x38] sm:$0xff] %vm3532_vm7, %v3523_v30  ;;  %v3505_v48 = vpop.xlane.xlu1 %3504 }
 0x864   : > { %v3526_v34 = vadd.f32 %v3505_v48, %v3478_v17  ;;  %v3503_v5 = vpop.xlane.xlu0 %3502  ;;  %v3550_v48 = vld [vmem:[#allocation4 + $0x8] sm:$0xff] }
 0x865   : > { %v3525_v47 = vadd.f32 %v3503_v5, %v3477_v12 }
 0x866   : > { %3543 = vst.msk [vmem:[#allocation3 + $0x50] sm:$0xff] %vm3532_vm7, %v3526_v34  ;;  %v3561_v34 = vld [vmem:[#allocation4 + $0x60] sm:$0xff] }
 0x867   : > { %3542 = vst.msk [vmem:[#allocation3 + $0x48] sm:$0xff] %vm3532_vm7, %v3525_v47  ;;  %v3509_v29 = vpop.xlane.xlu1 %3508 }
 0x868   : > { %v3528_v4 = vadd.f32 %v3509_v29, %v3480_v53  ;;  %v3507_v44 = vpop.xlane.xlu0 %3506  ;;  %v3552_v29 = vld [vmem:[#allocation4 + $0x18] sm:$0xff] }
 0x869   : > { %v3527_v25 = vadd.f32 %v3507_v44, %v3479_v49 }
 0x86a   : > { %3545 = vst.msk [vmem:[#allocation3 + $0x60] sm:$0xff] %vm3532_vm7, %v3528_v4  ;;  %v3563_v4 = vld [vmem:[#allocation4 + $0x70] sm:$0xff] }
 0x86b   : > { %3544 = vst.msk [vmem:[#allocation3 + $0x58] sm:$0xff] %vm3532_vm7, %v3527_v25  ;;  %v3513_v13 = vpop.xlane.xlu1 %3512 }
 0x86c   : > { %v3530_v2 = vadd.f32 %v3513_v13, %v3482_v63  ;;  %v3511_v59 = vpop.xlane.xlu0 %3510  ;;  %v3554_v13 = vld [vmem:[#allocation4 + $0x28] sm:$0xff] }
 0x86d   : > { %v3529_v10 = vadd.f32 %v3511_v59, %v3481_v16 }
 0x86e   : > { %3547 = vst.msk [vmem:[#allocation3 + $0x70] sm:$0xff] %vm3532_vm7, %v3530_v2 }
 0x86f   : > { %3546 = vst.msk [vmem:[#allocation3 + $0x68] sm:$0xff] %vm3532_vm7, %v3529_v10  ;;  %v3568_v62 = vpop.permute.xlu1 %3567  ;;  %v3556_v10 = vld [vmem:[#allocation4 + $0x38] sm:$0xff] }
 0x870   : > { %v3515_v9 = vpop.xlane.xlu0 %3514  ;;  %v3645_v28 = vmul.f32 %v3568_v62, %v3549_v35 }
 0x871   : > { %v3531_v7 = vadd.f32 %v3515_v9, %v3483_v61 }
 0x873   : > { %3548 = vst.msk [vmem:[#allocation3 + $0x78] sm:$0xff] %vm3532_vm7, %v3531_v7  ;;  %v3578_v46 = vpop.permute.xlu1 %3577  ;;  %v3558_v7 = vld [vmem:[#allocation4 + $0x48] sm:$0xff] }
 0x874   : > { %v3647_v43 = vmul.f32 %v3578_v46, %v3551_v18 }
 0x877   : > { %v3583_v36 = vpop.permute.xlu1 %3582 }
 0x878   : > { %v3573_v51 = vpop.permute.xlu0 %3572  ;;  %v3648_v26 = vmul.f32 %v3583_v36, %v3552_v29 }
 0x879   : > { %v3646_v31 = vmul.f32 %v3573_v51, %v3550_v48 }
 0x87b   : > { %v3588_v56 = vpop.permute.xlu1 %3587 }
 0x87c   : > { %v3618_v6 = vpop.permute.xlu0 %3617  ;;  %v3649_v0 = vmul.f32 %v3588_v56, %v3553_v11  ;;  %v3560_v56 = vld [vmem:[#allocation4 + $0x58] sm:$0xff]  ;;  %v3908_v11 = vld [vmem:[#allocation3 + $0x8] sm:$0xff] (!%p4869_p0) }
 0x87d   : > { %v3655_v37 = vmul.f32 %v3618_v6, %v3559_v33  ;;  %vm3924_vm13 = vcmp.eq.f32.partialorder (!%p4869_p0), %v3908_v11, 0.0  ;;  %v3918_v33 = vld [vmem:[#allocation3 + $0x58] sm:$0xff] (!%p4869_p0) }
 0x87e   : > { %vm3934_vm5 = vcmp.eq.f32.partialorder (!%p4869_p0), %v3918_v33, 0.0 }
 0x87f   : > { %v3593_v54 = vpop.permute.xlu1 %3592 }
 0x880   : > { %v3628_v19 = vpop.permute.xlu0 %3627  ;;  %v3650_v2 = vmul.f32 %v3593_v54, %v3554_v13 }
 0x881   : > { %v3657_v5 = vmul.f32 %v3628_v19, %v3561_v34 }
 0x883   : > { %v3598_v40 = vpop.permute.xlu1 %3597 }
 0x884   : > { %v3638_v50 = vpop.permute.xlu0 %3637  ;;  %v3651_v60 = vmul.f32 %v3598_v40, %v3555_v20  ;;  %v3562_v40 = vld [vmem:[#allocation4 + $0x68] sm:$0xff] }
 0x885   : > { %v3659_v44 = vmul.f32 %v3638_v50, %v3563_v4  ;;  %v3921_v4 = vld [vmem:[#allocation3 + $0x70] sm:$0xff] (!%p4869_p0) }
 0x887   : > { %v3603_v1 = vpop.permute.xlu1 %3602 }
 0x888   : > { %v3807_v42 = vpop.permute.xlu0 %3806  ;;  %v3652_v62 = vmul.f32 %v3603_v1, %v3556_v10  ;;  %v3564_v1 = vld [vmem:[#allocation4 + $0x78] sm:$0xff] }
 0x889   : > { %v3854_v22 = vadd.f32 %v3807_v42, %v3645_v28 }
 0x88b   : > { %3871 = vst.msk [vmem:[#allocation4] sm:$0xff] %vm3870_vm9, %v3854_v22  ;;  %v3608_v39 = vpop.permute.xlu1 %3607 }
 0x88c   : > { %v3811_v3 = vpop.permute.xlu0 %3810  ;;  %v3653_v32 = vmul.f32 %v3608_v39, %v3557_v55  ;;  %v3907_v39 = vld [vmem:[#allocation3] sm:$0xff] (!%p4869_p0) }
 0x88d   : > { %v3856_v23 = vadd.f32 %v3811_v3, %v3647_v43  ;;  %v3909_v43 = vld [vmem:[#allocation3 + $0x10] sm:$0xff] (!%p4869_p0)  ;;  %v3910_v3 = vld [vmem:[#allocation3 + $0x18] sm:$0xff] (!%p4869_p0)  ;;  %vm3923_vm11 = vcmp.eq.f32.partialorder (!%p4869_p0), %v3907_v39, 0.0 }
 0x88e   : > { %vm3925_vm10 = vcmp.eq.f32.partialorder (!%p4869_p0), %v3909_v43, 0.0  ;;  %vm3926_vm12 = vcmp.eq.f32.partialorder (!%p4869_p0), %v3910_v3, 0.0 }
 0x88f   : > { %3873 = vst.msk [vmem:[#allocation4 + $0x10] sm:$0xff] %vm3870_vm9, %v3856_v23  ;;  %v3613_v41 = vpop.permute.xlu1 %3612  ;;  %v5693_v23 = vmov (!%p4869_p0), 0   ;;  %v3942_v20 = vsel (!%p4869_p0), %vm3926_vm12, 1.0, %v3910_v3 }
 0x890   : > { %v3815_v15 = vpop.permute.xlu0 %3814  ;;  %v3654_v46 = vmul.f32 %v3613_v41, %v3558_v7  ;;  %5522 = vset.pattern.permute.xlu1 (!%p4869_p0), %v5693_v23  ;;  %5521 = vset.pattern.permute.xlu0 (!%p4869_p0), %v5693_v23  ;;  %v3911_v41 = vld [vmem:[#allocation3 + $0x20] sm:$0xff] (!%p4869_p0) }
 0x891   : > { %v3858_v38 = vadd.f32 %v3815_v15, %v3649_v0  ;;  %v3912_v0 = vld [vmem:[#allocation3 + $0x28] sm:$0xff] (!%p4869_p0)  ;;  %v3941_v15 = vsel (!%p4869_p0), %vm3925_vm10, 1.0, %v3909_v43  ;;  %vm3927_vm15 = vcmp.eq.f32.partialorder (!%p4869_p0), %v3911_v41, 0.0 }
 0x892   : > { %5529 = vrcp.f32 (!%p4869_p0), %v3941_v15  ;;  %vm3928_vm14 = vcmp.eq.f32.partialorder (!%p4869_p0), %v3912_v0, 0.0  ;;  %v3943_v55 = vsel (!%p4869_p0), %vm3927_vm15, 1.0, %v3911_v41  ;;  %vm4698_vm15 = vcmask (!%p4869_p0), 257024  }
 0x893   : > { %3875 = vst.msk [vmem:[#allocation4 + $0x20] sm:$0xff] %vm3870_vm9, %v3858_v38  ;;  %v3623_v52 = vpop.permute.xlu1 %3622  ;;  %v3939_v38 = vsel (!%p4869_p0), %vm3923_vm11, 1.0, %v3907_v39 }
 0x894   : > { %v3819_v45 = vpop.permute.xlu0 %3818  ;;  %v3656_v6 = vmul.f32 %v3623_v52, %v3560_v56  ;;  %5531 = vrcp.f32 (!%p4869_p0), %v3939_v38  ;;  %v3914_v52 = vld [vmem:[#allocation3 + $0x38] sm:$0xff] (!%p4869_p0) }
 0x895   : > { %v3860_v57 = vadd.f32 %v3819_v45, %v3651_v60  ;;  %v3940_v60 = vsel (!%p4869_p0), %vm3924_vm13, 1.0, %v3908_v11  ;;  %5533 = vrcp.f32 (!%p4869_p0), %v3942_v20  ;;  %v3913_v45 = vld [vmem:[#allocation3 + $0x30] sm:$0xff] (!%p4869_p0)  ;;  %vm3930_vm0 = vcmp.eq.f32.partialorder (!%p4869_p0), %v3914_v52, 0.0 }
 0x896   : > { %5535 = vrcp.f32 (!%p4869_p0), %v3940_v60  ;;  %vm3929_vm1 = vcmp.eq.f32.partialorder (!%p4869_p0), %v3913_v45, 0.0  ;;  %vm3937_vm13 = vcmp.eq.f32.partialorder (!%p4869_p0), %v3921_v4, 0.0  ;;  %v3974_v56 = vld [vmem:[#allocation4 + $0x10] sm:$0xff] (!%p4869_p0) }
 0x897   : > { %3877 = vst.msk [vmem:[#allocation4 + $0x30] sm:$0xff] %vm3870_vm9, %v3860_v57  ;;  %v3633_v21 = vpop.permute.xlu1 %3632  ;;  %v3944_v57 = vsel (!%p4869_p0), %vm3928_vm14, 1.0, %v3912_v0 }
 0x898   : > { %v3823_v8 = vpop.permute.xlu0 %3822  ;;  %v3658_v50 = vmul.f32 %v3633_v21, %v3562_v40  ;;  %5537 = vrcp.f32 (!%p4869_p0), %v3944_v57  ;;  %v3915_v21 = vld [vmem:[#allocation3 + $0x40] sm:$0xff] (!%p4869_p0) }
 0x899   : > { %v3862_v27 = vadd.f32 %v3823_v8, %v3653_v32  ;;  %v3916_v32 = vld [vmem:[#allocation3 + $0x48] sm:$0xff] (!%p4869_p0)  ;;  %5539 = vrcp.f32 (!%p4869_p0), %v3943_v55  ;;  %v3946_v8 = vsel (!%p4869_p0), %vm3930_vm0, 1.0, %v3914_v52  ;;  %vm3931_vm3 = vcmp.eq.f32.partialorder (!%p4869_p0), %v3915_v21, 0.0 }
 0x89a   : > { %vm3932_vm2 = vcmp.eq.f32.partialorder (!%p4869_p0), %v3916_v32, 0.0  ;;  %5541 = vrcp.f32 (!%p4869_p0), %v3946_v8  ;;  %v3976_v39 = vld [vmem:[#allocation4 + $0x20] sm:$0xff] (!%p4869_p0) }
 0x89b   : > { %3879 = vst.msk [vmem:[#allocation4 + $0x40] sm:$0xff] %vm3870_vm9, %v3862_v27  ;;  %v3643_v30 = vpop.permute.xlu1 %3642  ;;  %v3945_v27 = vsel (!%p4869_p0), %vm3929_vm1, 1.0, %v3913_v45  ;;  %v3948_v48 = vsel (!%p4869_p0), %vm3932_vm2, 1.0, %v3916_v32 }
 0x89c   : > { %v3827_v17 = vpop.permute.xlu0 %3826  ;;  %v3660_v42 = vmul.f32 %v3643_v30, %v3564_v1  ;;  %v3917_v30 = vld [vmem:[#allocation3 + $0x50] sm:$0xff] (!%p4869_p0)  ;;  %5543 = vrcp.f32 (!%p4869_p0), %v3945_v27 }
 0x89d   : > { %v3864_v12 = vadd.f32 %v3827_v17, %v3655_v37  ;;  %v8147_v37 = vpop.eup (!%p4869_p0), %5529  ;;  %vm3933_vm7 = vcmp.eq.f32.partialorder (!%p4869_p0), %v3917_v30, 0.0  ;;  %5545 = vrcp.f32 (!%p4869_p0), %v3948_v48 }
 0x89e   : > { %v8149_v17 = vpop.eup (!%p4869_p0), %5531  ;;  %4000 = vperm.xlu1 (!%p4869_p0), %5522, %v8147_v37   ;;  %v3949_v29 = vsel (!%p4869_p0), %vm3933_vm7, 1.0, %v3917_v30  ;;  %v3978_v15 = vld [vmem:[#allocation4 + $0x30] sm:$0xff] (!%p4869_p0) }
 0x89f   : > { %3881 = vst.msk [vmem:[#allocation4 + $0x50] sm:$0xff] %vm3870_vm9, %v3864_v12  ;;  %v3809_v24 = vpop.permute.xlu1 %3808  ;;  %v8152_v12 = vpop.eup (!%p4869_p0), %5533  ;;  %3990 = vperm.xlu0 (!%p4869_p0), %5521, %v8149_v17  }
 0x8a0   : > { %v3855_v47 = vadd.f32 %v3809_v24, %v3646_v31  ;;  %v3831_v53 = vpop.permute.xlu0 %3830  ;;  %v3947_v31 = vsel (!%p4869_p0), %vm3931_vm3, 1.0, %v3915_v21  ;;  %v8155_v34 = vpop.eup (!%p4869_p0), %5535  ;;  %v3919_v24 = vld [vmem:[#allocation3 + $0x60] sm:$0xff] (!%p4869_p0) }
 0x8a1   : > { %v3866_v49 = vadd.f32 %v3831_v53, %v3657_v5  ;;  %v3920_v5 = vld [vmem:[#allocation3 + $0x68] sm:$0xff] (!%p4869_p0)  ;;  %5547 = vrcp.f32 (!%p4869_p0), %v3947_v31  ;;  %vm3935_vm11 = vcmp.eq.f32.partialorder (!%p4869_p0), %v3919_v24, 0.0 }
 0x8a2   : > { %3872 = vst.msk [vmem:[#allocation4 + $0x8] sm:$0xff] %vm3870_vm9, %v3855_v47  ;;  %4005 = vperm.xlu1 (!%p4869_p0), %5522, %v8152_v12   ;;  %v3950_v47 = vsel (!%p4869_p0), %vm3934_vm5, 1.0, %v3918_v33  ;;  %v8158_v53 = vpop.eup (!%p4869_p0), %5537  ;;  %vm3936_vm10 = vcmp.eq.f32.partialorder (!%p4869_p0), %v3920_v5, 0.0  ;;  %v3980_v57 = vld [vmem:[#allocation4 + $0x40] sm:$0xff] (!%p4869_p0) }
 0x8a3   : > { %3883 = vst.msk [vmem:[#allocation4 + $0x60] sm:$0xff] %vm3870_vm9, %v3866_v49  ;;  %v3813_v58 = vpop.permute.xlu1 %3812  ;;  %3995 = vperm.xlu0 (!%p4869_p0), %5521, %v8155_v34   ;;  %v8161_v49 = vpop.eup (!%p4869_p0), %5539  ;;  %5549 = vrcp.f32 (!%p4869_p0), %v3950_v47 }
 0x8a4   : > { %v3857_v25 = vadd.f32 %v3813_v58, %v3648_v26  ;;  %v3835_v63 = vpop.permute.xlu0 %3834  ;;  %v3922_v26 = vld [vmem:[#allocation3 + $0x78] sm:$0xff] (!%p4869_p0)  ;;  %5551 = vrcp.f32 (!%p4869_p0), %v3949_v29  ;;  %v8164_v58 = vpop.eup (!%p4869_p0), %5541 }
 0x8a5   : > { %v3868_v16 = vadd.f32 %v3835_v63, %v3659_v44  ;;  %v3952_v44 = vsel (!%p4869_p0), %vm3936_vm10, 1.0, %v3920_v5  ;;  %vm3938_vm12 = vcmp.eq.f32.partialorder (!%p4869_p0), %v3922_v26, 0.0 }
 0x8a6   : > { %3874 = vst.msk [vmem:[#allocation4 + $0x18] sm:$0xff] %vm3870_vm9, %v3857_v25  ;;  %4015 = vperm.xlu1 (!%p4869_p0), %5522, %v8158_v53   ;;  %v3951_v25 = vsel (!%p4869_p0), %vm3935_vm11, 1.0, %v3919_v24  ;;  %v8167_v63 = vpop.eup (!%p4869_p0), %5543  ;;  %5553 = vrcp.f32 (!%p4869_p0), %v3952_v44  ;;  %v3954_v13 = vsel (!%p4869_p0), %vm3938_vm12, 1.0, %v3922_v26  ;;  %v3982_v33 = vld [vmem:[#allocation4 + $0x50] sm:$0xff] (!%p4869_p0) }
 0x8a7   : > { %3885 = vst.msk [vmem:[#allocation4 + $0x70] sm:$0xff] %vm3870_vm9, %v3868_v16  ;;  %v3817_v59 = vpop.permute.xlu1 %3816  ;;  %4010 = vperm.xlu0 (!%p4869_p0), %5521, %v8161_v49   ;;  %5555 = vrcp.f32 (!%p4869_p0), %v3951_v25  ;;  %v8170_v16 = vpop.eup (!%p4869_p0), %5545 }
 0x8a8   : > { %v3859_v14 = vadd.f32 %v3817_v59, %v3650_v2  ;;  %v3953_v2 = vsel (!%p4869_p0), %vm3937_vm13, 1.0, %v3921_v4  ;;  %5557 = vrcp.f32 (!%p4869_p0), %v3954_v13 }
 0x8a9   : > { %5559 = vrcp.f32 (!%p4869_p0), %v3953_v2 }
 0x8aa   : > { %3876 = vst.msk [vmem:[#allocation4 + $0x28] sm:$0xff] %vm3870_vm9, %v3859_v14  ;;  %4025 = vperm.xlu1 (!%p4869_p0), %5522, %v8164_v58   ;;  %v3984_v31 = vld [vmem:[#allocation4 + $0x60] sm:$0xff] (!%p4869_p0) }
 0x8ab   : > { %v3821_v61 = vpop.permute.xlu1 %3820  ;;  %4020 = vperm.xlu0 (!%p4869_p0), %5521, %v8167_v63   ;;  %v8173_v59 = vpop.eup (!%p4869_p0), %5547 }
 0x8ac   : > { %v3861_v9 = vadd.f32 %v3821_v61, %v3652_v62 }
 0x8ad   : > { %v5550_v14 = vpop.eup (!%p4869_p0), %5549 }
 0x8ae   : > { %3878 = vst.msk [vmem:[#allocation4 + $0x38] sm:$0xff] %vm3870_vm9, %v3861_v9  ;;  %4035 = vperm.xlu1 (!%p4869_p0), %5522, %v8170_v16   ;;  %v8177_v10 = vpop.eup (!%p4869_p0), %5551  ;;  %v3986_v29 = vld [vmem:[#allocation4 + $0x70] sm:$0xff] (!%p4869_p0) }
 0x8af   : > { %v3825_v36 = vpop.permute.xlu1 %3824  ;;  %4030 = vperm.xlu0 (!%p4869_p0), %5521, %v8173_v59  }
 0x8b0   : > { %v3863_v51 = vadd.f32 %v3825_v36, %v3654_v46  ;;  %v5554_v62 = vpop.eup (!%p4869_p0), %5553  ;;  %v5694_v46 = vmov (!%p4869_p0), 1   ;;  %v5695_v36 = vmov (!%p4869_p0), 2  }
 0x8b1   : > { %v8180_v61 = vpop.eup (!%p4869_p0), %5555  ;;  %v3977_v43 = vld [vmem:[#allocation4 + $0x28] sm:$0xff] (!%p4869_p0) }
 0x8b2   : > { %3880 = vst.msk [vmem:[#allocation4 + $0x48] sm:$0xff] %vm3870_vm9, %v3863_v51  ;;  %4045 = vperm.xlu1 (!%p4869_p0), %5522, %v5550_v14   ;;  %v5558_v9 = vpop.eup (!%p4869_p0), %5557  ;;  %v5696_v51 = vmov (!%p4869_p0), 3  }
 0x8b3   : > { %v3829_v54 = vpop.permute.xlu1 %3828  ;;  %4040 = vperm.xlu0 (!%p4869_p0), %5521, %v8177_v10   ;;  %v8183_v7 = vpop.eup (!%p4869_p0), %5559 }
 0x8b4   : > { %v3865_v19 = vadd.f32 %v3829_v54, %v3656_v6  ;;  %v3972_v6 = vld [vmem:[#allocation4] sm:$0xff] (!%p4869_p0) }
 0x8b5   : > { %v3979_v41 = vld [vmem:[#allocation4 + $0x38] sm:$0xff] (!%p4869_p0) }
 0x8b6   : > { %3882 = vst.msk [vmem:[#allocation4 + $0x58] sm:$0xff] %vm3870_vm9, %v3865_v19  ;;  %4055 = vperm.xlu1 (!%p4869_p0), %5522, %v5554_v62  }
 0x8b7   : > { %v3833_v35 = vpop.permute.xlu1 %3832  ;;  %4050 = vperm.xlu0 (!%p4869_p0), %5521, %v8180_v61  }
 0x8b8   : > { %v3867_v28 = vadd.f32 %v3833_v35, %v3658_v50  ;;  %3906 = sbr.rel (%p4869_p0) target bundleno = 2524 (0x9dc), region = 86  ;;  %v3975_v35 = vld [vmem:[#allocation4 + $0x18] sm:$0xff] (!%p4869_p0) }
 0x8b9   : > { %v3981_v45 = vld [vmem:[#allocation4 + $0x48] sm:$0xff] (!%p4869_p0) }
 0x8ba   : > { %3884 = vst.msk [vmem:[#allocation4 + $0x68] sm:$0xff] %vm3870_vm9, %v3867_v28  ;;  %4065 = vperm.xlu1 (!%p4869_p0), %5522, %v5558_v9   ;;  %v3973_v28 = vld [vmem:[#allocation4 + $0x8] sm:$0xff] (!%p4869_p0) }
 0x8bb   : > { %v3837_v22 = vpop.permute.xlu1 %3836  ;;  %4060 = vperm.xlu0 (!%p4869_p0), %5521, %v8183_v7  }
 0x8bc   : > { %v3869_v18 = vadd.f32 %v3837_v22, %v3660_v42 }
 0x8bd   : > { %v3983_v27 = vld [vmem:[#allocation4 + $0x58] sm:$0xff] (!%p4869_p0) }
 0x8be   : > { %3886 = vst.msk [vmem:[#allocation4 + $0x78] sm:$0xff] %vm3870_vm9, %v3869_v18  ;;  %5524 = vset.pattern.permute.xlu1 (!%p4869_p0), %v5694_v46 }
 0x8bf   : > { %5523 = vset.pattern.permute.xlu0 %v5694_v46  ;;  %4121 = vperm.xlu1 %5524, %v8155_v34  }
 0x8c0   : > { %4117 = vperm.xlu0 %5523, %v8149_v17  }
 0x8c3   : > { %4125 = vperm.xlu1 %5524, %v8147_v37  }
 0x8c4   : > { %4129 = vperm.xlu0 %5523, %v8152_v12  }
 0x8c7   : > { %4133 = vperm.xlu1 %5524, %v8161_v49  }
 0x8c8   : > { %4137 = vperm.xlu0 %5523, %v8158_v53  }
 0x8cb   : > { %4141 = vperm.xlu1 %5524, %v8167_v63  }
 0x8cc   : > { %4145 = vperm.xlu0 %5523, %v8164_v58  }
 0x8cf   : > { %4149 = vperm.xlu1 %5524, %v8173_v59  }
 0x8d0   : > { %4153 = vperm.xlu0 %5523, %v8170_v16  }
 0x8d3   : > { %4157 = vperm.xlu1 %5524, %v8177_v10  }
 0x8d4   : > { %4161 = vperm.xlu0 %5523, %v5550_v14  }
 0x8d7   : > { %4165 = vperm.xlu1 %5524, %v8180_v61  }
 0x8d8   : > { %4169 = vperm.xlu0 %5523, %v5554_v62  }
 0x8db   : > { %4173 = vperm.xlu1 %5524, %v8183_v7  }
 0x8dc   : > { %4177 = vperm.xlu0 %5523, %v5558_v9  }
 0x8df   : > { %5525 = vset.pattern.permute.xlu1 %v5695_v36 }
 0x8e0   : > { %5526 = vset.pattern.permute.xlu0 %v5695_v36  ;;  %4229 = vperm.xlu1 %5525, %v8149_v17  }
 0x8e1   : > { %4233 = vperm.xlu0 %5526, %v8155_v34  }
 0x8e4   : > { %4237 = vperm.xlu1 %5525, %v8147_v37  }
 0x8e5   : > { %4245 = vperm.xlu0 %5526, %v8161_v49  }
 0x8e8   : > { %4241 = vperm.xlu1 %5525, %v8152_v12  }
 0x8e9   : > { %4253 = vperm.xlu0 %5526, %v8167_v63  }
 0x8ec   : > { %4249 = vperm.xlu1 %5525, %v8158_v53  }
 0x8ed   : > { %4261 = vperm.xlu0 %5526, %v8173_v59  }
 0x8f0   : > { %4257 = vperm.xlu1 %5525, %v8164_v58  }
 0x8f1   : > { %4269 = vperm.xlu0 %5526, %v8177_v10  }
 0x8f4   : > { %4265 = vperm.xlu1 %5525, %v8170_v16  }
 0x8f5   : > { %4277 = vperm.xlu0 %5526, %v8180_v61  }
 0x8f8   : > { %4273 = vperm.xlu1 %5525, %v5550_v14  }
 0x8f9   : > { %4285 = vperm.xlu0 %5526, %v8183_v7  }
 0x8fc   : > { %4281 = vperm.xlu1 %5525, %v5554_v62  }
 0x8fd   : > { %5527 = vset.pattern.permute.xlu0 %v5696_v51 }
 0x8fe   : > { %4341 = vperm.xlu0 %5527, %v8149_v17  }
 0x900   : > { %4289 = vperm.xlu1 %5525, %v5558_v9  }
 0x902   : > { %4353 = vperm.xlu0 %5527, %v8152_v12   ;;  %v3985_v12 = vld [vmem:[#allocation4 + $0x68] sm:$0xff] }
 0x904   : > { %5528 = vset.pattern.permute.xlu1 %v5696_v51 }
 0x905   : > { %4345 = vperm.xlu1 %5528, %v8155_v34  }
 0x906   : > { %4361 = vperm.xlu0 %5527, %v8158_v53   ;;  %v3987_v53 = vld [vmem:[#allocation4 + $0x78] sm:$0xff] }
 0x909   : > { %4349 = vperm.xlu1 %5528, %v8147_v37  }
 0x90a   : > { %4369 = vperm.xlu0 %5527, %v8164_v58  }
 0x90d   : > { %4357 = vperm.xlu1 %5528, %v8161_v49  }
 0x90e   : > { %4377 = vperm.xlu0 %5527, %v8170_v16  }
 0x911   : > { %4365 = vperm.xlu1 %5528, %v8167_v63  }
 0x912   : > { %4385 = vperm.xlu0 %5527, %v5550_v14  }
 0x915   : > { %4373 = vperm.xlu1 %5528, %v8173_v59  }
 0x916   : > { %4393 = vperm.xlu0 %5527, %v5554_v62  }
 0x919   : > { %4381 = vperm.xlu1 %5528, %v8177_v10  }
 0x91a   : > { %4401 = vperm.xlu0 %5527, %v5558_v9  }
 0x91d   : > { %v4001_v54 = vpop.permute.xlu1 %4000  ;;  %4389 = vperm.xlu1 %5528, %v8180_v61  }
 0x91e   : > { %v4070_v19 = vmul.f32 %v4001_v54, %v3974_v56  ;;  %v3991_v40 = vpop.permute.xlu0 %3990 }
 0x91f   : > { %v4068_v50 = vmul.f32 %v3991_v40, %v3972_v6 }
 0x920   : > { %4086 = vst.msk [vmem:[#allocation4 + $0x10] sm:$0xff] %vm1305_vm4, %v4070_v19 }
 0x921   : > { %4084 = vst.msk [vmem:[#allocation4] sm:$0xff] %vm1305_vm4, %v4068_v50  ;;  %v4006_v1 = vpop.permute.xlu1 %4005  ;;  %4397 = vperm.xlu1 %5528, %v8183_v7  }
 0x922   : > { %v4071_v42 = vmul.f32 %v4006_v1, %v3975_v35  ;;  %v3996_v22 = vpop.permute.xlu0 %3995 }
 0x923   : > { %v4069_v18 = vmul.f32 %v3996_v22, %v3973_v28 }
 0x924   : > { %4087 = vst.msk [vmem:[#allocation4 + $0x18] sm:$0xff] %vm1305_vm4, %v4071_v42 }
 0x925   : > { %4085 = vst.msk [vmem:[#allocation4 + $0x8] sm:$0xff] %vm1305_vm4, %v4069_v18  ;;  %v4016_v3 = vpop.permute.xlu1 %4015 }
 0x926   : > { %v4073_v23 = vmul.f32 %v4016_v3, %v3977_v43  ;;  %v4011_v11 = vpop.permute.xlu0 %4010 }
 0x927   : > { %v4072_v0 = vmul.f32 %v4011_v11, %v3976_v39  ;;  %v4102_v59 = vld [vmem:[#allocation4 + $0x10] sm:$0xff] }
 0x928   : > { %4089 = vst.msk [vmem:[#allocation4 + $0x28] sm:$0xff] %vm1305_vm4, %v4073_v23  ;;  %v4100_v13 = vld [vmem:[#allocation4] sm:$0xff] }
 0x929   : > { %4088 = vst.msk [vmem:[#allocation4 + $0x20] sm:$0xff] %vm1305_vm4, %v4072_v0  ;;  %v4026_v38 = vpop.permute.xlu1 %4025 }
 0x92a   : > { %v4075_v20 = vmul.f32 %v4026_v38, %v3979_v41  ;;  %v4021_v60 = vpop.permute.xlu0 %4020 }
 0x92b   : > { %v4074_v52 = vmul.f32 %v4021_v60, %v3978_v15  ;;  %v4103_v62 = vld [vmem:[#allocation4 + $0x18] sm:$0xff] }
 0x92c   : > { %4091 = vst.msk [vmem:[#allocation4 + $0x38] sm:$0xff] %vm1305_vm4, %v4075_v20  ;;  %v4101_v25 = vld [vmem:[#allocation4 + $0x8] sm:$0xff] }
 0x92d   : > { %4090 = vst.msk [vmem:[#allocation4 + $0x30] sm:$0xff] %vm1305_vm4, %v4074_v52  ;;  %v4036_v55 = vpop.permute.xlu1 %4035 }
 0x92e   : > { %v4077_v32 = vmul.f32 %v4036_v55, %v3981_v45  ;;  %v4031_v21 = vpop.permute.xlu0 %4030 }
 0x92f   : > { %v4076_v8 = vmul.f32 %v4031_v21, %v3980_v57  ;;  %v4105_v51 = vld [vmem:[#allocation4 + $0x28] sm:$0xff] }
 0x930   : > { %4093 = vst.msk [vmem:[#allocation4 + $0x48] sm:$0xff] %vm1305_vm4, %v4077_v32  ;;  %v4104_v46 = vld [vmem:[#allocation4 + $0x20] sm:$0xff] }
 0x931   : > { %4092 = vst.msk [vmem:[#allocation4 + $0x40] sm:$0xff] %vm1305_vm4, %v4076_v8  ;;  %v4046_v37 = vpop.permute.xlu1 %4045 }
 0x932   : > { %v4079_v30 = vmul.f32 %v4046_v37, %v3983_v27  ;;  %v4041_v17 = vpop.permute.xlu0 %4040 }
 0x933   : > { %v4078_v48 = vmul.f32 %v4041_v17, %v3982_v33  ;;  %v4107_v50 = vld [vmem:[#allocation4 + $0x38] sm:$0xff] }
 0x934   : > { %4095 = vst.msk [vmem:[#allocation4 + $0x58] sm:$0xff] %vm1305_vm4, %v4079_v30  ;;  %v4106_v19 = vld [vmem:[#allocation4 + $0x30] sm:$0xff] }
 0x935   : > { %4094 = vst.msk [vmem:[#allocation4 + $0x50] sm:$0xff] %vm1305_vm4, %v4078_v48  ;;  %v4056_v34 = vpop.permute.xlu1 %4055 }
 0x936   : > { %v4081_v5 = vmul.f32 %v4056_v34, %v3985_v12  ;;  %v4051_v24 = vpop.permute.xlu0 %4050 }
 0x937   : > { %v4080_v47 = vmul.f32 %v4051_v24, %v3984_v31  ;;  %v4109_v18 = vld [vmem:[#allocation4 + $0x48] sm:$0xff] }
 0x938   : > { %4097 = vst.msk [vmem:[#allocation4 + $0x68] sm:$0xff] %vm1305_vm4, %v4081_v5  ;;  %v4108_v42 = vld [vmem:[#allocation4 + $0x40] sm:$0xff] }
 0x939   : > { %4096 = vst.msk [vmem:[#allocation4 + $0x60] sm:$0xff] %vm1305_vm4, %v4080_v47  ;;  %v4066_v49 = vpop.permute.xlu1 %4065 }
 0x93a   : > { %v4083_v26 = vmul.f32 %v4066_v49, %v3987_v53  ;;  %v4061_v4 = vpop.permute.xlu0 %4060 }
 0x93b   : > { %v4082_v44 = vmul.f32 %v4061_v4, %v3986_v29  ;;  %v4111_v0 = vld [vmem:[#allocation4 + $0x58] sm:$0xff] }
 0x93c   : > { %4099 = vst.msk [vmem:[#allocation4 + $0x78] sm:$0xff] %vm1305_vm4, %v4083_v26  ;;  %v4110_v23 = vld [vmem:[#allocation4 + $0x50] sm:$0xff] }
 0x93d   : > { %4098 = vst.msk [vmem:[#allocation4 + $0x70] sm:$0xff] %vm1305_vm4, %v4082_v44 }
 0x93e   : > { %v4122_v58 = vpop.permute.xlu1 %4121 }
 0x93f   : > { %v4181_v63 = vmul.f32 %v4122_v58, %v4101_v25  ;;  %v4118_v16 = vpop.permute.xlu0 %4117  ;;  %v4113_v52 = vld [vmem:[#allocation4 + $0x68] sm:$0xff] }
 0x940   : > { %v4180_v2 = vmul.f32 %v4118_v16, %v4100_v13  ;;  %v4112_v20 = vld [vmem:[#allocation4 + $0x60] sm:$0xff] }
 0x941   : > { %4197 = vst.msk [vmem:[#allocation4 + $0x8] sm:$0xff] %vm2160_vm6, %v4181_v63 }
 0x942   : > { %4196 = vst.msk [vmem:[#allocation4] sm:$0xff] %vm2160_vm6, %v4180_v2  ;;  %v4126_v14 = vpop.permute.xlu1 %4125 }
 0x943   : > { %v4182_v10 = vmul.f32 %v4126_v14, %v4102_v59  ;;  %v4130_v61 = vpop.permute.xlu0 %4129  ;;  %v4115_v8 = vld [vmem:[#allocation4 + $0x78] sm:$0xff] }
 0x944   : > { %v4183_v9 = vmul.f32 %v4130_v61, %v4103_v62  ;;  %v4114_v32 = vld [vmem:[#allocation4 + $0x70] sm:$0xff] }
 0x945   : > { %4198 = vst.msk [vmem:[#allocation4 + $0x10] sm:$0xff] %vm2160_vm6, %v4182_v10 }
 0x946   : > { %4199 = vst.msk [vmem:[#allocation4 + $0x18] sm:$0xff] %vm2160_vm6, %v4183_v9  ;;  %v4134_v7 = vpop.permute.xlu1 %4133 }
 0x947   : > { %v4184_v36 = vmul.f32 %v4134_v7, %v4104_v46  ;;  %v4138_v56 = vpop.permute.xlu0 %4137 }
 0x948   : > { %v4185_v6 = vmul.f32 %v4138_v56, %v4105_v51  ;;  %v4213_v48 = vld [vmem:[#allocation4 + $0x8] sm:$0xff] }
 0x949   : > { %4200 = vst.msk [vmem:[#allocation4 + $0x20] sm:$0xff] %vm2160_vm6, %v4184_v36  ;;  %v4212_v30 = vld [vmem:[#allocation4] sm:$0xff] }
 0x94a   : > { %4201 = vst.msk [vmem:[#allocation4 + $0x28] sm:$0xff] %vm2160_vm6, %v4185_v6  ;;  %v4142_v54 = vpop.permute.xlu1 %4141 }
 0x94b   : > { %v4186_v40 = vmul.f32 %v4142_v54, %v4106_v19  ;;  %v4146_v35 = vpop.permute.xlu0 %4145 }
 0x94c   : > { %v4187_v28 = vmul.f32 %v4146_v35, %v4107_v50  ;;  %v4214_v34 = vld [vmem:[#allocation4 + $0x10] sm:$0xff] }
 0x94d   : > { %4202 = vst.msk [vmem:[#allocation4 + $0x30] sm:$0xff] %vm2160_vm6, %v4186_v40  ;;  %v4215_v26 = vld [vmem:[#allocation4 + $0x18] sm:$0xff] }
 0x94e   : > { %4203 = vst.msk [vmem:[#allocation4 + $0x38] sm:$0xff] %vm2160_vm6, %v4187_v28  ;;  %v4150_v1 = vpop.permute.xlu1 %4149 }
 0x94f   : > { %v4188_v22 = vmul.f32 %v4150_v1, %v4108_v42  ;;  %v4154_v43 = vpop.permute.xlu0 %4153 }
 0x950   : > { %v4189_v39 = vmul.f32 %v4154_v43, %v4109_v18  ;;  %v4216_v47 = vld [vmem:[#allocation4 + $0x20] sm:$0xff] }
 0x951   : > { %4204 = vst.msk [vmem:[#allocation4 + $0x40] sm:$0xff] %vm2160_vm6, %v4188_v22  ;;  %v4217_v13 = vld [vmem:[#allocation4 + $0x28] sm:$0xff] }
 0x952   : > { %4205 = vst.msk [vmem:[#allocation4 + $0x48] sm:$0xff] %vm2160_vm6, %v4189_v39  ;;  %v4158_v3 = vpop.permute.xlu1 %4157 }
 0x953   : > { %v4190_v11 = vmul.f32 %v4158_v3, %v4110_v23  ;;  %v4162_v41 = vpop.permute.xlu0 %4161 }
 0x954   : > { %v4191_v15 = vmul.f32 %v4162_v41, %v4111_v0  ;;  %v4218_v44 = vld [vmem:[#allocation4 + $0x30] sm:$0xff] }
 0x955   : > { %4206 = vst.msk [vmem:[#allocation4 + $0x50] sm:$0xff] %vm2160_vm6, %v4190_v11  ;;  %v4219_v62 = vld [vmem:[#allocation4 + $0x38] sm:$0xff] }
 0x956   : > { %4207 = vst.msk [vmem:[#allocation4 + $0x58] sm:$0xff] %vm2160_vm6, %v4191_v15  ;;  %v4166_v38 = vpop.permute.xlu1 %4165 }
 0x957   : > { %v4192_v60 = vmul.f32 %v4166_v38, %v4112_v20  ;;  %v4170_v45 = vpop.permute.xlu0 %4169 }
 0x958   : > { %v4193_v57 = vmul.f32 %v4170_v45, %v4113_v52  ;;  %v4220_v2 = vld [vmem:[#allocation4 + $0x40] sm:$0xff] }
 0x959   : > { %4208 = vst.msk [vmem:[#allocation4 + $0x60] sm:$0xff] %vm2160_vm6, %v4192_v60  ;;  %v4221_v51 = vld [vmem:[#allocation4 + $0x48] sm:$0xff]  ;;  %v8278_v45 = vld [vmem:[%s8508_s3] ss:$0 sm:$0xff] }
 0x95a   : > { %4209 = vst.msk [vmem:[#allocation4 + $0x68] sm:$0xff] %vm2160_vm6, %v4193_v57  ;;  %v4174_v55 = vpop.permute.xlu1 %4173 }
 0x95b   : > { %v4194_v21 = vmul.f32 %v4174_v55, %v4114_v32  ;;  %v4178_v27 = vpop.permute.xlu0 %4177 }
 0x95c   : > { %v4195_v33 = vmul.f32 %v4178_v27, %v4115_v8  ;;  %v4222_v9 = vld [vmem:[#allocation4 + $0x50] sm:$0xff] }
 0x95d   : > { %4210 = vst.msk [vmem:[#allocation4 + $0x70] sm:$0xff] %vm2160_vm6, %v4194_v21  ;;  %v4223_v50 = vld [vmem:[#allocation4 + $0x58] sm:$0xff] }
 0x95e   : > { %4211 = vst.msk [vmem:[#allocation4 + $0x78] sm:$0xff] %vm2160_vm6, %v4195_v33 }
 0x95f   : > { %v4230_v37 = vpop.permute.xlu1 %4229 }
 0x960   : > { %v4292_v17 = vmul.f32 %v4230_v37, %v4212_v30  ;;  %v4234_v12 = vpop.permute.xlu0 %4233  ;;  %v4224_v6 = vld [vmem:[#allocation4 + $0x60] sm:$0xff] }
 0x961   : > { %v4293_v31 = vmul.f32 %v4234_v12, %v4213_v48  ;;  %v4225_v18 = vld [vmem:[#allocation4 + $0x68] sm:$0xff] }
 0x962   : > { %4308 = vst.msk [vmem:[#allocation4] sm:$0xff] %vm3015_vm8, %v4292_v17 }
 0x963   : > { %4309 = vst.msk [vmem:[#allocation4 + $0x8] sm:$0xff] %vm3015_vm8, %v4293_v31  ;;  %v4238_v5 = vpop.permute.xlu1 %4237 }
 0x964   : > { %v4294_v24 = vmul.f32 %v4238_v5, %v4214_v34  ;;  %v4246_v53 = vpop.permute.xlu0 %4245  ;;  %v4226_v28 = vld [vmem:[#allocation4 + $0x70] sm:$0xff] }
 0x965   : > { %v4296_v29 = vmul.f32 %v4246_v53, %v4216_v47  ;;  %v4227_v0 = vld [vmem:[#allocation4 + $0x78] sm:$0xff] }
 0x966   : > { %4310 = vst.msk [vmem:[#allocation4 + $0x10] sm:$0xff] %vm3015_vm8, %v4294_v24 }
 0x967   : > { %4312 = vst.msk [vmem:[#allocation4 + $0x20] sm:$0xff] %vm3015_vm8, %v4296_v29  ;;  %v4242_v49 = vpop.permute.xlu1 %4241 }
 0x968   : > { %v4295_v4 = vmul.f32 %v4242_v49, %v4215_v26  ;;  %v4254_v58 = vpop.permute.xlu0 %4253 }
 0x969   : > { %v4298_v25 = vmul.f32 %v4254_v58, %v4218_v44  ;;  %v4324_v39 = vld [vmem:[#allocation4] sm:$0xff] }
 0x96a   : > { %4311 = vst.msk [vmem:[#allocation4 + $0x18] sm:$0xff] %vm3015_vm8, %v4295_v4  ;;  %v4325_v52 = vld [vmem:[#allocation4 + $0x8] sm:$0xff] }
 0x96b   : > { %4314 = vst.msk [vmem:[#allocation4 + $0x30] sm:$0xff] %vm3015_vm8, %v4298_v25  ;;  %v4250_v63 = vpop.permute.xlu1 %4249 }
 0x96c   : > { %v4297_v16 = vmul.f32 %v4250_v63, %v4217_v13  ;;  %v4262_v59 = vpop.permute.xlu0 %4261 }
 0x96d   : > { %v4300_v14 = vmul.f32 %v4262_v59, %v4220_v2  ;;  %v4326_v33 = vld [vmem:[#allocation4 + $0x10] sm:$0xff] }
 0x96e   : > { %4313 = vst.msk [vmem:[#allocation4 + $0x28] sm:$0xff] %vm3015_vm8, %v4297_v16  ;;  %v4328_v47 = vld [vmem:[#allocation4 + $0x20] sm:$0xff] }
 0x96f   : > { %4316 = vst.msk [vmem:[#allocation4 + $0x40] sm:$0xff] %vm3015_vm8, %v4300_v14  ;;  %v4258_v10 = vpop.permute.xlu1 %4257 }
 0x970   : > { %v4299_v61 = vmul.f32 %v4258_v10, %v4219_v62  ;;  %v4270_v7 = vpop.permute.xlu0 %4269 }
 0x971   : > { %v4302_v46 = vmul.f32 %v4270_v7, %v4222_v9  ;;  %v4327_v15 = vld [vmem:[#allocation4 + $0x18] sm:$0xff] }
 0x972   : > { %4315 = vst.msk [vmem:[#allocation4 + $0x38] sm:$0xff] %vm3015_vm8, %v4299_v61  ;;  %v4330_v16 = vld [vmem:[#allocation4 + $0x30] sm:$0xff] }
 0x973   : > { %4318 = vst.msk [vmem:[#allocation4 + $0x50] sm:$0xff] %vm3015_vm8, %v4302_v46  ;;  %v4266_v36 = vpop.permute.xlu1 %4265 }
 0x974   : > { %v4301_v56 = vmul.f32 %v4266_v36, %v4221_v51  ;;  %v4278_v54 = vpop.permute.xlu0 %4277 }
 0x975   : > { %v4304_v19 = vmul.f32 %v4278_v54, %v4224_v6  ;;  %v4329_v55 = vld [vmem:[#allocation4 + $0x28] sm:$0xff] }
 0x976   : > { %4317 = vst.msk [vmem:[#allocation4 + $0x48] sm:$0xff] %vm3015_vm8, %v4301_v56  ;;  %v4332_v56 = vld [vmem:[#allocation4 + $0x40] sm:$0xff] }
 0x977   : > { %4320 = vst.msk [vmem:[#allocation4 + $0x60] sm:$0xff] %vm3015_vm8, %v4304_v19  ;;  %v4274_v40 = vpop.permute.xlu1 %4273 }
 0x978   : > { %v4303_v35 = vmul.f32 %v4274_v40, %v4223_v50  ;;  %v4286_v1 = vpop.permute.xlu0 %4285 }
 0x979   : > { %v4306_v42 = vmul.f32 %v4286_v1, %v4226_v28  ;;  %v4331_v17 = vld [vmem:[#allocation4 + $0x38] sm:$0xff] }
 0x97a   : > { %4319 = vst.msk [vmem:[#allocation4 + $0x58] sm:$0xff] %vm3015_vm8, %v4303_v35 }
 0x97b   : > { %4322 = vst.msk [vmem:[#allocation4 + $0x70] sm:$0xff] %vm3015_vm8, %v4306_v42  ;;  %v4282_v22 = vpop.permute.xlu1 %4281 }
 0x97c   : > { %v4305_v43 = vmul.f32 %v4282_v22, %v4225_v18 }
 0x97d   : > { %v4342_v3 = vpop.permute.xlu0 %4341  ;;  %v4333_v29 = vld [vmem:[#allocation4 + $0x48] sm:$0xff] }
 0x97e   : > { %4321 = vst.msk [vmem:[#allocation4 + $0x68] sm:$0xff] %vm3015_vm8, %v4305_v43  ;;  %v4404_v23 = vmul.f32 %v4342_v3, %v4324_v39  ;;  %v4334_v3 = vld [vmem:[#allocation4 + $0x50] sm:$0xff] }
 0x97f   : > { %v4290_v11 = vpop.permute.xlu1 %4289 }
 0x980   : > { %4420 = vst.msk [vmem:[#allocation4] sm:$0xff] %vm3870_vm9, %v4404_v23  ;;  %v4307_v41 = vmul.f32 %v4290_v11, %v4227_v0 }
 0x981   : > { %v4354_v38 = vpop.permute.xlu0 %4353  ;;  %v4335_v14 = vld [vmem:[#allocation4 + $0x58] sm:$0xff] }
 0x982   : > { %4323 = vst.msk [vmem:[#allocation4 + $0x78] sm:$0xff] %vm3015_vm8, %v4307_v41  ;;  %v4407_v20 = vmul.f32 %v4354_v38, %v4327_v15 }
 0x984   : > { %4423 = vst.msk [vmem:[#allocation4 + $0x18] sm:$0xff] %vm3870_vm9, %v4407_v20  ;;  %v4346_v60 = vpop.permute.xlu1 %4345 }
 0x985   : > { %v4405_v57 = vmul.f32 %v4346_v60, %v4325_v52  ;;  %v4362_v32 = vpop.permute.xlu0 %4361  ;;  %v4337_v19 = vld [vmem:[#allocation4 + $0x68] sm:$0xff] }
 0x986   : > { %v4409_v21 = vmul.f32 %v4362_v32, %v4329_v55 }
 0x987   : > { %v4436_v8 = vld [vmem:[#allocation4] sm:$0xff]  ;;  %4421 = vst.msk [vmem:[#allocation4 + $0x8] sm:$0xff] %vm3870_vm9, %v4405_v57 }
 0x988   : > { %v8282_v27 = vadd.f32 %v8278_v45, %v4436_v8  ;;  %4425 = vst.msk [vmem:[#allocation4 + $0x28] sm:$0xff] %vm3870_vm9, %v4409_v21  ;;  %v4350_v37 = vpop.permute.xlu1 %4349 }
 0x989   : > { %v4406_v30 = vmul.f32 %v4350_v37, %v4326_v33  ;;  %v4370_v48 = vpop.permute.xlu0 %4369  ;;  %v4339_v60 = vld [vmem:[#allocation4 + $0x78] sm:$0xff]  ;;  %v4336_v33 = vld [vmem:[#allocation4 + $0x60] sm:$0xff] }
 0x98a   : > { %v4490_v12 = vmul.f32 1.442695, %v8282_v27  ;;  %v4411_v31 = vmul.f32 %v4370_v48, %v4331_v17  ;;  %vm4474_vm4 = vcmp.gt.f32.partialorder %v8282_v27, 0.0 }
 0x98b   : > { %v4439_v34 = vld [vmem:[#allocation4 + $0x18] sm:$0xff]  ;;  %4422 = vst.msk [vmem:[#allocation4 + $0x10] sm:$0xff] %vm3870_vm9, %v4406_v30 }
 0x98c   : > { %5561 = vpow2.f32 %v4490_v12  ;;  %v8288_v5 = vadd.f32 %v8278_v45, %v4439_v34  ;;  %4427 = vst.msk [vmem:[#allocation4 + $0x38] sm:$0xff] %vm3870_vm9, %v4411_v31  ;;  %v4358_v24 = vpop.permute.xlu1 %4357 }
 0x98d   : > { %v4408_v53 = vmul.f32 %v4358_v24, %v4328_v47  ;;  %v4378_v49 = vpop.permute.xlu0 %4377 }
 0x98e   : > { %v4496_v26 = vmul.f32 1.442695, %v8288_v5  ;;  %v4437_v4 = vld [vmem:[#allocation4 + $0x8] sm:$0xff]  ;;  %v4413_v44 = vmul.f32 %v4378_v49, %v4333_v29  ;;  %vm4477_vm6 = vcmp.gt.f32.partialorder %v8288_v5, 0.0 }
 0x98f   : > { %v8293_v58 = vadd.f32 %v8278_v45, %v4437_v4  ;;  %v4441_v25 = vld [vmem:[#allocation4 + $0x28] sm:$0xff]  ;;  %4424 = vst.msk [vmem:[#allocation4 + $0x20] sm:$0xff] %vm3870_vm9, %v4408_v53 }
 0x990   : > { %5563 = vpow2.f32 %v4496_v26  ;;  %v8297_v63 = vadd.f32 %v8278_v45, %v4441_v25  ;;  %4429 = vst.msk [vmem:[#allocation4 + $0x48] sm:$0xff] %vm3870_vm9, %v4413_v44  ;;  %v4366_v13 = vpop.permute.xlu1 %4365 }
 0x991   : > { %v4492_v2 = vmul.f32 1.442695, %v8293_v58  ;;  %v4410_v59 = vmul.f32 %v4366_v13, %v4330_v16  ;;  %v4386_v10 = vpop.permute.xlu0 %4385  ;;  %vm4475_vm8 = vcmp.gt.f32.partialorder %v8293_v58, 0.0 }
 0x992   : > { %v4500_v62 = vmul.f32 1.442695, %v8297_v63  ;;  %v4438_v61 = vld [vmem:[#allocation4 + $0x10] sm:$0xff]  ;;  %v4415_v9 = vmul.f32 %v4386_v10, %v4335_v14  ;;  %vm4479_vm14 = vcmp.gt.f32.partialorder %v8297_v63, 0.0 }
 0x993   : > { %5565 = vpow2.f32 %v4492_v2  ;;  %v8303_v7 = vadd.f32 %v8278_v45, %v4438_v61  ;;  %v4443_v46 = vld [vmem:[#allocation4 + $0x38] sm:$0xff]  ;;  %4426 = vst.msk [vmem:[#allocation4 + $0x30] sm:$0xff] %vm3870_vm9, %v4410_v59 }
 0x994   : > { %5567 = vpow2.f32 %v4500_v62  ;;  %v8307_v36 = vadd.f32 %v8278_v45, %v4443_v46  ;;  %4431 = vst.msk [vmem:[#allocation4 + $0x58] sm:$0xff] %vm3870_vm9, %v4415_v9  ;;  %v4374_v51 = vpop.permute.xlu1 %4373 }
 0x995   : > { %v4494_v6 = vmul.f32 1.442695, %v8303_v7  ;;  %v4412_v54 = vmul.f32 %v4374_v51, %v4332_v56  ;;  %v4394_v40 = vpop.permute.xlu0 %4393  ;;  %vm4476_vm0 = vcmp.gt.f32.partialorder %v8303_v7, 0.0 }
 0x996   : > { %v5562_v50 = vpop.eup %5561  ;;  %v4504_v35 = vmul.f32 1.442695, %v8307_v36  ;;  %v4440_v28 = vld [vmem:[#allocation4 + $0x20] sm:$0xff]  ;;  %v4417_v1 = vmul.f32 %v4394_v40, %v4337_v19  ;;  %vm4481_vm1 = vcmp.gt.f32.partialorder %v8307_v36, 0.0 }
 0x997   : > { %v4871_v42 = vadd.f32 -1.0, %v5562_v50  ;;  %5569 = vpow2.f32 %v4494_v6  ;;  %v8313_v22 = vadd.f32 %v8278_v45, %v4440_v28  ;;  %v4445_v18 = vld [vmem:[#allocation4 + $0x48] sm:$0xff]  ;;  %4428 = vst.msk [vmem:[#allocation4 + $0x40] sm:$0xff] %vm3870_vm9, %v4412_v54 }
 0x998   : > { %5571 = vpow2.f32 %v4504_v35  ;;  %v8318_v43 = vadd.f32 %v8278_v45, %v4445_v18  ;;  %4433 = vst.msk [vmem:[#allocation4 + $0x68] sm:$0xff] %vm3870_vm9, %v4417_v1  ;;  %v4382_v39 = vpop.permute.xlu1 %4381 }
 0x999   : > { %v8322_v23 = vsel %vm4474_vm4, %v8282_v27, %v4871_v42  ;;  %v4498_v11 = vmul.f32 1.442695, %v8313_v22  ;;  %v4414_v0 = vmul.f32 %v4382_v39, %v4334_v3  ;;  %v4402_v41 = vpop.permute.xlu0 %4401  ;;  %vm4478_vm2 = vcmp.gt.f32.partialorder %v8313_v22, 0.0 }
 0x99a   : > { %v5564_v15 = vpop.eup %5563  ;;  %v4570_v38 = vmul.f32 1.442695, %v8322_v23  ;;  %v4508_v20 = vmul.f32 1.442695, %v8318_v43  ;;  %v4442_v57 = vld [vmem:[#allocation4 + $0x30] sm:$0xff]  ;;  %v4419_v32 = vmul.f32 %v4402_v41, %v4339_v60  ;;  %vm4554_vm3 = vcmp.gt.f32.partialorder %v8322_v23, 0.0 }
 0x99b   : > { %v4874_v52 = vadd.f32 -1.0, %v5564_v15  ;;  %5573 = vpow2.f32 %v4498_v11  ;;  %v4447_v55 = vld [vmem:[#allocation4 + $0x58] sm:$0xff]  ;;  %4430 = vst.msk [vmem:[#allocation4 + $0x50] sm:$0xff] %vm3870_vm9, %v4414_v0  ;;  %v8330_v21 = vadd.f32 %v8278_v45, %v4442_v57  ;;  %vm4483_vm5 = vcmp.gt.f32.partialorder %v8318_v43, 0.0  ;;  %v4338_v0 = vld [vmem:[#allocation4 + $0x70] sm:$0xff] }
 0x99c   : > { %5575 = vpow2.f32 %v4570_v38  ;;  %v8333_v8 = vadd.f32 %v8278_v45, %v4447_v55  ;;  %v4390_v27 = vpop.permute.xlu1 %4389  ;;  %4435 = vst.msk [vmem:[#allocation4 + $0x78] sm:$0xff] %vm3870_vm9, %v4419_v32 }
 0x99d   : > { %v5566_v37 = vpop.eup %5565  ;;  %v8336_v30 = vsel %vm4477_vm6, %v8288_v5, %v4874_v52  ;;  %5577 = vpow2.f32 %v4508_v20  ;;  %v4416_v17 = vmul.f32 %v4390_v27, %v4336_v33  ;;  %v4502_v47 = vmul.f32 1.442695, %v8330_v21 }
 0x99e   : > { %v5568_v48 = vpop.eup %5567  ;;  %v4576_v12 = vmul.f32 1.442695, %v8336_v30  ;;  %v4872_v31 = vadd.f32 -1.0, %v5566_v37  ;;  %v4444_v34 = vld [vmem:[#allocation4 + $0x40] sm:$0xff]  ;;  %v4512_v53 = vmul.f32 1.442695, %v8333_v8 }
 0x99f   : > { %v4876_v24 = vadd.f32 -1.0, %v5568_v48  ;;  %4432 = vst.msk [vmem:[#allocation4 + $0x60] sm:$0xff] %vm3870_vm9, %v4416_v17  ;;  %v8349_v29 = vadd.f32 %v8278_v45, %v4444_v34  ;;  %v4449_v44 = vld [vmem:[#allocation4 + $0x68] sm:$0xff]  ;;  %vm4557_vm7 = vcmp.gt.f32.partialorder %v8336_v30, 0.0  ;;  %vm4480_vm10 = vcmp.gt.f32.partialorder %v8330_v21, 0.0 }
 0x9a0   : > { %5579 = vpow2.f32 %v4576_v12  ;;  %v8345_v5 = vsel %vm4475_vm8, %v8293_v58, %v4872_v31  ;;  %v8363_v14 = vadd.f32 %v8278_v45, %v4449_v44  ;;  %v4398_v39 = vpop.permute.xlu1 %4397  ;;  %vm4485_vm11 = vcmp.gt.f32.partialorder %v8333_v8, 0.0 }
 0x9a1   : > { %v5570_v49 = vpop.eup %5569  ;;  %v4572_v26 = vmul.f32 1.442695, %v8345_v5  ;;  %v8353_v4 = vsel %vm4479_vm14, %v8297_v63, %v4876_v24  ;;  %5581 = vpow2.f32 %v4502_v47  ;;  %v4506_v59 = vmul.f32 1.442695, %v8349_v29 }
 0x9a2   : > { %v5572_v25 = vpop.eup %5571  ;;  %v4580_v13 = vmul.f32 1.442695, %v8353_v4  ;;  %v4873_v58 = vadd.f32 -1.0, %v5570_v49  ;;  %5583 = vpow2.f32 %v4512_v53  ;;  %v4446_v16 = vld [vmem:[#allocation4 + $0x50] sm:$0xff]  ;;  %v4516_v54 = vmul.f32 1.442695, %v8363_v14 }
 0x9a3   : > { %5585 = vpow2.f32 %v4572_v26  ;;  %v4878_v2 = vadd.f32 -1.0, %v5572_v25  ;;  %v8366_v10 = vadd.f32 %v8278_v45, %v4446_v16  ;;  %vm4555_vm12 = vcmp.gt.f32.partialorder %v8345_v5, 0.0 }
 0x9a4   : > { %5587 = vpow2.f32 %v4580_v13  ;;  %v8360_v63 = vsel %vm4476_vm0, %v8303_v7, %v4873_v58  ;;  %vm4559_vm13 = vcmp.gt.f32.partialorder %v8353_v4, 0.0  ;;  %v4418_v57 = vmul.f32 %v4398_v39, %v4338_v0 }
 0x9a5   : > { %v5574_v62 = vpop.eup %5573  ;;  %v4574_v61 = vmul.f32 1.442695, %v8360_v63  ;;  %v8370_v9 = vsel %vm4481_vm1, %v8307_v36, %v4878_v2  ;;  %5589 = vpow2.f32 %v4506_v59  ;;  %v4451_v36 = vld [vmem:[#allocation4 + $0x78] sm:$0xff]  ;;  %v4510_v50 = vmul.f32 1.442695, %v8366_v10 }
 0x9a6   : > { %v5576_v46 = vpop.eup %5575  ;;  %v4584_v7 = vmul.f32 1.442695, %v8370_v9  ;;  %v4875_v51 = vadd.f32 -1.0, %v5574_v62  ;;  %v4448_v38 = vld [vmem:[#allocation4 + $0x60] sm:$0xff]  ;;  %4434 = vst.msk [vmem:[#allocation4 + $0x70] sm:$0xff] %vm3870_vm9, %v4418_v57  ;;  %vm4482_vm4 = vcmp.gt.f32.partialorder %v8349_v29, 0.0 }
 0x9a7   : > { %v5578_v56 = vpop.eup %5577  ;;  %v4887_v6 = vadd.f32 -1.0, %v5576_v46  ;;  %5591 = vpow2.f32 %v4574_v61  ;;  %v8415_v12 = vadd.f32 %v8278_v45, %v4448_v38  ;;  %vm4556_vm9 = vcmp.gt.f32.partialorder %v8360_v63, 0.0 }
 0x9a8   : > { %5593 = vpow2.f32 %v4584_v7  ;;  %v8379_v19 = vsel %vm4478_vm2, %v8313_v22, %v4875_v51  ;;  %v4880_v40 = vadd.f32 -1.0, %v5578_v56  ;;  %v8391_v22 = vadd.f32 %v8278_v45, %v4451_v36 }
 0x9a9   : > { %v4618_v35 = vsel %vm4554_vm3, %v8322_v23, %v4887_v6  ;;  %v4578_v28 = vmul.f32 1.442695, %v8379_v19  ;;  %5595 = vpow2.f32 %v4516_v54  ;;  %vm4561_vm6 = vcmp.gt.f32.partialorder %v8370_v9, 0.0 }
 0x9aa   : > { %v5580_v1 = vpop.eup %5579  ;;  %v4922_v42 = vpack.c.bf16 %v4618_v35, %v4618_v35  ;;  %v8388_v18 = vsel %vm4483_vm5, %v8318_v43, %v4880_v40  ;;  %5597 = vpow2.f32 %v4510_v50  ;;  %v4520_v15 = vmul.f32 1.442695, %v8391_v22 }
 0x9ab   : > { %v5582_v3 = vpop.eup %5581  ;;  %v4890_v23 = vadd.f32 -1.0, %v5580_v1  ;;  %5599 = vpow2.f32 %v4578_v28  ;;  %v4588_v11 = vmul.f32 1.442695, %v8388_v18  ;;  %vm4487_vm8 = vcmp.gt.f32.partialorder %v8363_v14, 0.0 }
 0x9ac   : > { %v5584_v41 = vpop.eup %5583  ;;  %4699 = vst.msk [vmem:[%s5812_s29] sm:$0xf] %vm4698_vm15, %v4922_v42  ;;  %v4877_v43 = vadd.f32 -1.0, %v5582_v3  ;;  %vm4484_vm14 = vcmp.gt.f32.partialorder %v8366_v10, 0.0  ;;  %vm4558_vm0 = vcmp.gt.f32.partialorder %v8379_v19, 0.0  ;;  %vm4563_vm1 = vcmp.gt.f32.partialorder %v8388_v18, 0.0 }
 0x9ad   : > { %v5586_v20 = vpop.eup %5585  ;;  %v4621_v60 = vsel %vm4557_vm7, %v8336_v30, %v4890_v23  ;;  %5601 = vpow2.f32 %v4588_v11  ;;  %v4882_v52 = vadd.f32 -1.0, %v5584_v41  ;;  %v4450_v56 = vld [vmem:[#allocation4 + $0x70] sm:$0xff]  ;;  %vm4489_vm2 = vcmp.gt.f32.partialorder %v8391_v22, 0.0 }
 0x9ae   : > { %v5588_v55 = vpop.eup %5587  ;;  %v4925_v32 = vpack.c.bf16 %v4621_v60, %v4621_v60  ;;  %v4888_v27 = vadd.f32 -1.0, %v5586_v20  ;;  %v8406_v33 = vsel %vm4480_vm10, %v8330_v21, %v4877_v43  ;;  %5603 = vpow2.f32 %v4520_v15 }
 0x9af   : > { %v5590_v37 = vpop.eup %5589  ;;  %v4892_v17 = vadd.f32 -1.0, %v5588_v55  ;;  %v4582_v48 = vmul.f32 1.442695, %v8406_v33  ;;  %v8412_v30 = vsel %vm4485_vm11, %v8333_v8, %v4882_v52  ;;  %v4472_v36 = vadd.f32 %v8278_v45, %v4450_v56 }
 0x9b0   : > { %4702 = vst.msk [vmem:[%s5812_s29 + $0xc] sm:$0xf] %vm4698_vm15, %v4925_v32  ;;  %v4619_v21 = vsel %vm4555_vm12, %v8345_v5, %v4888_v27  ;;  %v4592_v31 = vmul.f32 1.442695, %v8412_v30  ;;  %v4879_v34 = vadd.f32 -1.0, %v5590_v37  ;;  %vm4560_vm3 = vcmp.gt.f32.partialorder %v8406_v33, 0.0 }
 0x9b1   : > { %v5592_v24 = vpop.eup %5591  ;;  %v4923_v8 = vpack.c.bf16 %v4619_v21, %v4619_v21  ;;  %v4623_v47 = vsel %vm4559_vm13, %v8353_v4, %v4892_v17  ;;  %5605 = vpow2.f32 %v4582_v48  ;;  %v4514_v4 = vmul.f32 1.442695, %v8415_v12 }
 0x9b2   : > { %v5594_v53 = vpop.eup %5593  ;;  %v4927_v49 = vpack.c.bf16 %v4623_v47, %v4623_v47  ;;  %v4889_v26 = vadd.f32 -1.0, %v5592_v24  ;;  %5607 = vpow2.f32 %v4592_v31  ;;  %v8430_v5 = vsel %vm4482_vm4, %v8349_v29, %v4879_v34 }
 0x9b3   : > { %v5596_v44 = vpop.eup %5595  ;;  %4700 = vst.msk [vmem:[%s5812_s29 + $0x4] sm:$0xf] %vm4698_vm15, %v4923_v8  ;;  %v4894_v25 = vadd.f32 -1.0, %v5594_v53  ;;  %v4586_v13 = vmul.f32 1.442695, %v8430_v5  ;;  %vm4565_vm5 = vcmp.gt.f32.partialorder %v8412_v30, 0.0 }
 0x9b4   : > { %v5598_v58 = vpop.eup %5597  ;;  %4704 = vst.msk [vmem:[%s5812_s29 + $0x14] sm:$0xf] %vm4698_vm15, %v4927_v49  ;;  %v4620_v16 = vsel %vm4556_vm9, %v8360_v63, %v4889_v26  ;;  %v4884_v29 = vadd.f32 -1.0, %v5596_v44  ;;  %vm4562_vm7 = vcmp.gt.f32.partialorder %v8430_v5, 0.0  ;;  %vm4486_vm10 = vcmp.gt.f32.partialorder %v8415_v12, 0.0 }
 0x9b5   : > { %v5600_v2 = vpop.eup %5599  ;;  %v4924_v59 = vpack.c.bf16 %v4620_v16, %v4620_v16  ;;  %v4625_v62 = vsel %vm4561_vm6, %v8370_v9, %v4894_v25  ;;  %5609 = vpow2.f32 %v4586_v13  ;;  %v4881_v61 = vadd.f32 -1.0, %v5598_v58 }
 0x9b6   : > { %v4929_v46 = vpack.c.bf16 %v4625_v62, %v4625_v62  ;;  %v4891_v7 = vadd.f32 -1.0, %v5600_v2  ;;  %v4551_v51 = vsel %vm4487_vm8, %v8363_v14, %v4884_v29  ;;  %5611 = vpow2.f32 %v4514_v4 }
 0x9b7   : > { %v5602_v6 = vpop.eup %5601  ;;  %4701 = vst.msk [vmem:[%s5812_s29 + $0x8] sm:$0xf] %vm4698_vm15, %v4924_v59  ;;  %v4596_v63 = vmul.f32 1.442695, %v4551_v51  ;;  %v4548_v54 = vsel %vm4484_vm14, %v8366_v10, %v4881_v61  ;;  %v4518_v10 = vmul.f32 1.442695, %v4472_v36 }
 0x9b8   : > { %v5604_v9 = vpop.eup %5603  ;;  %4706 = vst.msk [vmem:[%s5812_s29 + $0x1c] sm:$0xf] %vm4698_vm15, %v4929_v46  ;;  %v4622_v40 = vsel %vm4558_vm0, %v8379_v19, %v4891_v7  ;;  %v4896_v50 = vadd.f32 -1.0, %v5602_v6  ;;  %v4590_v14 = vmul.f32 1.442695, %v4548_v54  ;;  %vm4567_vm11 = vcmp.gt.f32.partialorder %v4551_v51, 0.0 }
 0x9b9   : > { %v4926_v35 = vpack.c.bf16 %v4622_v40, %v4622_v40  ;;  %5613 = vpow2.f32 %v4596_v63  ;;  %v4886_v28 = vadd.f32 -1.0, %v5604_v9  ;;  %vm4564_vm12 = vcmp.gt.f32.partialorder %v4548_v54, 0.0 }
 0x9ba   : > { %v4627_v1 = vsel %vm4563_vm1, %v8388_v18, %v4896_v50  ;;  %5615 = vpow2.f32 %v4590_v14  ;;  %vm4488_vm13 = vcmp.gt.f32.partialorder %v4472_v36, 0.0 }
 0x9bb   : > { %v5606_v45 = vpop.eup %5605  ;;  %4703 = vst.msk [vmem:[%s5812_s29 + $0x10] sm:$0xf] %vm4698_vm15, %v4926_v35  ;;  %v4931_v42 = vpack.c.bf16 %v4627_v1, %v4627_v1  ;;  %v4553_v19 = vsel %vm4489_vm2, %v8391_v22, %v4886_v28  ;;  %5617 = vpow2.f32 %v4518_v10 }
 0x9bc   : > { %v5608_v39 = vpop.eup %5607  ;;  %v4893_v3 = vadd.f32 -1.0, %v5606_v45  ;;  %v4600_v23 = vmul.f32 1.442695, %v4553_v19  ;;  %vm4569_vm4 = vcmp.gt.f32.partialorder %v4553_v19, 0.0 }
 0x9bd   : > { %4708 = vst.msk [vmem:[%s5812_s29 + $0x24] sm:$0xf] %vm4698_vm15, %v4931_v42  ;;  %v4898_v18 = vadd.f32 -1.0, %v5608_v39 }
 0x9be   : > { %v4624_v11 = vsel %vm4560_vm3, %v8406_v33, %v4893_v3  ;;  %5619 = vpow2.f32 %v4600_v23 }
 0x9bf   : > { %v5610_v0 = vpop.eup %5609  ;;  %v4928_v41 = vpack.c.bf16 %v4624_v11, %v4624_v11  ;;  %v4629_v22 = vsel %vm4565_vm5, %v8412_v30, %v4898_v18 }
 0x9c0   : > { %v5612_v43 = vpop.eup %5611  ;;  %v4933_v15 = vpack.c.bf16 %v4629_v22, %v4629_v22  ;;  %v4895_v38 = vadd.f32 -1.0, %v5610_v0 }
 0x9c1   : > { %4705 = vst.msk [vmem:[%s5812_s29 + $0x18] sm:$0xf] %vm4698_vm15, %v4928_v41  ;;  %v4883_v20 = vadd.f32 -1.0, %v5612_v43 }
 0x9c2   : > { %4710 = vst.msk [vmem:[%s5812_s29 + $0x2c] sm:$0xf] %vm4698_vm15, %v4933_v15  ;;  %v4626_v60 = vsel %vm4562_vm7, %v8430_v5, %v4895_v38 }
 0x9c3   : > { %v5614_v52 = vpop.eup %5613  ;;  %v4930_v57 = vpack.c.bf16 %v4626_v60, %v4626_v60  ;;  %v4550_v55 = vsel %vm4486_vm10, %v8415_v12, %v4883_v20 }
 0x9c4   : > { %v5616_v32 = vpop.eup %5615  ;;  %v4900_v27 = vadd.f32 -1.0, %v5614_v52  ;;  %v4594_v33 = vmul.f32 1.442695, %v4550_v55  ;;  %vm4566_vm9 = vcmp.gt.f32.partialorder %v4550_v55, 0.0 }
 0x9c5   : > { %4707 = vst.msk [vmem:[%s5812_s29 + $0x20] sm:$0xf] %vm4698_vm15, %v4930_v57  ;;  %v4897_v37 = vadd.f32 -1.0, %v5616_v32  ;;  %v5618_v17 = vpop.eup %5617 }
 0x9c6   : > { %v4631_v48 = vsel %vm4567_vm11, %v4551_v51, %v4900_v27  ;;  %5621 = vpow2.f32 %v4594_v33  ;;  %v4885_v31 = vadd.f32 -1.0, %v5618_v17 }
 0x9c7   : > { %v4935_v30 = vpack.c.bf16 %v4631_v48, %v4631_v48  ;;  %v4628_v21 = vsel %vm4564_vm12, %v4548_v54, %v4897_v37 }
 0x9c8   : > { %v5620_v34 = vpop.eup %5619  ;;  %v4932_v24 = vpack.c.bf16 %v4628_v21, %v4628_v21  ;;  %v4552_v8 = vsel %vm4488_vm13, %v4472_v36, %v4885_v31 }
 0x9c9   : > { %4712 = vst.msk [vmem:[%s5812_s29 + $0x34] sm:$0xf] %vm4698_vm15, %v4935_v30  ;;  %v4902_v12 = vadd.f32 -1.0, %v5620_v34  ;;  %v4598_v47 = vmul.f32 1.442695, %v4552_v8  ;;  %vm4568_vm6 = vcmp.gt.f32.partialorder %v4552_v8, 0.0 }
 0x9ca   : > { %4709 = vst.msk [vmem:[%s5812_s29 + $0x28] sm:$0xf] %vm4698_vm15, %v4932_v24 }
 0x9cb   : > { %v4633_v53 = vsel %vm4569_vm4, %v4553_v19, %v4902_v12  ;;  %5623 = vpow2.f32 %v4598_v47 }
 0x9cc   : > { %v4937_v49 = vpack.c.bf16 %v4633_v53, %v4633_v53 }
 0x9ce   : > { %4714 = vst.msk [vmem:[%s5812_s29 + $0x3c] sm:$0xf] %vm4698_vm15, %v4937_v49 }
 0x9d0   : > { %v5622_v26 = vpop.eup %5621 }
 0x9d1   : > { %v4899_v5 = vadd.f32 -1.0, %v5622_v26 }
 0x9d3   : > { %v4630_v44 = vsel %vm4566_vm9, %v4550_v55, %v4899_v5 }
 0x9d4   : > { %v4934_v25 = vpack.c.bf16 %v4630_v44, %v4630_v44 }
 0x9d5   : > { %v5624_v13 = vpop.eup %5623 }
 0x9d6   : > { %4711 = vst.msk [vmem:[%s5812_s29 + $0x30] sm:$0xf] %vm4698_vm15, %v4934_v25  ;;  %v4901_v4 = vadd.f32 -1.0, %v5624_v13 }
 0x9d8   : > { %v4632_v58 = vsel %vm4568_vm6, %v4552_v8, %v4901_v4 }
 0x9d9   : > { %v4936_v16 = vpack.c.bf16 %v4632_v58, %v4632_v58 }
 0x9db   : > { %4713 = vst.msk [vmem:[%s5812_s29 + $0x38] sm:$0xf] %vm4698_vm15, %v4936_v16 }
 0x9dc PF: > { %s15_s24 = sadd.s32 1, %s5679_s24   ;;  %s8958_s18 = smov %s5659_s19 }
 0x9dd   : > { %p12_p1 = scmp.ge.s32.totalorder %s15_s24, 6   ;;  %s8959_s19 = smov %s5778_s6 }
 0x9de   : > { %s8960_s20 = smov %s5671_s22  ;;  %s8961_s21 = smov %s5675_s23 }
 0x9df   : > { %s8962_s22 = smov %s8965_s25  ;;  %s8963_s23 = smov %s8969_s26 }
 0x9e0   :  { %14 = sbr.rel (!%p12_p1) target bundleno = 6 (0x6), region = 130 }

</bundles_post_ra>
